<compile_context>
chip_gen: v7x
topology: tpu7x:2x2x1
jax: 0.10.0
libtpu: 0.0.40
codegen_flags: <defaults>
</compile_context>

<pallas_src>
import functools

import jax
import jax.numpy as jnp
from jax.experimental import pallas as pl
from jax.experimental.pallas import tpu as pltpu

NEG_BIG = -1e30


def _round_up(x, m):
    return ((x + m - 1) // m) * m


def _pick_tiles(n_pad):
    # Row tiles: keep >= 2 tiles when possible (v7x has 2 TensorCores and the
    # row axis is the "parallel" grid axis); cap at 256 rows per tile.
    tile_m = min(256, max(64, n_pad // 2))
    if n_pad % tile_m != 0:
        tile_m = 128          # n_pad is always a multiple of 128
    # Column (neighbor) tiles for the flash-style inner loop.
    if n_pad <= 512:
        tile_k = n_pad
    else:
        tile_k = max(t for t in (512, 384, 256, 128) if n_pad % t == 0)
    return tile_m, tile_k


def _pick_vmem_limit():
    # Generation-aware scoped-VMEM limit: ~3/4 of physical (96 MiB on the
    # 128-MiB v5e/v6e, 48 MiB on the 64-MiB v7x), conservative fallback.
    try:
        cap = pltpu.get_tpu_info().vmem_capacity_bytes
    except Exception:
        cap = 64 * 1024 * 1024
    return int(min(cap * 3 // 4, 100 * 1024 * 1024))


def _fused_kernel(e_src_ref, e_dst_ref, h_ref, b_ref, mask_ref,
                  out_ref, out_pos_ref, out_neg_ref,
                  m_sc, d_pos_sc, d_neg_sc, acc_pos_sc, acc_neg_sc,
                  *, alpha, nheads, dim_out):
    """One (row tile, column tile) step; all heads fused, online softmax."""
    k = pl.program_id(1)
    nk = pl.num_programs(1)
    tm = e_src_ref.shape[0]

    @pl.when(k == 0)
    def _():
        m_sc[...] = jnp.full(m_sc.shape, NEG_BIG, m_sc.dtype)
        d_pos_sc[...] = jnp.zeros_like(d_pos_sc)
        d_neg_sc[...] = jnp.zeros_like(d_neg_sc)
        acc_pos_sc[...] = jnp.zeros_like(acc_pos_sc)
        acc_neg_sc[...] = jnp.zeros_like(acc_neg_sc)

    e_src = e_src_ref[...]                              # (tm, Hp)   f32
    e_dst = e_dst_ref[...]                              # (Hp, tk)   f32

    # Unpack the bit-packed adjacency once per column tile (shared by heads).
    mi = mask_ref[...].astype(jnp.int32)                # (tm, tk)
    pos_mask = (mi & 1).astype(jnp.float32)
    neg_mask = ((mi >> 1) & 1).astype(jnp.float32)
    union = mi != 0                                     # contributes to either softmax

    # TODO(synk): on v6e/v7x the elementwise score math below could run in bf16
    # for ~2x VPU throughput; kept f32 for robustness across all generations.
    for hd in range(nheads):
        e = e_src[:, hd:hd + 1] + e_dst[hd:hd + 1, :]   # (tm, tk)
        e = jnp.where(e > 0, e, alpha * e)              # LeakyReLU
        l = jnp.where(union, e, NEG_BIG)                # only neighbor scores feed the max

        # Online softmax (shared max / shared exp for pos and neg).
        m_old = m_sc[hd]                                # (tm, 1)
        m_new = jnp.maximum(m_old, jnp.max(l, axis=-1, keepdims=True))
        scale = jnp.exp(m_old - m_new)                  # (tm, 1)
        expe = jnp.exp(l - m_new)                       # (tm, tk), <= 1
        p_pos = expe * pos_mask
        p_neg = expe * neg_mask

        # One MXU matmul per head for BOTH signs (stacked along M), unnormalised.
        p_both = jnp.concatenate([p_pos, p_neg], axis=0).astype(jnp.bfloat16)
        agg = jnp.dot(p_both, h_ref[hd],
                      preferred_element_type=jnp.float32)        # (2*tm, Dout)

        acc_pos_sc[hd] = scale * acc_pos_sc[hd] + agg[:tm]
        acc_neg_sc[hd] = scale * acc_neg_sc[hd] + agg[tm:]
        d_pos_sc[hd] = scale * d_pos_sc[hd] + jnp.sum(p_pos, axis=-1, keepdims=True)
        d_neg_sc[hd] = scale * d_neg_sc[hd] + jnp.sum(p_neg, axis=-1, keepdims=True)
        m_sc[hd] = m_new

    @pl.when(k == nk - 1)
    def _():
        bias = b_ref[...]                               # (1, H*Dout)
        parts_pos, parts_neg = [], []
        for hd in range(nheads):
            d_p = d_pos_sc[hd]
            d_n = d_neg_sc[hd]
            inv_p = pl.reciprocal(jnp.where(d_p > 0, d_p, 1.0), approx=True)
            inv_n = pl.reciprocal(jnp.where(d_n > 0, d_n, 1.0), approx=True)
            parts_pos.append(acc_pos_sc[hd] * inv_p)    # normalise AFTER aggregation
            parts_neg.append(acc_neg_sc[hd] * inv_n)
        # Head concat along features == torch.cat(..., dim=1); lane-dense store.
        res_pos = jnp.concatenate(parts_pos, axis=-1) + bias
        res_neg = jnp.concatenate(parts_neg, axis=-1) + bias
        out_ref[...] = jnp.maximum(res_pos - res_neg, 0.0)
        out_pos_ref[...] = jnp.maximum(res_pos, 0.0)
        out_neg_ref[...] = jnp.maximum(res_neg, 0.0)


def layer_aggregator_forward(node_reps, adj_pos, adj_neg, params, *, alpha=0.2):
    """Pallas implementation of LayerAggregator.forward (last_layer=False path)."""
    N, dim_in = node_reps.shape
    W = params["W"].astype(jnp.float32)               # (H, Din, Dout)
    nheads, _, dim_out = W.shape
    d_all = nheads * dim_out
    h_pad = max(8, nheads)

    # --- glue identical to the PyTorch forward ------------------------------
    self_idx = jnp.arange(N, dtype=adj_pos.dtype)
    adj_pos2 = jnp.concatenate([adj_pos, jnp.stack([self_idx, self_idx])], axis=1)
    # node_reps[row_indices_self] is an identity gather -> no-op.

    n_pad = _round_up(N, 128)
    tile_m, tile_k = _pick_tiles(n_pad)
    grid_m, grid_k = n_pad // tile_m, n_pad // tile_k

    x = jnp.zeros((n_pad, dim_in), jnp.float32).at[:N].set(
        node_reps.astype(jnp.float32))

    # ---- grid-invariant heavy compute hoisted out of the kernel ------------
    # Per-head projections, head-major so the kernel indexes h_ref[hd] (no
    # lane-slicing of a fused (N, H*Dout) block).
    h_all = jnp.einsum("nd,hdo->hno", x, W).astype(jnp.bfloat16)   # (H, N_pad, Dout)
    # Folded GAT score terms: e_src[i,h] = x_i @ (W_h a_src_h), similarly dst.
    c_src = jnp.einsum("hio,ho->ih", W, params["a_src"][:, 0, :].astype(jnp.float32))
    c_dst = jnp.einsum("hio,ho->ih", W, params["a_dst"][:, 0, :].astype(jnp.float32))
    e_src = jnp.zeros((n_pad, h_pad), jnp.float32).at[:, :nheads].set(x @ c_src)
    e_dst_t = jnp.zeros((h_pad, n_pad), jnp.float32).at[:nheads, :].set((x @ c_dst).T)

    bias_all = params["bias"][:, 0, :].reshape(1, d_all).astype(jnp.float32)

    # One bit-packed int8 adjacency mask: bit0 = pos (+ self loops), bit1 = neg.
    # Padded rows/cols carry no edges -> inert, sliced off at the end.
    pos_m = jnp.zeros((n_pad, n_pad), jnp.int32).at[adj_pos2[0], adj_pos2[1]].set(1)
    neg_m = jnp.zeros((n_pad, n_pad), jnp.int32).at[adj_neg[0], adj_neg[1]].set(1)
    mask_packed = (pos_m | (neg_m << 1)).astype(jnp.int8)
    # TODO(synk): the dense O(N^2) mask is a memory-scaling limit for very large
    # graphs; a block-sparse / COO-gather mask would remove it.

    kernel = functools.partial(_fused_kernel, alpha=alpha, nheads=nheads,
                               dim_out=dim_out)
    out_sds = jax.ShapeDtypeStruct((n_pad, d_all), jnp.float32)

    res, res_pos, res_neg = pl.pallas_call(
        kernel,
        out_shape=(out_sds, out_sds, out_sds),
        grid_spec=pltpu.PrefetchScalarGridSpec(
            num_scalar_prefetch=0,
            grid=(grid_m, grid_k),                     # (row tiles, neighbor tiles)
            in_specs=[
                pl.BlockSpec((tile_m, h_pad), lambda i, k: (i, 0)),            # e_src
                pl.BlockSpec((h_pad, tile_k), lambda i, k: (0, k)),            # e_dst^T
                pl.BlockSpec((nheads, tile_k, dim_out), lambda i, k: (0, k, 0)),  # h (head-major)
                pl.BlockSpec((1, d_all), lambda i, k: (0, 0)),                 # fused bias
                pl.BlockSpec((tile_m, tile_k), lambda i, k: (i, k)),           # packed int8 masks
            ],
            out_specs=[
                pl.BlockSpec((tile_m, d_all), lambda i, k: (i, 0)),
                pl.BlockSpec((tile_m, d_all), lambda i, k: (i, 0)),
                pl.BlockSpec((tile_m, d_all), lambda i, k: (i, 0)),
            ],
            scratch_shapes=[
                pltpu.VMEM((nheads, tile_m, 1), jnp.float32),        # running max
                pltpu.VMEM((nheads, tile_m, 1), jnp.float32),        # pos denom
                pltpu.VMEM((nheads, tile_m, 1), jnp.float32),        # neg denom
                pltpu.VMEM((nheads, tile_m, dim_out), jnp.float32),  # pos accumulator
                pltpu.VMEM((nheads, tile_m, dim_out), jnp.float32),  # neg accumulator
            ]),
        compiler_params=pltpu.CompilerParams(
            dimension_semantics=("parallel", "arbitrary"),
            vmem_limit_bytes=_pick_vmem_limit()),
    )(e_src, e_dst_t, h_all, bias_all, mask_packed)

    return res[:N], res_pos[:N], res_neg[:N]


def _reference_forward(node_reps, adj_pos, adj_neg, params, *, alpha=0.2):
    """Pure-JAX f32 reference (same assumed SpMergeAttentionLayer math)."""
    N, _ = node_reps.shape
    W = params["W"]
    nheads, _, dim_out = W.shape
    self_idx = jnp.arange(N, dtype=adj_pos.dtype)
    adj_pos2 = jnp.concatenate([adj_pos, jnp.stack([self_idx, self_idx])], axis=1)
    pos_mask = jnp.zeros((N, N), jnp.float32).at[adj_pos2[0], adj_pos2[1]].set(1.0)
    neg_mask = jnp.zeros((N, N), jnp.float32).at[adj_neg[0], adj_neg[1]].set(1.0)

    outs, outs_p, outs_n = [], [], []
    for hd in range(nheads):
        h = node_reps @ W[hd]
        e_src = h @ params["a_src"][hd, 0]
        e_dst = h @ params["a_dst"][hd, 0]
        e = e_src[:, None] + e_dst[None, :]
        e = jnp.where(e > 0, e, alpha * e)

        def agg(mask, e=e, h=h, hd=hd):
            logits = jnp.where(mask > 0, e, -1e30)
            p = jnp.exp(logits - logits.max(-1, keepdims=True)) * mask
            d = p.sum(-1, keepdims=True)
            att = p / jnp.where(d > 0, d, 1.0)
            return att @ h + params["bias"][hd]

        rp, rn = agg(pos_mask), agg(neg_mask)
        outs.append(rp - rn)
        outs_p.append(rp)
        outs_n.append(rn)

    cat = lambda xs: jnp.maximum(jnp.concatenate(xs, axis=1), 0.0)
    return cat(outs), cat(outs_p), cat(outs_n)


def init_params(key, *, nheads, dim_in, dim_out):
    k_w, k_s, k_d = jax.random.split(key, 3)
    return {
        "W": 0.1 * jax.random.normal(k_w, (nheads, dim_in, dim_out), jnp.float32),
        "a_src": 0.1 * jax.random.normal(k_s, (nheads, 1, dim_out), jnp.float32),
        "a_dst": 0.1 * jax.random.normal(k_d, (nheads, 1, dim_out), jnp.float32),
        "bias": jnp.zeros((nheads, 1, dim_out), jnp.float32),  # bias_hgnn=True
    }


if __name__ == "__main__":
    key = jax.random.PRNGKey(0)
    N, dim_in, dim_out, nheads = 16, 32, 32, 4
    n_pos_edges, n_neg_edges = 24, 16

    k_x, k_p, k_n, k_params = jax.random.split(key, 4)
    node_reps = jax.random.normal(k_x, (N, dim_in), jnp.float32)
    adj_pos = jax.random.randint(k_p, (2, n_pos_edges), 0, N, dtype=jnp.int32)
    adj_neg = jax.random.randint(k_n, (2, n_neg_edges), 0, N, dtype=jnp.int32)
    params = init_params(k_params, nheads=nheads, dim_in=dim_in, dim_out=dim_out)

    fwd = jax.jit(functools.partial(layer_aggregator_forward, alpha=0.2))
    h_hidden, h_hidden_pos, h_hidden_neg = fwd(node_reps, adj_pos, adj_neg, params)
    jax.block_until_ready((h_hidden, h_hidden_pos, h_hidden_neg))

    assert h_hidden.shape == (N, nheads * dim_out)
    assert h_hidden_pos.shape == (N, nheads * dim_out)
    assert h_hidden_neg.shape == (N, nheads * dim_out)
    assert bool(jnp.all(h_hidden >= 0)) and bool(jnp.all(h_hidden_pos >= 0))

    # Numerical check against the pure-JAX f32 reference (tolerance covers the
    # bf16 MXU aggregation and the approximate reciprocal).
    ref, ref_pos, ref_neg = _reference_forward(node_reps, adj_pos, adj_neg,
                                               params, alpha=0.2)
    assert bool(jnp.allclose(h_hidden, ref, rtol=5e-2, atol=5e-2))
    assert bool(jnp.allclose(h_hidden_pos, ref_pos, rtol=5e-2, atol=5e-2))
    assert bool(jnp.allclose(h_hidden_neg, ref_neg, rtol=5e-2, atol=5e-2))

    print("KERNEL_OK")
</pallas_src>

<mosaic_0001>
module attributes {stable_mosaic.version = 11 : i64} {
  func.func @_fused_kernel(%arg0: i32, %arg1: i32, %arg2: memref<64x8xf32, #tpu.memory_space<vmem>>, %arg3: memref<8x128xf32, #tpu.memory_space<vmem>>, %arg4: memref<4x128x32xbf16, #tpu.memory_space<vmem>>, %arg5: memref<1x128xf32, #tpu.memory_space<vmem>>, %arg6: memref<64x128xi8, #tpu.memory_space<vmem>>, %arg7: memref<64x128xf32, #tpu.memory_space<vmem>>, %arg8: memref<64x128xf32, #tpu.memory_space<vmem>>, %arg9: memref<64x128xf32, #tpu.memory_space<vmem>>, %arg10: memref<4x64x1xf32, #tpu.memory_space<vmem>>, %arg11: memref<4x64x1xf32, #tpu.memory_space<vmem>>, %arg12: memref<4x64x1xf32, #tpu.memory_space<vmem>>, %arg13: memref<4x64x32xf32, #tpu.memory_space<vmem>>, %arg14: memref<4x64x32xf32, #tpu.memory_space<vmem>>) attributes {dimension_semantics = [#tpu.dimension_semantics<parallel>, #tpu.dimension_semantics<arbitrary>], iteration_bounds = array<i64: 2, 1>, scalar_prefetch = 0 : i64, scratch_operands = 5 : i64, tpu.core_type = #tpu.core_type<tc>, window_params = [{transform_indices = @transform_0, window_bounds = array<i64: 64, 8>}, {transform_indices = @transform_1, window_bounds = array<i64: 8, 128>}, {transform_indices = @transform_2, window_bounds = array<i64: 4, 128, 32>}, {pipeline_mode = #tpu.pipeline_mode<synchronous>, transform_indices = @transform_3, window_bounds = array<i64: 1, 128>}, {transform_indices = @transform_4, window_bounds = array<i64: 64, 128>}, {transform_indices = @transform_5, window_bounds = array<i64: 64, 128>}, {transform_indices = @transform_6, window_bounds = array<i64: 64, 128>}, {transform_indices = @transform_7, window_bounds = array<i64: 64, 128>}]} {
    %c0_i32 = arith.constant 0 : i32
    %0 = arith.cmpi eq, %arg1, %c0_i32 : i32
    %1 = arith.extui %0 : i1 to i32
    %c0_i32_0 = arith.constant 0 : i32
    %2 = arith.cmpi ne, %1, %c0_i32_0 : i32
    scf.if %2 {
      %cst_167 = arith.constant -1.000000e+30 : f32
      %292 = vector.broadcast %cst_167 : f32 to vector<4x64x1xf32>
      %c0_168 = arith.constant 0 : index
      %c0_169 = arith.constant 0 : index
      %c0_170 = arith.constant 0 : index
      %293 = vector.load %arg10[%c0_168, %c0_169, %c0_170] : memref<4x64x1xf32, #tpu.memory_space<vmem>>, vector<4x64x1xf32>
      tpu.vector_store %arg10[%c0_168, %c0_169, %c0_170], %292 {strides = array<i32>} : memref<4x64x1xf32, #tpu.memory_space<vmem>>, vector<4x64x1xf32>,
      %cst_171 = arith.constant 0.000000e+00 : f32
      %294 = vector.broadcast %cst_171 : f32 to vector<4x64x1xf32>
      %c0_172 = arith.constant 0 : index
      %c0_173 = arith.constant 0 : index
      %c0_174 = arith.constant 0 : index
      %295 = vector.load %arg11[%c0_172, %c0_173, %c0_174] : memref<4x64x1xf32, #tpu.memory_space<vmem>>, vector<4x64x1xf32>
      tpu.vector_store %arg11[%c0_172, %c0_173, %c0_174], %294 {strides = array<i32>} : memref<4x64x1xf32, #tpu.memory_space<vmem>>, vector<4x64x1xf32>,
      %cst_175 = arith.constant 0.000000e+00 : f32
      %296 = vector.broadcast %cst_175 : f32 to vector<4x64x1xf32>
      %c0_176 = arith.constant 0 : index
      %c0_177 = arith.constant 0 : index
      %c0_178 = arith.constant 0 : index
      %297 = vector.load %arg12[%c0_176, %c0_177, %c0_178] : memref<4x64x1xf32, #tpu.memory_space<vmem>>, vector<4x64x1xf32>
      tpu.vector_store %arg12[%c0_176, %c0_177, %c0_178], %296 {strides = array<i32>} : memref<4x64x1xf32, #tpu.memory_space<vmem>>, vector<4x64x1xf32>,
      %cst_179 = arith.constant 0.000000e+00 : f32
      %298 = vector.broadcast %cst_179 : f32 to vector<4x64x32xf32>
      %c0_180 = arith.constant 0 : index
      %c0_181 = arith.constant 0 : index
      %c0_182 = arith.constant 0 : index
      %299 = vector.load %arg13[%c0_180, %c0_181, %c0_182] : memref<4x64x32xf32, #tpu.memory_space<vmem>>, vector<4x64x32xf32>
      tpu.vector_store %arg13[%c0_180, %c0_181, %c0_182], %298 {strides = array<i32>} : memref<4x64x32xf32, #tpu.memory_space<vmem>>, vector<4x64x32xf32>,
      %cst_183 = arith.constant 0.000000e+00 : f32
      %300 = vector.broadcast %cst_183 : f32 to vector<4x64x32xf32>
      %c0_184 = arith.constant 0 : index
      %c0_185 = arith.constant 0 : index
      %c0_186 = arith.constant 0 : index
      %301 = vector.load %arg14[%c0_184, %c0_185, %c0_186] : memref<4x64x32xf32, #tpu.memory_space<vmem>>, vector<4x64x32xf32>
      tpu.vector_store %arg14[%c0_184, %c0_185, %c0_186], %300 {strides = array<i32>} : memref<4x64x32xf32, #tpu.memory_space<vmem>>, vector<4x64x32xf32>,
    } else {
    }
    %c0 = arith.constant 0 : index
    %c0_1 = arith.constant 0 : index
    %3 = vector.load %arg2[%c0, %c0_1] : memref<64x8xf32, #tpu.memory_space<vmem>>, vector<64x8xf32>
    %c0_2 = arith.constant 0 : index
    %c0_3 = arith.constant 0 : index
    %4 = vector.load %arg3[%c0_2, %c0_3] : memref<8x128xf32, #tpu.memory_space<vmem>>, vector<8x128xf32>
    %c0_4 = arith.constant 0 : index
    %c0_5 = arith.constant 0 : index
    %5 = vector.load %arg6[%c0_4, %c0_5] : memref<64x128xi8, #tpu.memory_space<vmem>>, vector<64x128xi8>
    %6 = arith.extsi %5 : vector<64x128xi8> to vector<64x128xi32>
    %c1_i32 = arith.constant 1 : i32
    %7 = vector.broadcast %c1_i32 : i32 to vector<64x128xi32>
    %8 = arith.andi %6, %7 : vector<64x128xi32>
    %9 = arith.sitofp %8 : vector<64x128xi32> to vector<64x128xf32>
    %c1_i32_6 = arith.constant 1 : i32
    %10 = vector.broadcast %c1_i32_6 : i32 to vector<64x128xi32>
    %11 = arith.shrsi %6, %10 : vector<64x128xi32>
    %c1_i32_7 = arith.constant 1 : i32
    %12 = vector.broadcast %c1_i32_7 : i32 to vector<64x128xi32>
    %13 = arith.andi %11, %12 : vector<64x128xi32>
    %14 = arith.sitofp %13 : vector<64x128xi32> to vector<64x128xf32>
    %c0_i32_8 = arith.constant 0 : i32
    %15 = vector.broadcast %c0_i32_8 : i32 to vector<64x128xi32>
    %16 = arith.cmpi ne, %6, %15 : vector<64x128xi32>
    %17 = vector.extract_strided_slice %3 {offsets = [0, 0], sizes = [64, 1], strides = [1, 1]} : vector<64x8xf32> to vector<64x1xf32>
    %18 = vector.extract_strided_slice %4 {offsets = [0, 0], sizes = [1, 128], strides = [1, 1]} : vector<8x128xf32> to vector<1x128xf32>
    %19 = vector.broadcast %17 : vector<64x1xf32> to vector<64x128xf32>
    %20 = vector.broadcast %18 : vector<1x128xf32> to vector<64x128xf32>
    %21 = arith.addf %19, %20 : vector<64x128xf32>
    %cst = arith.constant 0.000000e+00 : f32
    %22 = vector.broadcast %cst : f32 to vector<64x128xf32>
    %23 = arith.cmpf ogt, %21, %22 : vector<64x128xf32>
    %cst_9 = arith.constant 2.000000e-01 : f32
    %24 = vector.broadcast %cst_9 : f32 to vector<64x128xf32>
    %25 = arith.mulf %24, %21 : vector<64x128xf32>
    %26 = arith.select %23, %21, %25 : vector<64x128xi1>, vector<64x128xf32>
    %cst_10 = arith.constant -1.000000e+30 : f32
    %27 = vector.broadcast %cst_10 : f32 to vector<64x128xf32>
    %28 = arith.select %16, %26, %27 : vector<64x128xi1>, vector<64x128xf32>
    %c0_11 = arith.constant 0 : index
    %c0_12 = arith.constant 0 : index
    %c0_13 = arith.constant 0 : index
    %29 = vector.load %arg10[%c0_11, %c0_12, %c0_13] : memref<4x64x1xf32, #tpu.memory_space<vmem>>, vector<1x64x1xf32>
    %30 = vector.shape_cast %29 : vector<1x64x1xf32> to vector<64x1xf32>
    %cst_14 = arith.constant dense<0xFF800000> : vector<64xf32>
    %31 = vector.multi_reduction <maximumf>, %28, %cst_14 [1] : vector<64x128xf32> to vector<64xf32>
    %32 = vector.shape_cast %31 : vector<64xf32> to vector<64x1xf32>
    %33 = arith.maximumf %30, %32 : vector<64x1xf32>
    %34 = arith.subf %30, %33 : vector<64x1xf32>
    %35 = math.exp %34 : vector<64x1xf32>
    %36 = vector.broadcast %33 : vector<64x1xf32> to vector<64x128xf32>
    %37 = arith.subf %28, %36 : vector<64x128xf32>
    %38 = math.exp %37 : vector<64x128xf32>
    %39 = arith.mulf %38, %9 : vector<64x128xf32>
    %40 = arith.mulf %38, %14 : vector<64x128xf32>
    %41 = tpu.concatenate %39, %40 in 0 : vector<64x128xf32>, vector<64x128xf32> -> vector<128x128xf32>
    %42 = arith.truncf %41 : vector<128x128xf32> to vector<128x128xbf16>
    %c0_15 = arith.constant 0 : index
    %c0_16 = arith.constant 0 : index
    %c0_17 = arith.constant 0 : index
    %43 = vector.load %arg4[%c0_15, %c0_16, %c0_17] : memref<4x128x32xbf16, #tpu.memory_space<vmem>>, vector<1x128x32xbf16>
    %44 = vector.shape_cast %43 : vector<1x128x32xbf16> to vector<128x32xbf16>
    %cst_18 = arith.constant dense<0.000000e+00> : vector<128x32xf32>
    %45 = tpu.matmul %42, %44, %cst_18 {dimension_numbers = #tpu.dot_dimension_numbers<[1], [0], [0], [1], [0, 0, 1, 1], [], []>} : vector<128x128xbf16>, vector<128x32xbf16>, vector<128x32xf32> -> vector<128x32xf32>
    %c0_19 = arith.constant 0 : index
    %c0_20 = arith.constant 0 : index
    %c0_21 = arith.constant 0 : index
    %46 = vector.load %arg13[%c0_19, %c0_20, %c0_21] : memref<4x64x32xf32, #tpu.memory_space<vmem>>, vector<1x64x32xf32>
    %47 = vector.shape_cast %46 : vector<1x64x32xf32> to vector<64x32xf32>
    %48 = vector.broadcast %35 : vector<64x1xf32> to vector<64x32xf32>
    %49 = arith.mulf %48, %47 : vector<64x32xf32>
    %50 = vector.extract_strided_slice %45 {offsets = [0, 0], sizes = [64, 32], strides = [1, 1]} : vector<128x32xf32> to vector<64x32xf32>
    %51 = arith.addf %49, %50 : vector<64x32xf32>
    %c0_22 = arith.constant 0 : index
    %c0_23 = arith.constant 0 : index
    %c0_24 = arith.constant 0 : index
    %52 = vector.load %arg13[%c0_22, %c0_23, %c0_24] : memref<4x64x32xf32, #tpu.memory_space<vmem>>, vector<1x64x32xf32>
    %53 = vector.shape_cast %52 : vector<1x64x32xf32> to vector<64x32xf32>
    %54 = vector.shape_cast %51 : vector<64x32xf32> to vector<1x64x32xf32>
    tpu.vector_store %arg13[%c0_22, %c0_23, %c0_24], %54 {strides = array<i32>} : memref<4x64x32xf32, #tpu.memory_space<vmem>>, vector<1x64x32xf32>,
    %c0_25 = arith.constant 0 : index
    %c0_26 = arith.constant 0 : index
    %c0_27 = arith.constant 0 : index
    %55 = vector.load %arg14[%c0_25, %c0_26, %c0_27] : memref<4x64x32xf32, #tpu.memory_space<vmem>>, vector<1x64x32xf32>
    %56 = vector.shape_cast %55 : vector<1x64x32xf32> to vector<64x32xf32>
    %57 = vector.broadcast %35 : vector<64x1xf32> to vector<64x32xf32>
    %58 = arith.mulf %57, %56 : vector<64x32xf32>
    %59 = vector.extract_strided_slice %45 {offsets = [64, 0], sizes = [64, 32], strides = [1, 1]} : vector<128x32xf32> to vector<64x32xf32>
    %60 = arith.addf %58, %59 : vector<64x32xf32>
    %c0_28 = arith.constant 0 : index
    %c0_29 = arith.constant 0 : index
    %c0_30 = arith.constant 0 : index
    %61 = vector.load %arg14[%c0_28, %c0_29, %c0_30] : memref<4x64x32xf32, #tpu.memory_space<vmem>>, vector<1x64x32xf32>
    %62 = vector.shape_cast %61 : vector<1x64x32xf32> to vector<64x32xf32>
    %63 = vector.shape_cast %60 : vector<64x32xf32> to vector<1x64x32xf32>
    tpu.vector_store %arg14[%c0_28, %c0_29, %c0_30], %63 {strides = array<i32>} : memref<4x64x32xf32, #tpu.memory_space<vmem>>, vector<1x64x32xf32>,
    %c0_31 = arith.constant 0 : index
    %c0_32 = arith.constant 0 : index
    %c0_33 = arith.constant 0 : index
    %64 = vector.load %arg11[%c0_31, %c0_32, %c0_33] : memref<4x64x1xf32, #tpu.memory_space<vmem>>, vector<1x64x1xf32>
    %65 = vector.shape_cast %64 : vector<1x64x1xf32> to vector<64x1xf32>
    %66 = arith.mulf %35, %65 : vector<64x1xf32>
    %cst_34 = arith.constant dense<0.000000e+00> : vector<64xf32>
    %67 = vector.multi_reduction <add>, %39, %cst_34 [1] : vector<64x128xf32> to vector<64xf32>
    %68 = vector.shape_cast %67 : vector<64xf32> to vector<64x1xf32>
    %69 = arith.addf %66, %68 : vector<64x1xf32>
    %c0_35 = arith.constant 0 : index
    %c0_36 = arith.constant 0 : index
    %c0_37 = arith.constant 0 : index
    %70 = vector.load %arg11[%c0_35, %c0_36, %c0_37] : memref<4x64x1xf32, #tpu.memory_space<vmem>>, vector<1x64x1xf32>
    %71 = vector.shape_cast %70 : vector<1x64x1xf32> to vector<64x1xf32>
    %72 = vector.shape_cast %69 : vector<64x1xf32> to vector<1x64x1xf32>
    tpu.vector_store %arg11[%c0_35, %c0_36, %c0_37], %72 {strides = array<i32>} : memref<4x64x1xf32, #tpu.memory_space<vmem>>, vector<1x64x1xf32>,
    %c0_38 = arith.constant 0 : index
    %c0_39 = arith.constant 0 : index
    %c0_40 = arith.constant 0 : index
    %73 = vector.load %arg12[%c0_38, %c0_39, %c0_40] : memref<4x64x1xf32, #tpu.memory_space<vmem>>, vector<1x64x1xf32>
    %74 = vector.shape_cast %73 : vector<1x64x1xf32> to vector<64x1xf32>
    %75 = arith.mulf %35, %74 : vector<64x1xf32>
    %cst_41 = arith.constant dense<0.000000e+00> : vector<64xf32>
    %76 = vector.multi_reduction <add>, %40, %cst_41 [1] : vector<64x128xf32> to vector<64xf32>
    %77 = vector.shape_cast %76 : vector<64xf32> to vector<64x1xf32>
    %78 = arith.addf %75, %77 : vector<64x1xf32>
    %c0_42 = arith.constant 0 : index
    %c0_43 = arith.constant 0 : index
    %c0_44 = arith.constant 0 : index
    %79 = vector.load %arg12[%c0_42, %c0_43, %c0_44] : memref<4x64x1xf32, #tpu.memory_space<vmem>>, vector<1x64x1xf32>
    %80 = vector.shape_cast %79 : vector<1x64x1xf32> to vector<64x1xf32>
    %81 = vector.shape_cast %78 : vector<64x1xf32> to vector<1x64x1xf32>
    tpu.vector_store %arg12[%c0_42, %c0_43, %c0_44], %81 {strides = array<i32>} : memref<4x64x1xf32, #tpu.memory_space<vmem>>, vector<1x64x1xf32>,
    %c0_45 = arith.constant 0 : index
    %c0_46 = arith.constant 0 : index
    %c0_47 = arith.constant 0 : index
    %82 = vector.load %arg10[%c0_45, %c0_46, %c0_47] : memref<4x64x1xf32, #tpu.memory_space<vmem>>, vector<1x64x1xf32>
    %83 = vector.shape_cast %82 : vector<1x64x1xf32> to vector<64x1xf32>
    %84 = vector.shape_cast %33 : vector<64x1xf32> to vector<1x64x1xf32>
    tpu.vector_store %arg10[%c0_45, %c0_46, %c0_47], %84 {strides = array<i32>} : memref<4x64x1xf32, #tpu.memory_space<vmem>>, vector<1x64x1xf32>,
    %85 = vector.extract_strided_slice %3 {offsets = [0, 1], sizes = [64, 1], strides = [1, 1]} : vector<64x8xf32> to vector<64x1xf32>
    %86 = vector.extract_strided_slice %4 {offsets = [1, 0], sizes = [1, 128], strides = [1, 1]} : vector<8x128xf32> to vector<1x128xf32>
    %87 = vector.broadcast %85 : vector<64x1xf32> to vector<64x128xf32>
    %88 = vector.broadcast %86 : vector<1x128xf32> to vector<64x128xf32>
    %89 = arith.addf %87, %88 : vector<64x128xf32>
    %cst_48 = arith.constant 0.000000e+00 : f32
    %90 = vector.broadcast %cst_48 : f32 to vector<64x128xf32>
    %91 = arith.cmpf ogt, %89, %90 : vector<64x128xf32>
    %cst_49 = arith.constant 2.000000e-01 : f32
    %92 = vector.broadcast %cst_49 : f32 to vector<64x128xf32>
    %93 = arith.mulf %92, %89 : vector<64x128xf32>
    %94 = arith.select %91, %89, %93 : vector<64x128xi1>, vector<64x128xf32>
    %cst_50 = arith.constant -1.000000e+30 : f32
    %95 = vector.broadcast %cst_50 : f32 to vector<64x128xf32>
    %96 = arith.select %16, %94, %95 : vector<64x128xi1>, vector<64x128xf32>
    %c1 = arith.constant 1 : index
    %c0_51 = arith.constant 0 : index
    %c0_52 = arith.constant 0 : index
    %97 = vector.load %arg10[%c1, %c0_51, %c0_52] : memref<4x64x1xf32, #tpu.memory_space<vmem>>, vector<1x64x1xf32>
    %98 = vector.shape_cast %97 : vector<1x64x1xf32> to vector<64x1xf32>
    %cst_53 = arith.constant dense<0xFF800000> : vector<64xf32>
    %99 = vector.multi_reduction <maximumf>, %96, %cst_53 [1] : vector<64x128xf32> to vector<64xf32>
    %100 = vector.shape_cast %99 : vector<64xf32> to vector<64x1xf32>
    %101 = arith.maximumf %98, %100 : vector<64x1xf32>
    %102 = arith.subf %98, %101 : vector<64x1xf32>
    %103 = math.exp %102 : vector<64x1xf32>
    %104 = vector.broadcast %101 : vector<64x1xf32> to vector<64x128xf32>
    %105 = arith.subf %96, %104 : vector<64x128xf32>
    %106 = math.exp %105 : vector<64x128xf32>
    %107 = arith.mulf %106, %9 : vector<64x128xf32>
    %108 = arith.mulf %106, %14 : vector<64x128xf32>
    %109 = tpu.concatenate %107, %108 in 0 : vector<64x128xf32>, vector<64x128xf32> -> vector<128x128xf32>
    %110 = arith.truncf %109 : vector<128x128xf32> to vector<128x128xbf16>
    %c1_54 = arith.constant 1 : index
    %c0_55 = arith.constant 0 : index
    %c0_56 = arith.constant 0 : index
    %111 = vector.load %arg4[%c1_54, %c0_55, %c0_56] : memref<4x128x32xbf16, #tpu.memory_space<vmem>>, vector<1x128x32xbf16>
    %112 = vector.shape_cast %111 : vector<1x128x32xbf16> to vector<128x32xbf16>
    %cst_57 = arith.constant dense<0.000000e+00> : vector<128x32xf32>
    %113 = tpu.matmul %110, %112, %cst_57 {dimension_numbers = #tpu.dot_dimension_numbers<[1], [0], [0], [1], [0, 0, 1, 1], [], []>} : vector<128x128xbf16>, vector<128x32xbf16>, vector<128x32xf32> -> vector<128x32xf32>
    %c1_58 = arith.constant 1 : index
    %c0_59 = arith.constant 0 : index
    %c0_60 = arith.constant 0 : index
    %114 = vector.load %arg13[%c1_58, %c0_59, %c0_60] : memref<4x64x32xf32, #tpu.memory_space<vmem>>, vector<1x64x32xf32>
    %115 = vector.shape_cast %114 : vector<1x64x32xf32> to vector<64x32xf32>
    %116 = vector.broadcast %103 : vector<64x1xf32> to vector<64x32xf32>
    %117 = arith.mulf %116, %115 : vector<64x32xf32>
    %118 = vector.extract_strided_slice %113 {offsets = [0, 0], sizes = [64, 32], strides = [1, 1]} : vector<128x32xf32> to vector<64x32xf32>
    %119 = arith.addf %117, %118 : vector<64x32xf32>
    %c1_61 = arith.constant 1 : index
    %c0_62 = arith.constant 0 : index
    %c0_63 = arith.constant 0 : index
    %120 = vector.load %arg13[%c1_61, %c0_62, %c0_63] : memref<4x64x32xf32, #tpu.memory_space<vmem>>, vector<1x64x32xf32>
    %121 = vector.shape_cast %120 : vector<1x64x32xf32> to vector<64x32xf32>
    %122 = vector.shape_cast %119 : vector<64x32xf32> to vector<1x64x32xf32>
    tpu.vector_store %arg13[%c1_61, %c0_62, %c0_63], %122 {strides = array<i32>} : memref<4x64x32xf32, #tpu.memory_space<vmem>>, vector<1x64x32xf32>,
    %c1_64 = arith.constant 1 : index
    %c0_65 = arith.constant 0 : index
    %c0_66 = arith.constant 0 : index
    %123 = vector.load %arg14[%c1_64, %c0_65, %c0_66] : memref<4x64x32xf32, #tpu.memory_space<vmem>>, vector<1x64x32xf32>
    %124 = vector.shape_cast %123 : vector<1x64x32xf32> to vector<64x32xf32>
    %125 = vector.broadcast %103 : vector<64x1xf32> to vector<64x32xf32>
    %126 = arith.mulf %125, %124 : vector<64x32xf32>
    %127 = vector.extract_strided_slice %113 {offsets = [64, 0], sizes = [64, 32], strides = [1, 1]} : vector<128x32xf32> to vector<64x32xf32>
    %128 = arith.addf %126, %127 : vector<64x32xf32>
    %c1_67 = arith.constant 1 : index
    %c0_68 = arith.constant 0 : index
    %c0_69 = arith.constant 0 : index
    %129 = vector.load %arg14[%c1_67, %c0_68, %c0_69] : memref<4x64x32xf32, #tpu.memory_space<vmem>>, vector<1x64x32xf32>
    %130 = vector.shape_cast %129 : vector<1x64x32xf32> to vector<64x32xf32>
    %131 = vector.shape_cast %128 : vector<64x32xf32> to vector<1x64x32xf32>
    tpu.vector_store %arg14[%c1_67, %c0_68, %c0_69], %131 {strides = array<i32>} : memref<4x64x32xf32, #tpu.memory_space<vmem>>, vector<1x64x32xf32>,
    %c1_70 = arith.constant 1 : index
    %c0_71 = arith.constant 0 : index
    %c0_72 = arith.constant 0 : index
    %132 = vector.load %arg11[%c1_70, %c0_71, %c0_72] : memref<4x64x1xf32, #tpu.memory_space<vmem>>, vector<1x64x1xf32>
    %133 = vector.shape_cast %132 : vector<1x64x1xf32> to vector<64x1xf32>
    %134 = arith.mulf %103, %133 : vector<64x1xf32>
    %cst_73 = arith.constant dense<0.000000e+00> : vector<64xf32>
    %135 = vector.multi_reduction <add>, %107, %cst_73 [1] : vector<64x128xf32> to vector<64xf32>
    %136 = vector.shape_cast %135 : vector<64xf32> to vector<64x1xf32>
    %137 = arith.addf %134, %136 : vector<64x1xf32>
    %c1_74 = arith.constant 1 : index
    %c0_75 = arith.constant 0 : index
    %c0_76 = arith.constant 0 : index
    %138 = vector.load %arg11[%c1_74, %c0_75, %c0_76] : memref<4x64x1xf32, #tpu.memory_space<vmem>>, vector<1x64x1xf32>
    %139 = vector.shape_cast %138 : vector<1x64x1xf32> to vector<64x1xf32>
    %140 = vector.shape_cast %137 : vector<64x1xf32> to vector<1x64x1xf32>
    tpu.vector_store %arg11[%c1_74, %c0_75, %c0_76], %140 {strides = array<i32>} : memref<4x64x1xf32, #tpu.memory_space<vmem>>, vector<1x64x1xf32>,
    %c1_77 = arith.constant 1 : index
    %c0_78 = arith.constant 0 : index
    %c0_79 = arith.constant 0 : index
    %141 = vector.load %arg12[%c1_77, %c0_78, %c0_79] : memref<4x64x1xf32, #tpu.memory_space<vmem>>, vector<1x64x1xf32>
    %142 = vector.shape_cast %141 : vector<1x64x1xf32> to vector<64x1xf32>
    %143 = arith.mulf %103, %142 : vector<64x1xf32>
    %cst_80 = arith.constant dense<0.000000e+00> : vector<64xf32>
    %144 = vector.multi_reduction <add>, %108, %cst_80 [1] : vector<64x128xf32> to vector<64xf32>
    %145 = vector.shape_cast %144 : vector<64xf32> to vector<64x1xf32>
    %146 = arith.addf %143, %145 : vector<64x1xf32>
    %c1_81 = arith.constant 1 : index
    %c0_82 = arith.constant 0 : index
    %c0_83 = arith.constant 0 : index
    %147 = vector.load %arg12[%c1_81, %c0_82, %c0_83] : memref<4x64x1xf32, #tpu.memory_space<vmem>>, vector<1x64x1xf32>
    %148 = vector.shape_cast %147 : vector<1x64x1xf32> to vector<64x1xf32>
    %149 = vector.shape_cast %146 : vector<64x1xf32> to vector<1x64x1xf32>
    tpu.vector_store %arg12[%c1_81, %c0_82, %c0_83], %149 {strides = array<i32>} : memref<4x64x1xf32, #tpu.memory_space<vmem>>, vector<1x64x1xf32>,
    %c1_84 = arith.constant 1 : index
    %c0_85 = arith.constant 0 : index
    %c0_86 = arith.constant 0 : index
    %150 = vector.load %arg10[%c1_84, %c0_85, %c0_86] : memref<4x64x1xf32, #tpu.memory_space<vmem>>, vector<1x64x1xf32>
    %151 = vector.shape_cast %150 : vector<1x64x1xf32> to vector<64x1xf32>
    %152 = vector.shape_cast %101 : vector<64x1xf32> to vector<1x64x1xf32>
    tpu.vector_store %arg10[%c1_84, %c0_85, %c0_86], %152 {strides = array<i32>} : memref<4x64x1xf32, #tpu.memory_space<vmem>>, vector<1x64x1xf32>,
    %153 = vector.extract_strided_slice %3 {offsets = [0, 2], sizes = [64, 1], strides = [1, 1]} : vector<64x8xf32> to vector<64x1xf32>
    %154 = vector.extract_strided_slice %4 {offsets = [2, 0], sizes = [1, 128], strides = [1, 1]} : vector<8x128xf32> to vector<1x128xf32>
    %155 = vector.broadcast %153 : vector<64x1xf32> to vector<64x128xf32>
    %156 = vector.broadcast %154 : vector<1x128xf32> to vector<64x128xf32>
    %157 = arith.addf %155, %156 : vector<64x128xf32>
    %cst_87 = arith.constant 0.000000e+00 : f32
    %158 = vector.broadcast %cst_87 : f32 to vector<64x128xf32>
    %159 = arith.cmpf ogt, %157, %158 : vector<64x128xf32>
    %cst_88 = arith.constant 2.000000e-01 : f32
    %160 = vector.broadcast %cst_88 : f32 to vector<64x128xf32>
    %161 = arith.mulf %160, %157 : vector<64x128xf32>
    %162 = arith.select %159, %157, %161 : vector<64x128xi1>, vector<64x128xf32>
    %cst_89 = arith.constant -1.000000e+30 : f32
    %163 = vector.broadcast %cst_89 : f32 to vector<64x128xf32>
    %164 = arith.select %16, %162, %163 : vector<64x128xi1>, vector<64x128xf32>
    %c2 = arith.constant 2 : index
    %c0_90 = arith.constant 0 : index
    %c0_91 = arith.constant 0 : index
    %165 = vector.load %arg10[%c2, %c0_90, %c0_91] : memref<4x64x1xf32, #tpu.memory_space<vmem>>, vector<1x64x1xf32>
    %166 = vector.shape_cast %165 : vector<1x64x1xf32> to vector<64x1xf32>
    %cst_92 = arith.constant dense<0xFF800000> : vector<64xf32>
    %167 = vector.multi_reduction <maximumf>, %164, %cst_92 [1] : vector<64x128xf32> to vector<64xf32>
    %168 = vector.shape_cast %167 : vector<64xf32> to vector<64x1xf32>
    %169 = arith.maximumf %166, %168 : vector<64x1xf32>
    %170 = arith.subf %166, %169 : vector<64x1xf32>
    %171 = math.exp %170 : vector<64x1xf32>
    %172 = vector.broadcast %169 : vector<64x1xf32> to vector<64x128xf32>
    %173 = arith.subf %164, %172 : vector<64x128xf32>
    %174 = math.exp %173 : vector<64x128xf32>
    %175 = arith.mulf %174, %9 : vector<64x128xf32>
    %176 = arith.mulf %174, %14 : vector<64x128xf32>
    %177 = tpu.concatenate %175, %176 in 0 : vector<64x128xf32>, vector<64x128xf32> -> vector<128x128xf32>
    %178 = arith.truncf %177 : vector<128x128xf32> to vector<128x128xbf16>
    %c2_93 = arith.constant 2 : index
    %c0_94 = arith.constant 0 : index
    %c0_95 = arith.constant 0 : index
    %179 = vector.load %arg4[%c2_93, %c0_94, %c0_95] : memref<4x128x32xbf16, #tpu.memory_space<vmem>>, vector<1x128x32xbf16>
    %180 = vector.shape_cast %179 : vector<1x128x32xbf16> to vector<128x32xbf16>
    %cst_96 = arith.constant dense<0.000000e+00> : vector<128x32xf32>
    %181 = tpu.matmul %178, %180, %cst_96 {dimension_numbers = #tpu.dot_dimension_numbers<[1], [0], [0], [1], [0, 0, 1, 1], [], []>} : vector<128x128xbf16>, vector<128x32xbf16>, vector<128x32xf32> -> vector<128x32xf32>
    %c2_97 = arith.constant 2 : index
    %c0_98 = arith.constant 0 : index
    %c0_99 = arith.constant 0 : index
    %182 = vector.load %arg13[%c2_97, %c0_98, %c0_99] : memref<4x64x32xf32, #tpu.memory_space<vmem>>, vector<1x64x32xf32>
    %183 = vector.shape_cast %182 : vector<1x64x32xf32> to vector<64x32xf32>
    %184 = vector.broadcast %171 : vector<64x1xf32> to vector<64x32xf32>
    %185 = arith.mulf %184, %183 : vector<64x32xf32>
    %186 = vector.extract_strided_slice %181 {offsets = [0, 0], sizes = [64, 32], strides = [1, 1]} : vector<128x32xf32> to vector<64x32xf32>
    %187 = arith.addf %185, %186 : vector<64x32xf32>
    %c2_100 = arith.constant 2 : index
    %c0_101 = arith.constant 0 : index
    %c0_102 = arith.constant 0 : index
    %188 = vector.load %arg13[%c2_100, %c0_101, %c0_102] : memref<4x64x32xf32, #tpu.memory_space<vmem>>, vector<1x64x32xf32>
    %189 = vector.shape_cast %188 : vector<1x64x32xf32> to vector<64x32xf32>
    %190 = vector.shape_cast %187 : vector<64x32xf32> to vector<1x64x32xf32>
    tpu.vector_store %arg13[%c2_100, %c0_101, %c0_102], %190 {strides = array<i32>} : memref<4x64x32xf32, #tpu.memory_space<vmem>>, vector<1x64x32xf32>,
    %c2_103 = arith.constant 2 : index
    %c0_104 = arith.constant 0 : index
    %c0_105 = arith.constant 0 : index
    %191 = vector.load %arg14[%c2_103, %c0_104, %c0_105] : memref<4x64x32xf32, #tpu.memory_space<vmem>>, vector<1x64x32xf32>
    %192 = vector.shape_cast %191 : vector<1x64x32xf32> to vector<64x32xf32>
    %193 = vector.broadcast %171 : vector<64x1xf32> to vector<64x32xf32>
    %194 = arith.mulf %193, %192 : vector<64x32xf32>
    %195 = vector.extract_strided_slice %181 {offsets = [64, 0], sizes = [64, 32], strides = [1, 1]} : vector<128x32xf32> to vector<64x32xf32>
    %196 = arith.addf %194, %195 : vector<64x32xf32>
    %c2_106 = arith.constant 2 : index
    %c0_107 = arith.constant 0 : index
    %c0_108 = arith.constant 0 : index
    %197 = vector.load %arg14[%c2_106, %c0_107, %c0_108] : memref<4x64x32xf32, #tpu.memory_space<vmem>>, vector<1x64x32xf32>
    %198 = vector.shape_cast %197 : vector<1x64x32xf32> to vector<64x32xf32>
    %199 = vector.shape_cast %196 : vector<64x32xf32> to vector<1x64x32xf32>
    tpu.vector_store %arg14[%c2_106, %c0_107, %c0_108], %199 {strides = array<i32>} : memref<4x64x32xf32, #tpu.memory_space<vmem>>, vector<1x64x32xf32>,
    %c2_109 = arith.constant 2 : index
    %c0_110 = arith.constant 0 : index
    %c0_111 = arith.constant 0 : index
    %200 = vector.load %arg11[%c2_109, %c0_110, %c0_111] : memref<4x64x1xf32, #tpu.memory_space<vmem>>, vector<1x64x1xf32>
    %201 = vector.shape_cast %200 : vector<1x64x1xf32> to vector<64x1xf32>
    %202 = arith.mulf %171, %201 : vector<64x1xf32>
    %cst_112 = arith.constant dense<0.000000e+00> : vector<64xf32>
    %203 = vector.multi_reduction <add>, %175, %cst_112 [1] : vector<64x128xf32> to vector<64xf32>
    %204 = vector.shape_cast %203 : vector<64xf32> to vector<64x1xf32>
    %205 = arith.addf %202, %204 : vector<64x1xf32>
    %c2_113 = arith.constant 2 : index
    %c0_114 = arith.constant 0 : index
    %c0_115 = arith.constant 0 : index
    %206 = vector.load %arg11[%c2_113, %c0_114, %c0_115] : memref<4x64x1xf32, #tpu.memory_space<vmem>>, vector<1x64x1xf32>
    %207 = vector.shape_cast %206 : vector<1x64x1xf32> to vector<64x1xf32>
    %208 = vector.shape_cast %205 : vector<64x1xf32> to vector<1x64x1xf32>
    tpu.vector_store %arg11[%c2_113, %c0_114, %c0_115], %208 {strides = array<i32>} : memref<4x64x1xf32, #tpu.memory_space<vmem>>, vector<1x64x1xf32>,
    %c2_116 = arith.constant 2 : index
    %c0_117 = arith.constant 0 : index
    %c0_118 = arith.constant 0 : index
    %209 = vector.load %arg12[%c2_116, %c0_117, %c0_118] : memref<4x64x1xf32, #tpu.memory_space<vmem>>, vector<1x64x1xf32>
    %210 = vector.shape_cast %209 : vector<1x64x1xf32> to vector<64x1xf32>
    %211 = arith.mulf %171, %210 : vector<64x1xf32>
    %cst_119 = arith.constant dense<0.000000e+00> : vector<64xf32>
    %212 = vector.multi_reduction <add>, %176, %cst_119 [1] : vector<64x128xf32> to vector<64xf32>
    %213 = vector.shape_cast %212 : vector<64xf32> to vector<64x1xf32>
    %214 = arith.addf %211, %213 : vector<64x1xf32>
    %c2_120 = arith.constant 2 : index
    %c0_121 = arith.constant 0 : index
    %c0_122 = arith.constant 0 : index
    %215 = vector.load %arg12[%c2_120, %c0_121, %c0_122] : memref<4x64x1xf32, #tpu.memory_space<vmem>>, vector<1x64x1xf32>
    %216 = vector.shape_cast %215 : vector<1x64x1xf32> to vector<64x1xf32>
    %217 = vector.shape_cast %214 : vector<64x1xf32> to vector<1x64x1xf32>
    tpu.vector_store %arg12[%c2_120, %c0_121, %c0_122], %217 {strides = array<i32>} : memref<4x64x1xf32, #tpu.memory_space<vmem>>, vector<1x64x1xf32>,
    %c2_123 = arith.constant 2 : index
    %c0_124 = arith.constant 0 : index
    %c0_125 = arith.constant 0 : index
    %218 = vector.load %arg10[%c2_123, %c0_124, %c0_125] : memref<4x64x1xf32, #tpu.memory_space<vmem>>, vector<1x64x1xf32>
    %219 = vector.shape_cast %218 : vector<1x64x1xf32> to vector<64x1xf32>
    %220 = vector.shape_cast %169 : vector<64x1xf32> to vector<1x64x1xf32>
    tpu.vector_store %arg10[%c2_123, %c0_124, %c0_125], %220 {strides = array<i32>} : memref<4x64x1xf32, #tpu.memory_space<vmem>>, vector<1x64x1xf32>,
    %221 = vector.extract_strided_slice %3 {offsets = [0, 3], sizes = [64, 1], strides = [1, 1]} : vector<64x8xf32> to vector<64x1xf32>
    %222 = vector.extract_strided_slice %4 {offsets = [3, 0], sizes = [1, 128], strides = [1, 1]} : vector<8x128xf32> to vector<1x128xf32>
    %223 = vector.broadcast %221 : vector<64x1xf32> to vector<64x128xf32>
    %224 = vector.broadcast %222 : vector<1x128xf32> to vector<64x128xf32>
    %225 = arith.addf %223, %224 : vector<64x128xf32>
    %cst_126 = arith.constant 0.000000e+00 : f32
    %226 = vector.broadcast %cst_126 : f32 to vector<64x128xf32>
    %227 = arith.cmpf ogt, %225, %226 : vector<64x128xf32>
    %cst_127 = arith.constant 2.000000e-01 : f32
    %228 = vector.broadcast %cst_127 : f32 to vector<64x128xf32>
    %229 = arith.mulf %228, %225 : vector<64x128xf32>
    %230 = arith.select %227, %225, %229 : vector<64x128xi1>, vector<64x128xf32>
    %cst_128 = arith.constant -1.000000e+30 : f32
    %231 = vector.broadcast %cst_128 : f32 to vector<64x128xf32>
    %232 = arith.select %16, %230, %231 : vector<64x128xi1>, vector<64x128xf32>
    %c3 = arith.constant 3 : index
    %c0_129 = arith.constant 0 : index
    %c0_130 = arith.constant 0 : index
    %233 = vector.load %arg10[%c3, %c0_129, %c0_130] : memref<4x64x1xf32, #tpu.memory_space<vmem>>, vector<1x64x1xf32>
    %234 = vector.shape_cast %233 : vector<1x64x1xf32> to vector<64x1xf32>
    %cst_131 = arith.constant dense<0xFF800000> : vector<64xf32>
    %235 = vector.multi_reduction <maximumf>, %232, %cst_131 [1] : vector<64x128xf32> to vector<64xf32>
    %236 = vector.shape_cast %235 : vector<64xf32> to vector<64x1xf32>
    %237 = arith.maximumf %234, %236 : vector<64x1xf32>
    %238 = arith.subf %234, %237 : vector<64x1xf32>
    %239 = math.exp %238 : vector<64x1xf32>
    %240 = vector.broadcast %237 : vector<64x1xf32> to vector<64x128xf32>
    %241 = arith.subf %232, %240 : vector<64x128xf32>
    %242 = math.exp %241 : vector<64x128xf32>
    %243 = arith.mulf %242, %9 : vector<64x128xf32>
    %244 = arith.mulf %242, %14 : vector<64x128xf32>
    %245 = tpu.concatenate %243, %244 in 0 : vector<64x128xf32>, vector<64x128xf32> -> vector<128x128xf32>
    %246 = arith.truncf %245 : vector<128x128xf32> to vector<128x128xbf16>
    %c3_132 = arith.constant 3 : index
    %c0_133 = arith.constant 0 : index
    %c0_134 = arith.constant 0 : index
    %247 = vector.load %arg4[%c3_132, %c0_133, %c0_134] : memref<4x128x32xbf16, #tpu.memory_space<vmem>>, vector<1x128x32xbf16>
    %248 = vector.shape_cast %247 : vector<1x128x32xbf16> to vector<128x32xbf16>
    %cst_135 = arith.constant dense<0.000000e+00> : vector<128x32xf32>
    %249 = tpu.matmul %246, %248, %cst_135 {dimension_numbers = #tpu.dot_dimension_numbers<[1], [0], [0], [1], [0, 0, 1, 1], [], []>} : vector<128x128xbf16>, vector<128x32xbf16>, vector<128x32xf32> -> vector<128x32xf32>
    %c3_136 = arith.constant 3 : index
    %c0_137 = arith.constant 0 : index
    %c0_138 = arith.constant 0 : index
    %250 = vector.load %arg13[%c3_136, %c0_137, %c0_138] : memref<4x64x32xf32, #tpu.memory_space<vmem>>, vector<1x64x32xf32>
    %251 = vector.shape_cast %250 : vector<1x64x32xf32> to vector<64x32xf32>
    %252 = vector.broadcast %239 : vector<64x1xf32> to vector<64x32xf32>
    %253 = arith.mulf %252, %251 : vector<64x32xf32>
    %254 = vector.extract_strided_slice %249 {offsets = [0, 0], sizes = [64, 32], strides = [1, 1]} : vector<128x32xf32> to vector<64x32xf32>
    %255 = arith.addf %253, %254 : vector<64x32xf32>
    %c3_139 = arith.constant 3 : index
    %c0_140 = arith.constant 0 : index
    %c0_141 = arith.constant 0 : index
    %256 = vector.load %arg13[%c3_139, %c0_140, %c0_141] : memref<4x64x32xf32, #tpu.memory_space<vmem>>, vector<1x64x32xf32>
    %257 = vector.shape_cast %256 : vector<1x64x32xf32> to vector<64x32xf32>
    %258 = vector.shape_cast %255 : vector<64x32xf32> to vector<1x64x32xf32>
    tpu.vector_store %arg13[%c3_139, %c0_140, %c0_141], %258 {strides = array<i32>} : memref<4x64x32xf32, #tpu.memory_space<vmem>>, vector<1x64x32xf32>,
    %c3_142 = arith.constant 3 : index
    %c0_143 = arith.constant 0 : index
    %c0_144 = arith.constant 0 : index
    %259 = vector.load %arg14[%c3_142, %c0_143, %c0_144] : memref<4x64x32xf32, #tpu.memory_space<vmem>>, vector<1x64x32xf32>
    %260 = vector.shape_cast %259 : vector<1x64x32xf32> to vector<64x32xf32>
    %261 = vector.broadcast %239 : vector<64x1xf32> to vector<64x32xf32>
    %262 = arith.mulf %261, %260 : vector<64x32xf32>
    %263 = vector.extract_strided_slice %249 {offsets = [64, 0], sizes = [64, 32], strides = [1, 1]} : vector<128x32xf32> to vector<64x32xf32>
    %264 = arith.addf %262, %263 : vector<64x32xf32>
    %c3_145 = arith.constant 3 : index
    %c0_146 = arith.constant 0 : index
    %c0_147 = arith.constant 0 : index
    %265 = vector.load %arg14[%c3_145, %c0_146, %c0_147] : memref<4x64x32xf32, #tpu.memory_space<vmem>>, vector<1x64x32xf32>
    %266 = vector.shape_cast %265 : vector<1x64x32xf32> to vector<64x32xf32>
    %267 = vector.shape_cast %264 : vector<64x32xf32> to vector<1x64x32xf32>
    tpu.vector_store %arg14[%c3_145, %c0_146, %c0_147], %267 {strides = array<i32>} : memref<4x64x32xf32, #tpu.memory_space<vmem>>, vector<1x64x32xf32>,
    %c3_148 = arith.constant 3 : index
    %c0_149 = arith.constant 0 : index
    %c0_150 = arith.constant 0 : index
    %268 = vector.load %arg11[%c3_148, %c0_149, %c0_150] : memref<4x64x1xf32, #tpu.memory_space<vmem>>, vector<1x64x1xf32>
    %269 = vector.shape_cast %268 : vector<1x64x1xf32> to vector<64x1xf32>
    %270 = arith.mulf %239, %269 : vector<64x1xf32>
    %cst_151 = arith.constant dense<0.000000e+00> : vector<64xf32>
    %271 = vector.multi_reduction <add>, %243, %cst_151 [1] : vector<64x128xf32> to vector<64xf32>
    %272 = vector.shape_cast %271 : vector<64xf32> to vector<64x1xf32>
    %273 = arith.addf %270, %272 : vector<64x1xf32>
    %c3_152 = arith.constant 3 : index
    %c0_153 = arith.constant 0 : index
    %c0_154 = arith.constant 0 : index
    %274 = vector.load %arg11[%c3_152, %c0_153, %c0_154] : memref<4x64x1xf32, #tpu.memory_space<vmem>>, vector<1x64x1xf32>
    %275 = vector.shape_cast %274 : vector<1x64x1xf32> to vector<64x1xf32>
    %276 = vector.shape_cast %273 : vector<64x1xf32> to vector<1x64x1xf32>
    tpu.vector_store %arg11[%c3_152, %c0_153, %c0_154], %276 {strides = array<i32>} : memref<4x64x1xf32, #tpu.memory_space<vmem>>, vector<1x64x1xf32>,
    %c3_155 = arith.constant 3 : index
    %c0_156 = arith.constant 0 : index
    %c0_157 = arith.constant 0 : index
    %277 = vector.load %arg12[%c3_155, %c0_156, %c0_157] : memref<4x64x1xf32, #tpu.memory_space<vmem>>, vector<1x64x1xf32>
    %278 = vector.shape_cast %277 : vector<1x64x1xf32> to vector<64x1xf32>
    %279 = arith.mulf %239, %278 : vector<64x1xf32>
    %cst_158 = arith.constant dense<0.000000e+00> : vector<64xf32>
    %280 = vector.multi_reduction <add>, %244, %cst_158 [1] : vector<64x128xf32> to vector<64xf32>
    %281 = vector.shape_cast %280 : vector<64xf32> to vector<64x1xf32>
    %282 = arith.addf %279, %281 : vector<64x1xf32>
    %c3_159 = arith.constant 3 : index
    %c0_160 = arith.constant 0 : index
    %c0_161 = arith.constant 0 : index
    %283 = vector.load %arg12[%c3_159, %c0_160, %c0_161] : memref<4x64x1xf32, #tpu.memory_space<vmem>>, vector<1x64x1xf32>
    %284 = vector.shape_cast %283 : vector<1x64x1xf32> to vector<64x1xf32>
    %285 = vector.shape_cast %282 : vector<64x1xf32> to vector<1x64x1xf32>
    tpu.vector_store %arg12[%c3_159, %c0_160, %c0_161], %285 {strides = array<i32>} : memref<4x64x1xf32, #tpu.memory_space<vmem>>, vector<1x64x1xf32>,
    %c3_162 = arith.constant 3 : index
    %c0_163 = arith.constant 0 : index
    %c0_164 = arith.constant 0 : index
    %286 = vector.load %arg10[%c3_162, %c0_163, %c0_164] : memref<4x64x1xf32, #tpu.memory_space<vmem>>, vector<1x64x1xf32>
    %287 = vector.shape_cast %286 : vector<1x64x1xf32> to vector<64x1xf32>
    %288 = vector.shape_cast %237 : vector<64x1xf32> to vector<1x64x1xf32>
    tpu.vector_store %arg10[%c3_162, %c0_163, %c0_164], %288 {strides = array<i32>} : memref<4x64x1xf32, #tpu.memory_space<vmem>>, vector<1x64x1xf32>,
    %c0_i32_165 = arith.constant 0 : i32
    %289 = arith.cmpi eq, %arg1, %c0_i32_165 : i32
    %290 = arith.extui %289 : i1 to i32
    %c0_i32_166 = arith.constant 0 : i32
    %291 = arith.cmpi ne, %290, %c0_i32_166 : i32
    scf.if %291 {
      %c0_167 = arith.constant 0 : index
      %c0_168 = arith.constant 0 : index
      %292 = vector.load %arg5[%c0_167, %c0_168] : memref<1x128xf32, #tpu.memory_space<vmem>>, vector<1x128xf32>
      %c0_169 = arith.constant 0 : index
      %c0_170 = arith.constant 0 : index
      %c0_171 = arith.constant 0 : index
      %293 = vector.load %arg11[%c0_169, %c0_170, %c0_171] : memref<4x64x1xf32, #tpu.memory_space<vmem>>, vector<1x64x1xf32>
      %294 = vector.shape_cast %293 : vector<1x64x1xf32> to vector<64x1xf32>
      %c0_172 = arith.constant 0 : index
      %c0_173 = arith.constant 0 : index
      %c0_174 = arith.constant 0 : index
      %295 = vector.load %arg12[%c0_172, %c0_173, %c0_174] : memref<4x64x1xf32, #tpu.memory_space<vmem>>, vector<1x64x1xf32>
      %296 = vector.shape_cast %295 : vector<1x64x1xf32> to vector<64x1xf32>
      %cst_175 = arith.constant 0.000000e+00 : f32
      %297 = vector.broadcast %cst_175 : f32 to vector<64x1xf32>
      %298 = arith.cmpf ogt, %294, %297 : vector<64x1xf32>
      %cst_176 = arith.constant 1.000000e+00 : f32
      %299 = vector.broadcast %cst_176 : f32 to vector<64x1xf32>
      %300 = arith.select %298, %294, %299 : vector<64x1xi1>, vector<64x1xf32>
      %301 = tpu.reciprocal %300 {approx = true} : vector<64x1xf32> -> vector<64x1xf32>
      %cst_177 = arith.constant 0.000000e+00 : f32
      %302 = vector.broadcast %cst_177 : f32 to vector<64x1xf32>
      %303 = arith.cmpf ogt, %296, %302 : vector<64x1xf32>
      %cst_178 = arith.constant 1.000000e+00 : f32
      %304 = vector.broadcast %cst_178 : f32 to vector<64x1xf32>
      %305 = arith.select %303, %296, %304 : vector<64x1xi1>, vector<64x1xf32>
      %306 = tpu.reciprocal %305 {approx = true} : vector<64x1xf32> -> vector<64x1xf32>
      %c0_179 = arith.constant 0 : index
      %c0_180 = arith.constant 0 : index
      %c0_181 = arith.constant 0 : index
      %307 = vector.load %arg13[%c0_179, %c0_180, %c0_181] : memref<4x64x32xf32, #tpu.memory_space<vmem>>, vector<1x64x32xf32>
      %308 = vector.shape_cast %307 : vector<1x64x32xf32> to vector<64x32xf32>
      %309 = vector.broadcast %301 : vector<64x1xf32> to vector<64x32xf32>
      %310 = arith.mulf %308, %309 : vector<64x32xf32>
      %c0_182 = arith.constant 0 : index
      %c0_183 = arith.constant 0 : index
      %c0_184 = arith.constant 0 : index
      %311 = vector.load %arg14[%c0_182, %c0_183, %c0_184] : memref<4x64x32xf32, #tpu.memory_space<vmem>>, vector<1x64x32xf32>
      %312 = vector.shape_cast %311 : vector<1x64x32xf32> to vector<64x32xf32>
      %313 = vector.broadcast %306 : vector<64x1xf32> to vector<64x32xf32>
      %314 = arith.mulf %312, %313 : vector<64x32xf32>
      %c1_185 = arith.constant 1 : index
      %c0_186 = arith.constant 0 : index
      %c0_187 = arith.constant 0 : index
      %315 = vector.load %arg11[%c1_185, %c0_186, %c0_187] : memref<4x64x1xf32, #tpu.memory_space<vmem>>, vector<1x64x1xf32>
      %316 = vector.shape_cast %315 : vector<1x64x1xf32> to vector<64x1xf32>
      %c1_188 = arith.constant 1 : index
      %c0_189 = arith.constant 0 : index
      %c0_190 = arith.constant 0 : index
      %317 = vector.load %arg12[%c1_188, %c0_189, %c0_190] : memref<4x64x1xf32, #tpu.memory_space<vmem>>, vector<1x64x1xf32>
      %318 = vector.shape_cast %317 : vector<1x64x1xf32> to vector<64x1xf32>
      %cst_191 = arith.constant 0.000000e+00 : f32
      %319 = vector.broadcast %cst_191 : f32 to vector<64x1xf32>
      %320 = arith.cmpf ogt, %316, %319 : vector<64x1xf32>
      %cst_192 = arith.constant 1.000000e+00 : f32
      %321 = vector.broadcast %cst_192 : f32 to vector<64x1xf32>
      %322 = arith.select %320, %316, %321 : vector<64x1xi1>, vector<64x1xf32>
      %323 = tpu.reciprocal %322 {approx = true} : vector<64x1xf32> -> vector<64x1xf32>
      %cst_193 = arith.constant 0.000000e+00 : f32
      %324 = vector.broadcast %cst_193 : f32 to vector<64x1xf32>
      %325 = arith.cmpf ogt, %318, %324 : vector<64x1xf32>
      %cst_194 = arith.constant 1.000000e+00 : f32
      %326 = vector.broadcast %cst_194 : f32 to vector<64x1xf32>
      %327 = arith.select %325, %318, %326 : vector<64x1xi1>, vector<64x1xf32>
      %328 = tpu.reciprocal %327 {approx = true} : vector<64x1xf32> -> vector<64x1xf32>
      %c1_195 = arith.constant 1 : index
      %c0_196 = arith.constant 0 : index
      %c0_197 = arith.constant 0 : index
      %329 = vector.load %arg13[%c1_195, %c0_196, %c0_197] : memref<4x64x32xf32, #tpu.memory_space<vmem>>, vector<1x64x32xf32>
      %330 = vector.shape_cast %329 : vector<1x64x32xf32> to vector<64x32xf32>
      %331 = vector.broadcast %323 : vector<64x1xf32> to vector<64x32xf32>
      %332 = arith.mulf %330, %331 : vector<64x32xf32>
      %c1_198 = arith.constant 1 : index
      %c0_199 = arith.constant 0 : index
      %c0_200 = arith.constant 0 : index
      %333 = vector.load %arg14[%c1_198, %c0_199, %c0_200] : memref<4x64x32xf32, #tpu.memory_space<vmem>>, vector<1x64x32xf32>
      %334 = vector.shape_cast %333 : vector<1x64x32xf32> to vector<64x32xf32>
      %335 = vector.broadcast %328 : vector<64x1xf32> to vector<64x32xf32>
      %336 = arith.mulf %334, %335 : vector<64x32xf32>
      %c2_201 = arith.constant 2 : index
      %c0_202 = arith.constant 0 : index
      %c0_203 = arith.constant 0 : index
      %337 = vector.load %arg11[%c2_201, %c0_202, %c0_203] : memref<4x64x1xf32, #tpu.memory_space<vmem>>, vector<1x64x1xf32>
      %338 = vector.shape_cast %337 : vector<1x64x1xf32> to vector<64x1xf32>
      %c2_204 = arith.constant 2 : index
      %c0_205 = arith.constant 0 : index
      %c0_206 = arith.constant 0 : index
      %339 = vector.load %arg12[%c2_204, %c0_205, %c0_206] : memref<4x64x1xf32, #tpu.memory_space<vmem>>, vector<1x64x1xf32>
      %340 = vector.shape_cast %339 : vector<1x64x1xf32> to vector<64x1xf32>
      %cst_207 = arith.constant 0.000000e+00 : f32
      %341 = vector.broadcast %cst_207 : f32 to vector<64x1xf32>
      %342 = arith.cmpf ogt, %338, %341 : vector<64x1xf32>
      %cst_208 = arith.constant 1.000000e+00 : f32
      %343 = vector.broadcast %cst_208 : f32 to vector<64x1xf32>
      %344 = arith.select %342, %338, %343 : vector<64x1xi1>, vector<64x1xf32>
      %345 = tpu.reciprocal %344 {approx = true} : vector<64x1xf32> -> vector<64x1xf32>
      %cst_209 = arith.constant 0.000000e+00 : f32
      %346 = vector.broadcast %cst_209 : f32 to vector<64x1xf32>
      %347 = arith.cmpf ogt, %340, %346 : vector<64x1xf32>
      %cst_210 = arith.constant 1.000000e+00 : f32
      %348 = vector.broadcast %cst_210 : f32 to vector<64x1xf32>
      %349 = arith.select %347, %340, %348 : vector<64x1xi1>, vector<64x1xf32>
      %350 = tpu.reciprocal %349 {approx = true} : vector<64x1xf32> -> vector<64x1xf32>
      %c2_211 = arith.constant 2 : index
      %c0_212 = arith.constant 0 : index
      %c0_213 = arith.constant 0 : index
      %351 = vector.load %arg13[%c2_211, %c0_212, %c0_213] : memref<4x64x32xf32, #tpu.memory_space<vmem>>, vector<1x64x32xf32>
      %352 = vector.shape_cast %351 : vector<1x64x32xf32> to vector<64x32xf32>
      %353 = vector.broadcast %345 : vector<64x1xf32> to vector<64x32xf32>
      %354 = arith.mulf %352, %353 : vector<64x32xf32>
      %c2_214 = arith.constant 2 : index
      %c0_215 = arith.constant 0 : index
      %c0_216 = arith.constant 0 : index
      %355 = vector.load %arg14[%c2_214, %c0_215, %c0_216] : memref<4x64x32xf32, #tpu.memory_space<vmem>>, vector<1x64x32xf32>
      %356 = vector.shape_cast %355 : vector<1x64x32xf32> to vector<64x32xf32>
      %357 = vector.broadcast %350 : vector<64x1xf32> to vector<64x32xf32>
      %358 = arith.mulf %356, %357 : vector<64x32xf32>
      %c3_217 = arith.constant 3 : index
      %c0_218 = arith.constant 0 : index
      %c0_219 = arith.constant 0 : index
      %359 = vector.load %arg11[%c3_217, %c0_218, %c0_219] : memref<4x64x1xf32, #tpu.memory_space<vmem>>, vector<1x64x1xf32>
      %360 = vector.shape_cast %359 : vector<1x64x1xf32> to vector<64x1xf32>
      %c3_220 = arith.constant 3 : index
      %c0_221 = arith.constant 0 : index
      %c0_222 = arith.constant 0 : index
      %361 = vector.load %arg12[%c3_220, %c0_221, %c0_222] : memref<4x64x1xf32, #tpu.memory_space<vmem>>, vector<1x64x1xf32>
      %362 = vector.shape_cast %361 : vector<1x64x1xf32> to vector<64x1xf32>
      %cst_223 = arith.constant 0.000000e+00 : f32
      %363 = vector.broadcast %cst_223 : f32 to vector<64x1xf32>
      %364 = arith.cmpf ogt, %360, %363 : vector<64x1xf32>
      %cst_224 = arith.constant 1.000000e+00 : f32
      %365 = vector.broadcast %cst_224 : f32 to vector<64x1xf32>
      %366 = arith.select %364, %360, %365 : vector<64x1xi1>, vector<64x1xf32>
      %367 = tpu.reciprocal %366 {approx = true} : vector<64x1xf32> -> vector<64x1xf32>
      %cst_225 = arith.constant 0.000000e+00 : f32
      %368 = vector.broadcast %cst_225 : f32 to vector<64x1xf32>
      %369 = arith.cmpf ogt, %362, %368 : vector<64x1xf32>
      %cst_226 = arith.constant 1.000000e+00 : f32
      %370 = vector.broadcast %cst_226 : f32 to vector<64x1xf32>
      %371 = arith.select %369, %362, %370 : vector<64x1xi1>, vector<64x1xf32>
      %372 = tpu.reciprocal %371 {approx = true} : vector<64x1xf32> -> vector<64x1xf32>
      %c3_227 = arith.constant 3 : index
      %c0_228 = arith.constant 0 : index
      %c0_229 = arith.constant 0 : index
      %373 = vector.load %arg13[%c3_227, %c0_228, %c0_229] : memref<4x64x32xf32, #tpu.memory_space<vmem>>, vector<1x64x32xf32>
      %374 = vector.shape_cast %373 : vector<1x64x32xf32> to vector<64x32xf32>
      %375 = vector.broadcast %367 : vector<64x1xf32> to vector<64x32xf32>
      %376 = arith.mulf %374, %375 : vector<64x32xf32>
      %c3_230 = arith.constant 3 : index
      %c0_231 = arith.constant 0 : index
      %c0_232 = arith.constant 0 : index
      %377 = vector.load %arg14[%c3_230, %c0_231, %c0_232] : memref<4x64x32xf32, #tpu.memory_space<vmem>>, vector<1x64x32xf32>
      %378 = vector.shape_cast %377 : vector<1x64x32xf32> to vector<64x32xf32>
      %379 = vector.broadcast %372 : vector<64x1xf32> to vector<64x32xf32>
      %380 = arith.mulf %378, %379 : vector<64x32xf32>
      %381 = tpu.concatenate %310, %332, %354, %376 in 1 : vector<64x32xf32>, vector<64x32xf32>, vector<64x32xf32>, vector<64x32xf32> -> vector<64x128xf32>
      %382 = vector.broadcast %292 : vector<1x128xf32> to vector<64x128xf32>
      %383 = arith.addf %381, %382 : vector<64x128xf32>
      %384 = tpu.concatenate %314, %336, %358, %380 in 1 : vector<64x32xf32>, vector<64x32xf32>, vector<64x32xf32>, vector<64x32xf32> -> vector<64x128xf32>
      %385 = vector.broadcast %292 : vector<1x128xf32> to vector<64x128xf32>
      %386 = arith.addf %384, %385 : vector<64x128xf32>
      %387 = arith.subf %383, %386 : vector<64x128xf32>
      %cst_233 = arith.constant 0.000000e+00 : f32
      %388 = vector.broadcast %cst_233 : f32 to vector<64x128xf32>
      %389 = arith.maximumf %387, %388 : vector<64x128xf32>
      %c0_234 = arith.constant 0 : index
      %c0_235 = arith.constant 0 : index
      %390 = vector.load %arg7[%c0_234, %c0_235] : memref<64x128xf32, #tpu.memory_space<vmem>>, vector<64x128xf32>
      tpu.vector_store %arg7[%c0_234, %c0_235], %389 {strides = array<i32>} : memref<64x128xf32, #tpu.memory_space<vmem>>, vector<64x128xf32>,
      %cst_236 = arith.constant 0.000000e+00 : f32
      %391 = vector.broadcast %cst_236 : f32 to vector<64x128xf32>
      %392 = arith.maximumf %383, %391 : vector<64x128xf32>
      %c0_237 = arith.constant 0 : index
      %c0_238 = arith.constant 0 : index
      %393 = vector.load %arg8[%c0_237, %c0_238] : memref<64x128xf32, #tpu.memory_space<vmem>>, vector<64x128xf32>
      tpu.vector_store %arg8[%c0_237, %c0_238], %392 {strides = array<i32>} : memref<64x128xf32, #tpu.memory_space<vmem>>, vector<64x128xf32>,
      %cst_239 = arith.constant 0.000000e+00 : f32
      %394 = vector.broadcast %cst_239 : f32 to vector<64x128xf32>
      %395 = arith.maximumf %386, %394 : vector<64x128xf32>
      %c0_240 = arith.constant 0 : index
      %c0_241 = arith.constant 0 : index
      %396 = vector.load %arg9[%c0_240, %c0_241] : memref<64x128xf32, #tpu.memory_space<vmem>>, vector<64x128xf32>
      tpu.vector_store %arg9[%c0_240, %c0_241], %395 {strides = array<i32>} : memref<64x128xf32, #tpu.memory_space<vmem>>, vector<64x128xf32>,
    } else {
    }
    return
  }
  func.func @transform_0(%arg0: i32, %arg1: i32) -> (i32, i32) {
    %c0_i32 = arith.constant 0 : i32
    %c0_i32_0 = arith.constant 0 : i32
    return %arg0, %c0_i32 : i32, i32
  }
  func.func @transform_1(%arg0: i32, %arg1: i32) -> (i32, i32) {
    %c0_i32 = arith.constant 0 : i32
    %c0_i32_0 = arith.constant 0 : i32
    return %c0_i32, %arg1 : i32, i32
  }
  func.func @transform_2(%arg0: i32, %arg1: i32) -> (i32, i32, i32) {
    %c0_i32 = arith.constant 0 : i32
    %c0_i32_0 = arith.constant 0 : i32
    %c0_i32_1 = arith.constant 0 : i32
    return %c0_i32, %arg1, %c0_i32_0 : i32, i32, i32
  }
  func.func @transform_3(%arg0: i32, %arg1: i32) -> (i32, i32) {
    %c0_i32 = arith.constant 0 : i32
    %c0_i32_0 = arith.constant 0 : i32
    %c0_i32_1 = arith.constant 0 : i32
    return %c0_i32, %c0_i32_0 : i32, i32
  }
  func.func @transform_4(%arg0: i32, %arg1: i32) -> (i32, i32) {
    %c0_i32 = arith.constant 0 : i32
    return %arg0, %arg1 : i32, i32
  }
  func.func @transform_5(%arg0: i32, %arg1: i32) -> (i32, i32) {
    %c0_i32 = arith.constant 0 : i32
    %c0_i32_0 = arith.constant 0 : i32
    return %arg0, %c0_i32 : i32, i32
  }
  func.func @transform_6(%arg0: i32, %arg1: i32) -> (i32, i32) {
    %c0_i32 = arith.constant 0 : i32
    %c0_i32_0 = arith.constant 0 : i32
    return %arg0, %c0_i32 : i32, i32
  }
  func.func @transform_7(%arg0: i32, %arg1: i32) -> (i32, i32) {
    %c0_i32 = arith.constant 0 : i32
    %c0_i32_0 = arith.constant 0 : i32
    return %arg0, %c0_i32 : i32, i32
  }
}

</mosaic_0001>

<bundles_post_ra>
// kernel: squeeze.9
= control target key start
LH: loop header
LB: loop body
LE: loop exit
PB: predicated region body
PF: predicated region fallthrough
CT: control target
= control target key end

     0   :  { %vm7_vm0 = vcmask 261120   ;;  %s37_s8 = smov 32   ;;  %s38_s9 = smov 64   ;;  %vm13_vm1 = vcmask 1048320   ;;  %vm19_vm2 = vcmask 785920   ;;  %vm25_vm3 = vcmask 523520   ;;  %s55_s0 = inlined_call_operand.vmem [shape: f32[4,32], index: 0, kind: input, shape index: {}]   ;;  %s56_s1 = inlined_call_operand.vmem [shape: f32[1,128], index: 1, kind: output, shape index: {}]  }
   0x1   :  { %v4_v0 = vld [vmem:[%s55_s0] sm:$0xf]  ;;  %s36_s0 = smov 96  }
   0x2   :  { %5 = vst [vmem:[#allocation1] sm:$0xf] %v4_v0 }
   0x9   :  { %v10_v1 = vld [vmem:[#allocation1 + $0x3] sm:$0x1]   ;;  %v22_v2 = vld [vmem:[#allocation1 + $0x1] sm:$0x1]   ;;  %v6_v3 = vld [vmem:[#allocation1] sm:$0x1]  }
   0xa   :  { %11 = vrot.lane.b32.xlu0 %v10_v1, %s36_s0  ;;  %23 = vrot.lane.b32.xlu1 %v22_v2, %s37_s8  ;;  %v16_v4 = vld [vmem:[#allocation1 + $0x2] sm:$0x1]   ;;  %8 = vst.msk [vmem:[#allocation0] sm:$0x1] %vm7_vm0, %v6_v3  }
   0xe   :  { %17 = vrot.lane.b32.xlu0 %v16_v4, %s38_s9 }
  0x7c   :  { %v12_v5 = vpop.permute.xlu0 %11   ;;  %v24_v6 = vpop.permute.xlu1 %23  }
  0x7d   :  { %14 = vst.msk [vmem:[#allocation0] sm:$0x1] %vm13_vm1, %v12_v5  }
  0x80   :  { %v18_v7 = vpop.permute.xlu0 %17  }
  0x81   :  { %20 = vst.msk [vmem:[#allocation0] sm:$0x1] %vm19_vm2, %v18_v7  }
  0x82   :  { %26 = vst.msk [vmem:[#allocation0] sm:$0x1] %vm25_vm3, %v24_v6  }
  0x89   :  { %v30_v8 = vld [vmem:[#allocation0] sm:$0x1] }
  0x8a   :  { %32 = vst [vmem:[%s56_s1] sm:$0x1] %v30_v8 }

// kernel: layer_aggregator_forward.1
= control target key start
LH: loop header
LB: loop body
LE: loop exit
PB: predicated region body
PF: predicated region fallthrough
CT: control target
= control target key end

     0   :  { %s4925_s24 = smov 0   ;;  %s4927_s25 = smov 0   ;;  %s6930_s0 = inlined_call_operand.vmem [shape: f32[128,8], index: 0, kind: input, shape index: {}]   ;;  %s6931_s1 = inlined_call_operand.vmem [shape: f32[8,128], index: 1, kind: input, shape index: {}]   ;;  %s6932_s2 = inlined_call_operand.vmem [shape: bf16[4,128,32], index: 2, kind: input, shape index: {}]   ;;  %s6933_s3 = inlined_call_operand.vmem [shape: f32[1,128], index: 3, kind: input, shape index: {}]   ;;  %s6934_s4 = inlined_call_operand.vmem [shape: s8[128,128], index: 4, kind: input, shape index: {}]   ;;  %s6935_s5 = inlined_call_operand.vmem [shape: f32[128,128], index: 5, kind: output, shape index: {0}]   ;;  %s6936_s6 = inlined_call_operand.vmem [shape: f32[128,128], index: 6, kind: output, shape index: {1}]   ;;  %s6937_s7 = inlined_call_operand.vmem [shape: f32[128,128], index: 7, kind: output, shape index: {2}]  }
   0x1   :  { %s4929_s26 = smov 0  }
   0x2 LB: > { %s30_s27 = sadd.s32 1, %s4870_s25  ;;  %p4223_p0 = scmp.ge.s32.totalorder %s4874_s26, 1  ;;  %s4874_s26 = sphi %s4929_s26, %s18_s26   ;;  %s4870_s25 = sphi %s4927_s25, %s7095_s25   ;;  %s4866_s24 = sphi %s4925_s24, %s7094_s24  }
   0x3   : > { %p32_p1 = scmp.ge.s32.totalorder %s30_s27, 2  ;;  %p291_p2 = scmp.lt.s32.totalorder %s4874_s26, 3 }
   0x5   : > { %s7097_s27 = smov (%p32_p1, %s30_s27), 0  ;;  %p292_p3 = pnand %p4223_p0, %p291_p2 }
   0x7   : > { %295 = sbr.rel (%p292_p3) target bundleno = 1750 (0x6d6), region = 40 }
   0xe   : > { %s4224_s28 = sshll.u32 %s4866_s24, 3  ;;  %v6938_v0 = vmov 0   ;;  %v4877_v9 = vmov 1   ;;  %v4878_v10 = vmov 2   ;;  %vm398_vm0 = vcmask 7168   ;;  %s4226_s10 = sshll.u32 %s4866_s24, 1 }
   0xf   : > { %4543 = vset.pattern.permute.xlu1 %v6938_v0  ;;  %4542 = vset.pattern.permute.xlu0 %v6938_v0  ;;  %p351_p4 = scmp.lt.s32.totalorder %s4224_s28, 15  ;;  %v4879_v11 = vmov -1e+30   ;;  %p367_p5 = scmp.lt.s32.totalorder %s4226_s10, 3  ;;  %v667_v12 = vlaneseq  ;;  %v568_v15 = vld [vmem:[%s6931_s1] sm:$0xff] }
  0x10   : > { %399 = vst.msk [vmem:[#allocation2] sm:$0xff] %vm398_vm0, %v4879_v11  ;;  %400 = vst.msk [vmem:[#allocation2 + $0x8] sm:$0xff] %vm398_vm0, %v4879_v11  ;;  %s4882_s12 = smov 32   ;;  %s4884_s13 = smov 96  }
  0x11   : > { %s7099_s28 = smov (!%p351_p4, %s4224_s28), 15  ;;  %401 = vst.msk [vmem:[#allocation2 + $0x10] sm:$0xff] %vm398_vm0, %v4879_v11  ;;  %402 = vst.msk [vmem:[#allocation2 + $0x18] sm:$0xff] %vm398_vm0, %v4879_v11  ;;  %s7101_s10 = smov (!%p367_p5, %s4226_s10), 3  ;;  %v5029_v13 = vshrl.u32 %v667_v12, 7 }
  0x12   : > { %s4948_s29 = sshll.u32 %s7099_s28, 3  ;;  %403 = vst.msk [vmem:[#allocation2 + $0x20] sm:$0xff] %vm398_vm0, %v4879_v11  ;;  %404 = vst.msk [vmem:[#allocation2 + $0x28] sm:$0xff] %vm398_vm0, %v4879_v11  ;;  %s4227_s11 = sshll.u32 %s7101_s10, 3 }
  0x13   : > { %s4954_s9 = scalar_lea.vmem %s6930_s0, %s4948_s29  ;;  %405 = vst.msk [vmem:[#allocation2 + $0x30] sm:$0xff] %vm398_vm0, %v4879_v11  ;;  %406 = vst.msk [vmem:[#allocation2 + $0x38] sm:$0xff] %vm398_vm0, %v4879_v11  ;;  %v669_v14 = vsub.s32 0, %v5029_v13  ;;  %s373_s14 = scalar_lea.vmem %s6934_s4, %s4227_s11  ;;  %v1260_v47 = vsub.s32 1, %v5029_v13 }
  0x14   : > { %v4957_v1 = vld [vmem:[%s4954_s9 + $0x10] sm:$0xff]  ;;  %v4960_v2 = vld [vmem:[%s4954_s9] sm:$0xff]  ;;  %v4965_v3 = vld [vmem:[%s4954_s9 + $0x18] sm:$0xff]  ;;  %407 = vst.msk [vmem:[#allocation2 + $0x40] sm:$0xff] %vm398_vm0, %v4879_v11  ;;  %s6761_s18 = scalar_lea.vmem %s6936_s6, %s4948_s29  ;;  %s6851_s21 = scalar_lea.vmem %s6937_s7, %s4948_s29 }
  0x15   : > { %639 = vperm.xlu1 %4543, %v4957_v1   ;;  %629 = vperm.xlu0 %4542, %v4960_v2   ;;  %v4968_v4 = vld [vmem:[%s4954_s9 + $0x8] sm:$0xff]  ;;  %v4974_v6 = vld [vmem:[%s4954_s9 + $0x20] sm:$0xff]  ;;  %v4981_v7 = vld [vmem:[%s4954_s9 + $0x38] sm:$0xff]  ;;  %408 = vst.msk [vmem:[#allocation2 + $0x48] sm:$0xff] %vm398_vm0, %v4879_v11  ;;  %v670_v17 = vrot.slane %v568_v15, %v669_v14  ;;  %v5084_v60 = vrot.slane %v568_v15, %v1260_v47  ;;  %v4880_v47 = vmov 0.0   ;;  %s6865_s24 = scalar_lea.vmem %s6935_s5, %s4948_s29 }
  0x16   : > { %v4971_v5 = vld [vmem:[%s4954_s9 + $0x28] sm:$0xff]  ;;  %v4984_v8 = vld [vmem:[%s4954_s9 + $0x30] sm:$0xff]  ;;  %409 = vst.msk [vmem:[#allocation2 + $0x50] sm:$0xff] %vm398_vm0, %v4879_v11  ;;  %410 = vst.msk [vmem:[#allocation2 + $0x58] sm:$0xff] %vm398_vm0, %v4879_v11 }
  0x17   : > { %411 = vst.msk [vmem:[#allocation2 + $0x60] sm:$0xff] %vm398_vm0, %v4879_v11  ;;  %412 = vst.msk [vmem:[#allocation2 + $0x68] sm:$0xff] %vm398_vm0, %v4879_v11  ;;  %v569_v16 = vld [vmem:[%s373_s14] sm:$0xff]  ;;  %v570_v25 = vld [vmem:[%s373_s14 + $0x8] sm:$0xff] }
  0x18   : > { %413 = vst.msk [vmem:[#allocation2 + $0x70] sm:$0xff] %vm398_vm0, %v4879_v11  ;;  %414 = vst.msk [vmem:[#allocation2 + $0x78] sm:$0xff] %vm398_vm0, %v4879_v11  ;;  %v5038_v18 = vunpack.c.0.s8 %v569_v16  ;;  %v5040_v23 = vunpack.c.2.s8 %v569_v16  ;;  %v5042_v24 = vunpack.c.1.s8 %v569_v16  ;;  %v5045_v30 = vunpack.c.3.s8 %v569_v16 }
  0x19   : > { %644 = vperm.xlu1 %4543, %v4965_v3   ;;  %634 = vperm.xlu0 %4542, %v4968_v4   ;;  %415 = vst.msk [vmem:[#allocation2 + $0x80] sm:$0xff] %vm398_vm0, %v4879_v11  ;;  %416 = vst.msk [vmem:[#allocation2 + $0x88] sm:$0xff] %vm398_vm0, %v4879_v11  ;;  %v5047_v34 = vunpack.c.0.s8 %v570_v25  ;;  %v5057_v41 = vunpack.c.1.s8 %v570_v25  ;;  %v5069_v48 = vunpack.c.2.s8 %v570_v25  ;;  %v5074_v57 = vunpack.c.3.s8 %v570_v25 }
  0x1a   : > { %417 = vst.msk [vmem:[#allocation2 + $0x90] sm:$0xff] %vm398_vm0, %v4879_v11  ;;  %418 = vst.msk [vmem:[#allocation2 + $0x98] sm:$0xff] %vm398_vm0, %v4879_v11  ;;  %vm619_vm1 = vcmp.ne.s32.totalorder %v5038_v18, 0  ;;  %vm621_vm4 = vcmp.ne.s32.totalorder %v5040_v23, 0  ;;  %vm620_vm5 = vcmp.ne.s32.totalorder %v5042_v24, 0  ;;  %vm622_vm7 = vcmp.ne.s32.totalorder %v5045_v30, 0 }
  0x1b   : > { %419 = vst.msk [vmem:[#allocation2 + $0xa0] sm:$0xff] %vm398_vm0, %v4879_v11  ;;  %420 = vst.msk [vmem:[#allocation2 + $0xa8] sm:$0xff] %vm398_vm0, %v4879_v11  ;;  %vm623_vm9 = vcmp.ne.s32.totalorder %v5047_v34, 0  ;;  %vm624_vm11 = vcmp.ne.s32.totalorder %v5057_v41, 0  ;;  %vm625_vm13 = vcmp.ne.s32.totalorder %v5069_v48, 0 }
  0x1c   : > { %421 = vst.msk [vmem:[#allocation2 + $0xb0] sm:$0xff] %vm398_vm0, %v4879_v11  ;;  %422 = vst.msk [vmem:[#allocation2 + $0xb8] sm:$0xff] %vm398_vm0, %v4879_v11 }
  0x1d   : > { %654 = vperm.xlu1 %4543, %v4971_v5   ;;  %649 = vperm.xlu0 %4542, %v4974_v6   ;;  %423 = vst.msk [vmem:[#allocation2 + $0xc0] sm:$0xff] %vm398_vm0, %v4879_v11  ;;  %424 = vst.msk [vmem:[#allocation2 + $0xc8] sm:$0xff] %vm398_vm0, %v4879_v11 }
  0x1e   : > { %425 = vst.msk [vmem:[#allocation2 + $0xd0] sm:$0xff] %vm398_vm0, %v4879_v11  ;;  %426 = vst.msk [vmem:[#allocation2 + $0xd8] sm:$0xff] %vm398_vm0, %v4879_v11 }
  0x1f   : > { %427 = vst.msk [vmem:[#allocation2 + $0xe0] sm:$0xff] %vm398_vm0, %v4879_v11  ;;  %428 = vst.msk [vmem:[#allocation2 + $0xe8] sm:$0xff] %vm398_vm0, %v4879_v11 }
  0x20   : > { %429 = vst.msk [vmem:[#allocation2 + $0xf0] sm:$0xff] %vm398_vm0, %v4879_v11  ;;  %430 = vst.msk [vmem:[#allocation2 + $0xf8] sm:$0xff] %vm398_vm0, %v4879_v11 }
  0x21   : > { %664 = vperm.xlu1 %4543, %v4981_v7   ;;  %659 = vperm.xlu0 %4542, %v4984_v8   ;;  %6989 = vst [vmem:[#allocation7_spill] sm:$0xff] %v5029_v13  ;;  %6990 = vst [vmem:[#allocation8_spill] sm:$0xff] %v5038_v18 }
  0x22   : > { %6991 = vst [vmem:[#allocation9_spill] sm:$0xff] %v5040_v23  ;;  %6992 = vst [vmem:[#allocation10_spill] sm:$0xff] %v5042_v24 }
  0x23   : > { %6993 = vst [vmem:[#allocation11_spill] sm:$0xff] %v5045_v30  ;;  %6994 = vst [vmem:[#allocation12_spill] sm:$0xff] %v5047_v34 }
  0x24   : > { %6995 = vst [vmem:[#allocation13_spill] sm:$0xff] %v5057_v41  ;;  %6996 = vst [vmem:[#allocation14_spill] sm:$0xff] %v5069_v48 }
  0x25   : > { %4544 = vset.pattern.permute.xlu1 %v4877_v9  ;;  %4545 = vset.pattern.permute.xlu0 %v4877_v9  ;;  %6997 = vst [vmem:[#allocation15_spill] sm:$0xff] %v5074_v57  ;;  %431 = vst.msk [vmem:[#allocation3] sm:$0xff] %vm398_vm0, %v4880_v47 }
  0x26   : > { %1227 = vperm.xlu1 %4544, %v4960_v2   ;;  %1231 = vperm.xlu0 %4545, %v4968_v4   ;;  %432 = vst.msk [vmem:[#allocation3 + $0x8] sm:$0xff] %vm398_vm0, %v4880_v47  ;;  %433 = vst.msk [vmem:[#allocation3 + $0x10] sm:$0xff] %vm398_vm0, %v4880_v47 }
  0x27   : > { %434 = vst.msk [vmem:[#allocation3 + $0x18] sm:$0xff] %vm398_vm0, %v4880_v47  ;;  %435 = vst.msk [vmem:[#allocation3 + $0x20] sm:$0xff] %vm398_vm0, %v4880_v47 }
  0x28   : > { %436 = vst.msk [vmem:[#allocation3 + $0x28] sm:$0xff] %vm398_vm0, %v4880_v47  ;;  %437 = vst.msk [vmem:[#allocation3 + $0x30] sm:$0xff] %vm398_vm0, %v4880_v47 }
  0x29   : > { %438 = vst.msk [vmem:[#allocation3 + $0x38] sm:$0xff] %vm398_vm0, %v4880_v47  ;;  %439 = vst.msk [vmem:[#allocation3 + $0x40] sm:$0xff] %vm398_vm0, %v4880_v47 }
  0x2a   : > { %1235 = vperm.xlu1 %4544, %v4957_v1   ;;  %4546 = vset.pattern.permute.xlu0 %v4878_v10  ;;  %440 = vst.msk [vmem:[#allocation3 + $0x48] sm:$0xff] %vm398_vm0, %v4880_v47  ;;  %441 = vst.msk [vmem:[#allocation3 + $0x50] sm:$0xff] %vm398_vm0, %v4880_v47 }
  0x2b   : > { %442 = vst.msk [vmem:[#allocation3 + $0x58] sm:$0xff] %vm398_vm0, %v4880_v47  ;;  %443 = vst.msk [vmem:[#allocation3 + $0x60] sm:$0xff] %vm398_vm0, %v4880_v47 }
  0x2c   : > { %444 = vst.msk [vmem:[#allocation3 + $0x68] sm:$0xff] %vm398_vm0, %v4880_v47  ;;  %445 = vst.msk [vmem:[#allocation3 + $0x70] sm:$0xff] %vm398_vm0, %v4880_v47 }
  0x2d   : > { %446 = vst.msk [vmem:[#allocation3 + $0x78] sm:$0xff] %vm398_vm0, %v4880_v47  ;;  %447 = vst.msk [vmem:[#allocation3 + $0x80] sm:$0xff] %vm398_vm0, %v4880_v47 }
  0x2e   : > { %1239 = vperm.xlu1 %4544, %v4965_v3   ;;  %448 = vst.msk [vmem:[#allocation3 + $0x88] sm:$0xff] %vm398_vm0, %v4880_v47  ;;  %449 = vst.msk [vmem:[#allocation3 + $0x90] sm:$0xff] %vm398_vm0, %v4880_v47 }
  0x2f   : > { %450 = vst.msk [vmem:[#allocation3 + $0x98] sm:$0xff] %vm398_vm0, %v4880_v47  ;;  %451 = vst.msk [vmem:[#allocation3 + $0xa0] sm:$0xff] %vm398_vm0, %v4880_v47 }
  0x30   : > { %452 = vst.msk [vmem:[#allocation3 + $0xa8] sm:$0xff] %vm398_vm0, %v4880_v47  ;;  %453 = vst.msk [vmem:[#allocation3 + $0xb0] sm:$0xff] %vm398_vm0, %v4880_v47 }
  0x31   : > { %454 = vst.msk [vmem:[#allocation3 + $0xb8] sm:$0xff] %vm398_vm0, %v4880_v47  ;;  %455 = vst.msk [vmem:[#allocation3 + $0xc0] sm:$0xff] %vm398_vm0, %v4880_v47 }
  0x32   : > { %1243 = vperm.xlu1 %4544, %v4974_v6   ;;  %456 = vst.msk [vmem:[#allocation3 + $0xc8] sm:$0xff] %vm398_vm0, %v4880_v47  ;;  %457 = vst.msk [vmem:[#allocation3 + $0xd0] sm:$0xff] %vm398_vm0, %v4880_v47 }
  0x33   : > { %458 = vst.msk [vmem:[#allocation3 + $0xd8] sm:$0xff] %vm398_vm0, %v4880_v47  ;;  %459 = vst.msk [vmem:[#allocation3 + $0xe0] sm:$0xff] %vm398_vm0, %v4880_v47 }
  0x34   : > { %460 = vst.msk [vmem:[#allocation3 + $0xe8] sm:$0xff] %vm398_vm0, %v4880_v47  ;;  %461 = vst.msk [vmem:[#allocation3 + $0xf0] sm:$0xff] %vm398_vm0, %v4880_v47 }
  0x35   : > { %462 = vst.msk [vmem:[#allocation3 + $0xf8] sm:$0xff] %vm398_vm0, %v4880_v47  ;;  %463 = vst.msk [vmem:[#allocation4] sm:$0xff] %vm398_vm0, %v4880_v47 }
  0x36   : > { %1247 = vperm.xlu1 %4544, %v4971_v5   ;;  %464 = vst.msk [vmem:[#allocation4 + $0x8] sm:$0xff] %vm398_vm0, %v4880_v47  ;;  %465 = vst.msk [vmem:[#allocation4 + $0x10] sm:$0xff] %vm398_vm0, %v4880_v47 }
  0x37   : > { %466 = vst.msk [vmem:[#allocation4 + $0x18] sm:$0xff] %vm398_vm0, %v4880_v47  ;;  %467 = vst.msk [vmem:[#allocation4 + $0x20] sm:$0xff] %vm398_vm0, %v4880_v47 }
  0x38   : > { %468 = vst.msk [vmem:[#allocation4 + $0x28] sm:$0xff] %vm398_vm0, %v4880_v47  ;;  %469 = vst.msk [vmem:[#allocation4 + $0x30] sm:$0xff] %vm398_vm0, %v4880_v47 }
  0x39   : > { %470 = vst.msk [vmem:[#allocation4 + $0x38] sm:$0xff] %vm398_vm0, %v4880_v47  ;;  %471 = vst.msk [vmem:[#allocation4 + $0x40] sm:$0xff] %vm398_vm0, %v4880_v47 }
  0x3a   : > { %1251 = vperm.xlu1 %4544, %v4984_v8   ;;  %472 = vst.msk [vmem:[#allocation4 + $0x48] sm:$0xff] %vm398_vm0, %v4880_v47  ;;  %473 = vst.msk [vmem:[#allocation4 + $0x50] sm:$0xff] %vm398_vm0, %v4880_v47 }
  0x3b   : > { %474 = vst.msk [vmem:[#allocation4 + $0x58] sm:$0xff] %vm398_vm0, %v4880_v47  ;;  %475 = vst.msk [vmem:[#allocation4 + $0x60] sm:$0xff] %vm398_vm0, %v4880_v47 }
  0x3c   : > { %476 = vst.msk [vmem:[#allocation4 + $0x68] sm:$0xff] %vm398_vm0, %v4880_v47  ;;  %477 = vst.msk [vmem:[#allocation4 + $0x70] sm:$0xff] %vm398_vm0, %v4880_v47 }
  0x3d   : > { %478 = vst.msk [vmem:[#allocation4 + $0x78] sm:$0xff] %vm398_vm0, %v4880_v47  ;;  %479 = vst.msk [vmem:[#allocation4 + $0x80] sm:$0xff] %vm398_vm0, %v4880_v47 }
  0x3e   : > { %1255 = vperm.xlu1 %4544, %v4981_v7   ;;  %480 = vst.msk [vmem:[#allocation4 + $0x88] sm:$0xff] %vm398_vm0, %v4880_v47  ;;  %481 = vst.msk [vmem:[#allocation4 + $0x90] sm:$0xff] %vm398_vm0, %v4880_v47 }
  0x3f   : > { %482 = vst.msk [vmem:[#allocation4 + $0x98] sm:$0xff] %vm398_vm0, %v4880_v47  ;;  %483 = vst.msk [vmem:[#allocation4 + $0xa0] sm:$0xff] %vm398_vm0, %v4880_v47 }
  0x40   : > { %484 = vst.msk [vmem:[#allocation4 + $0xa8] sm:$0xff] %vm398_vm0, %v4880_v47  ;;  %485 = vst.msk [vmem:[#allocation4 + $0xb0] sm:$0xff] %vm398_vm0, %v4880_v47 }
  0x41   : > { %486 = vst.msk [vmem:[#allocation4 + $0xb8] sm:$0xff] %vm398_vm0, %v4880_v47  ;;  %487 = vst.msk [vmem:[#allocation4 + $0xc0] sm:$0xff] %vm398_vm0, %v4880_v47 }
  0x42   : > { %4547 = vset.pattern.permute.xlu1 %v4878_v10  ;;  %488 = vst.msk [vmem:[#allocation4 + $0xc8] sm:$0xff] %vm398_vm0, %v4880_v47  ;;  %489 = vst.msk [vmem:[#allocation4 + $0xd0] sm:$0xff] %vm398_vm0, %v4880_v47 }
  0x43   : > { %490 = vst.msk [vmem:[#allocation4 + $0xd8] sm:$0xff] %vm398_vm0, %v4880_v47  ;;  %491 = vst.msk [vmem:[#allocation4 + $0xe0] sm:$0xff] %vm398_vm0, %v4880_v47 }
  0x44   : > { %492 = vst.msk [vmem:[#allocation4 + $0xe8] sm:$0xff] %vm398_vm0, %v4880_v47  ;;  %493 = vst.msk [vmem:[#allocation4 + $0xf0] sm:$0xff] %vm398_vm0, %v4880_v47 }
  0x45   : > { %494 = vst.msk [vmem:[#allocation4 + $0xf8] sm:$0xff] %vm398_vm0, %v4880_v47 }
  0x94   : > { %v640_v19 = vpop.permute.xlu1 %639  ;;  %v630_v20 = vpop.permute.xlu0 %629 }
  0x95   : > { %v673_v21 = vadd.f32 %v670_v17, %v640_v19  ;;  %v671_v22 = vadd.f32 %v670_v17, %v630_v20 }
  0x97   : > { %vm679_vm2 = vcmp.gt.f32.partialorder %v671_v22, 0.0  ;;  %v687_v26 = vmul.f32 0.2, %v671_v22  ;;  %v689_v27 = vmul.f32 0.2, %v673_v21  ;;  %vm681_vm3 = vcmp.gt.f32.partialorder %v673_v21, 0.0 }
  0x98   : > { %v645_v28 = vpop.permute.xlu1 %644  ;;  %v635_v29 = vpop.permute.xlu0 %634 }
  0x99   : > { %v674_v31 = vadd.f32 %v670_v17, %v645_v28  ;;  %v672_v32 = vadd.f32 %v670_v17, %v635_v29  ;;  %v695_v33 = vsel %vm679_vm2, %v671_v22, %v687_v26  ;;  %v697_v36 = vsel %vm681_vm3, %v673_v21, %v689_v27 }
  0x9a   : > { %v5051_v35 = vsel %vm619_vm1, %v695_v33, -1e+30  ;;  %v5062_v45 = vsel %vm621_vm4, %v697_v36, -1e+30  ;;  %vm626_vm2 = vcmp.ne.s32.totalorder %v5074_v57, 0 }
  0x9b   : > { %719 = vmax.xlane.f32.xlu0 %v5051_v35  ;;  %vm680_vm6 = vcmp.gt.f32.partialorder %v672_v32, 0.0  ;;  %v688_v37 = vmul.f32 0.2, %v672_v32  ;;  %v690_v38 = vmul.f32 0.2, %v674_v31  ;;  %vm682_vm8 = vcmp.gt.f32.partialorder %v674_v31, 0.0 }
  0x9c   : > { %v655_v39 = vpop.permute.xlu1 %654  ;;  %v650_v40 = vpop.permute.xlu0 %649 }
  0x9d   : > { %v676_v42 = vadd.f32 %v670_v17, %v655_v39  ;;  %v675_v43 = vadd.f32 %v670_v17, %v650_v40  ;;  %v696_v44 = vsel %vm680_vm6, %v672_v32, %v688_v37  ;;  %v698_v49 = vsel %vm682_vm8, %v674_v31, %v690_v38 }
  0x9e   : > { %v5066_v46 = vsel %vm620_vm5, %v696_v44, -1e+30  ;;  %v5078_v58 = vsel %vm622_vm7, %v698_v49, -1e+30 }
  0x9f   : > { %723 = vmax.xlane.f32.xlu0 %v5062_v45  ;;  %721 = vmax.xlane.f32.xlu1 %v5066_v46  ;;  %vm683_vm10 = vcmp.gt.f32.partialorder %v675_v43, 0.0  ;;  %v691_v50 = vmul.f32 0.2, %v675_v43  ;;  %v692_v51 = vmul.f32 0.2, %v676_v42  ;;  %vm684_vm12 = vcmp.gt.f32.partialorder %v676_v42, 0.0 }
  0xa0   : > { %v665_v52 = vpop.permute.xlu1 %664  ;;  %v660_v53 = vpop.permute.xlu0 %659 }
  0xa1   : > { %v678_v54 = vadd.f32 %v670_v17, %v665_v52  ;;  %v677_v55 = vadd.f32 %v670_v17, %v660_v53  ;;  %v699_v56 = vsel %vm683_vm10, %v675_v43, %v691_v50  ;;  %v700_v61 = vsel %vm684_vm12, %v676_v42, %v692_v51 }
  0xa2   : > { %v5082_v59 = vsel %vm623_vm9, %v699_v56, -1e+30  ;;  %v5092_v14 = vsel %vm624_vm11, %v700_v61, -1e+30 }
  0xa3   : > { %725 = vmax.xlane.f32.xlu0 %v5078_v58  ;;  %727 = vmax.xlane.f32.xlu1 %v5082_v59  ;;  %vm685_vm14 = vcmp.gt.f32.partialorder %v677_v55, 0.0  ;;  %v693_v62 = vmul.f32 0.2, %v677_v55  ;;  %v694_v63 = vmul.f32 0.2, %v678_v54  ;;  %vm686_vm15 = vcmp.gt.f32.partialorder %v678_v54, 0.0 }
  0xa5   : > { %v1228_v9 = vpop.permute.xlu1 %1227  ;;  %v701_v10 = vsel %vm685_vm14, %v677_v55, %v693_v62  ;;  %v1232_v11 = vpop.permute.xlu0 %1231  ;;  %v702_v17 = vsel %vm686_vm15, %v678_v54, %v694_v63 }
  0xa6   : > { %v1262_v12 = vadd.f32 %v5084_v60, %v1228_v9  ;;  %v5096_v15 = vsel %vm625_vm13, %v701_v10, -1e+30  ;;  %v1263_v16 = vadd.f32 %v5084_v60, %v1232_v11  ;;  %v5105_v25 = vsel %vm626_vm2, %v702_v17, -1e+30 }
  0xa7   : > { %729 = vmax.xlane.f32.xlu0 %v5092_v14  ;;  %731 = vmax.xlane.f32.xlu1 %v5096_v15 }
  0xa8   : > { %vm1270_vm3 = vcmp.gt.f32.partialorder %v1262_v12, 0.0  ;;  %v1278_v19 = vmul.f32 0.2, %v1262_v12  ;;  %vm1271_vm6 = vcmp.gt.f32.partialorder %v1263_v16, 0.0  ;;  %v1279_v20 = vmul.f32 0.2, %v1263_v16 }
  0xa9   : > { %v1236_v21 = vpop.permute.xlu1 %1235 }
  0xaa   : > { %v1264_v22 = vadd.f32 %v5084_v60, %v1236_v21  ;;  %v1286_v26 = vsel %vm1270_vm3, %v1262_v12, %v1278_v19  ;;  %v1287_v27 = vsel %vm1271_vm6, %v1263_v16, %v1279_v20  ;;  %v4556_v21 = vld [vmem:[%s6932_s2 + $0x10] sm:$0xff]   ;;  %vm495_vm6 = vcmask 261120  }
  0xab   : > { %733 = vmax.xlane.f32.xlu0 %v5105_v25  ;;  %v5110_v28 = vsel %vm619_vm1, %v1286_v26, -1e+30  ;;  %v5115_v29 = vsel %vm620_vm5, %v1287_v27, -1e+30  ;;  %v5316_v26 = vld [vmem:[#allocation2 + $0x18] sm:$0xff]  ;;  %498 = vst.msk [vmem:[#allocation5 + $0x10] sm:$0xff] %vm495_vm6, %v4880_v47 }
  0xac   : > { %1311 = vmax.xlane.f32.xlu1 %v5110_v28  ;;  %vm1272_vm8 = vcmp.gt.f32.partialorder %v1264_v22, 0.0  ;;  %v1280_v31 = vmul.f32 0.2, %v1264_v22  ;;  %496 = vst.msk [vmem:[#allocation5] sm:$0xff] %vm495_vm6, %v4880_v47  ;;  %497 = vst.msk [vmem:[#allocation5 + $0x8] sm:$0xff] %vm495_vm6, %v4880_v47 }
  0xad   : > { %v1240_v32 = vpop.permute.xlu1 %1239  ;;  %499 = vst.msk [vmem:[#allocation5 + $0x18] sm:$0xff] %vm495_vm6, %v4880_v47  ;;  %500 = vst.msk [vmem:[#allocation5 + $0x20] sm:$0xff] %vm495_vm6, %v4880_v47 }
  0xae   : > { %v1265_v33 = vadd.f32 %v5084_v60, %v1240_v32  ;;  %v1288_v36 = vsel %vm1272_vm8, %v1264_v22, %v1280_v31  ;;  %v715_v22 = vld [vmem:[#allocation2 + $0x20] sm:$0xff]  ;;  %501 = vst.msk [vmem:[#allocation5 + $0x28] sm:$0xff] %vm495_vm6, %v4880_v47  ;;  %502 = vst.msk [vmem:[#allocation5 + $0x30] sm:$0xff] %vm495_vm6, %v4880_v47 }
  0xaf   : > { %1313 = vmax.xlane.f32.xlu0 %v5115_v29  ;;  %v5121_v37 = vsel %vm621_vm4, %v1288_v36, -1e+30  ;;  %503 = vst.msk [vmem:[#allocation5 + $0x38] sm:$0xff] %vm495_vm6, %v4880_v47  ;;  %504 = vst.msk [vmem:[#allocation5 + $0x40] sm:$0xff] %vm495_vm6, %v4880_v47 }
  0xb0   : > { %1315 = vmax.xlane.f32.xlu1 %v5121_v37  ;;  %vm1273_vm10 = vcmp.gt.f32.partialorder %v1265_v33, 0.0  ;;  %v1281_v38 = vmul.f32 0.2, %v1265_v33  ;;  %505 = vst.msk [vmem:[#allocation5 + $0x48] sm:$0xff] %vm495_vm6, %v4880_v47  ;;  %506 = vst.msk [vmem:[#allocation5 + $0x50] sm:$0xff] %vm495_vm6, %v4880_v47 }
  0xb1   : > { %v1244_v39 = vpop.permute.xlu1 %1243  ;;  %507 = vst.msk [vmem:[#allocation5 + $0x58] sm:$0xff] %vm495_vm6, %v4880_v47  ;;  %508 = vst.msk [vmem:[#allocation5 + $0x60] sm:$0xff] %vm495_vm6, %v4880_v47 }
  0xb2   : > { %v5125_v40 = vadd.f32 %v5084_v60, %v1244_v39  ;;  %v1289_v42 = vsel %vm1273_vm10, %v1265_v33, %v1281_v38  ;;  %v4557_v38 = vld [vmem:[%s6932_s2 + $0x18] sm:$0xff]   ;;  %v717_v39 = vld [vmem:[#allocation2 + $0x30] sm:$0xff]  ;;  %509 = vst.msk [vmem:[#allocation5 + $0x68] sm:$0xff] %vm495_vm6, %v4880_v47  ;;  %510 = vst.msk [vmem:[#allocation5 + $0x70] sm:$0xff] %vm495_vm6, %v4880_v47 }
  0xb3   : > { %v5129_v43 = vsel %vm622_vm7, %v1289_v42, -1e+30  ;;  %511 = vst.msk [vmem:[#allocation5 + $0x78] sm:$0xff] %vm495_vm6, %v4880_v47  ;;  %512 = vst.msk [vmem:[#allocation5 + $0x80] sm:$0xff] %vm495_vm6, %v4880_v47 }
  0xb4   : > { %1317 = vmax.xlane.f32.xlu0 %v5129_v43  ;;  %vm1274_vm12 = vcmp.gt.f32.partialorder %v5125_v40, 0.0  ;;  %v5134_v44 = vmul.f32 0.2, %v5125_v40  ;;  %513 = vst.msk [vmem:[#allocation5 + $0x88] sm:$0xff] %vm495_vm6, %v4880_v47  ;;  %514 = vst.msk [vmem:[#allocation5 + $0x90] sm:$0xff] %vm495_vm6, %v4880_v47 }
  0xb5   : > { %v1248_v49 = vpop.permute.xlu1 %1247  ;;  %515 = vst.msk [vmem:[#allocation5 + $0x98] sm:$0xff] %vm495_vm6, %v4880_v47  ;;  %516 = vst.msk [vmem:[#allocation5 + $0xa0] sm:$0xff] %vm495_vm6, %v4880_v47 }
  0xb6   : > { %v1267_v50 = vadd.f32 %v5084_v60, %v1248_v49  ;;  %v1290_v51 = vsel %vm1274_vm12, %v5125_v40, %v5134_v44  ;;  %v5328_v40 = vld [vmem:[#allocation2 + $0x28] sm:$0xff]  ;;  %517 = vst.msk [vmem:[#allocation5 + $0xa8] sm:$0xff] %vm495_vm6, %v4880_v47  ;;  %518 = vst.msk [vmem:[#allocation5 + $0xb0] sm:$0xff] %vm495_vm6, %v4880_v47 }
  0xb7   : > { %v5271_v52 = vsel %vm623_vm9, %v1290_v51, -1e+30  ;;  %519 = vst.msk [vmem:[#allocation5 + $0xb8] sm:$0xff] %vm495_vm6, %v4880_v47  ;;  %520 = vst.msk [vmem:[#allocation5 + $0xc0] sm:$0xff] %vm495_vm6, %v4880_v47 }
  0xb8   : > { %1319 = vmax.xlane.f32.xlu1 %v5271_v52  ;;  %vm1275_vm14 = vcmp.gt.f32.partialorder %v1267_v50, 0.0  ;;  %v1283_v53 = vmul.f32 0.2, %v1267_v50  ;;  %521 = vst.msk [vmem:[#allocation5 + $0xc8] sm:$0xff] %vm495_vm6, %v4880_v47  ;;  %522 = vst.msk [vmem:[#allocation5 + $0xd0] sm:$0xff] %vm495_vm6, %v4880_v47 }
  0xb9   : > { %v1252_v54 = vpop.permute.xlu1 %1251  ;;  %523 = vst.msk [vmem:[#allocation5 + $0xd8] sm:$0xff] %vm495_vm6, %v4880_v47  ;;  %524 = vst.msk [vmem:[#allocation5 + $0xe0] sm:$0xff] %vm495_vm6, %v4880_v47 }
  0xba   : > { %v1268_v55 = vadd.f32 %v5084_v60, %v1252_v54  ;;  %v1291_v56 = vsel %vm1275_vm14, %v1267_v50, %v1283_v53  ;;  %v4558_v54 = vld [vmem:[%s6932_s2 + $0x20] sm:$0xff]   ;;  %525 = vst.msk [vmem:[#allocation5 + $0xe8] sm:$0xff] %vm495_vm6, %v4880_v47  ;;  %526 = vst.msk [vmem:[#allocation5 + $0xf0] sm:$0xff] %vm495_vm6, %v4880_v47 }
  0xbb   : > { %v5277_v61 = vsel %vm624_vm11, %v1291_v56, -1e+30  ;;  %v5346_v56 = vld [vmem:[#allocation2 + $0x40] sm:$0xff]  ;;  %527 = vst.msk [vmem:[#allocation5 + $0xf8] sm:$0xff] %vm495_vm6, %v4880_v47  ;;  %528 = vst.msk [vmem:[#allocation6] sm:$0xff] %vm495_vm6, %v4880_v47 }
  0xbc   : > { %1321 = vmax.xlane.f32.xlu0 %v5277_v61  ;;  %vm1276_vm15 = vcmp.gt.f32.partialorder %v1268_v55, 0.0  ;;  %v1284_v62 = vmul.f32 0.2, %v1268_v55  ;;  %529 = vst.msk [vmem:[#allocation6 + $0x8] sm:$0xff] %vm495_vm6, %v4880_v47  ;;  %530 = vst.msk [vmem:[#allocation6 + $0x10] sm:$0xff] %vm495_vm6, %v4880_v47 }
  0xbd   : > { %v1256_v63 = vpop.permute.xlu1 %1255  ;;  %531 = vst.msk [vmem:[#allocation6 + $0x18] sm:$0xff] %vm495_vm6, %v4880_v47  ;;  %532 = vst.msk [vmem:[#allocation6 + $0x20] sm:$0xff] %vm495_vm6, %v4880_v47 }
  0xbe   : > { %v1269_v9 = vadd.f32 %v5084_v60, %v1256_v63  ;;  %v1292_v10 = vsel %vm1276_vm15, %v1268_v55, %v1284_v62  ;;  %v5340_v55 = vld [vmem:[#allocation2 + $0x38] sm:$0xff]  ;;  %533 = vst.msk [vmem:[#allocation6 + $0x28] sm:$0xff] %vm495_vm6, %v4880_v47  ;;  %534 = vst.msk [vmem:[#allocation6 + $0x30] sm:$0xff] %vm495_vm6, %v4880_v47 }
  0xbf   : > { %v5283_v11 = vsel %vm625_vm13, %v1292_v10, -1e+30  ;;  %535 = vst.msk [vmem:[#allocation6 + $0x38] sm:$0xff] %vm495_vm6, %v4880_v47  ;;  %536 = vst.msk [vmem:[#allocation6 + $0x40] sm:$0xff] %vm495_vm6, %v4880_v47 }
  0xc0   : > { %1323 = vmax.xlane.f32.xlu1 %v5283_v11  ;;  %vm1277_vm3 = vcmp.gt.f32.partialorder %v1269_v9, 0.0  ;;  %v1285_v12 = vmul.f32 0.2, %v1269_v9  ;;  %537 = vst.msk [vmem:[#allocation6 + $0x48] sm:$0xff] %vm495_vm6, %v4880_v47  ;;  %538 = vst.msk [vmem:[#allocation6 + $0x50] sm:$0xff] %vm495_vm6, %v4880_v47 }
  0xc1   : > { %539 = vst.msk [vmem:[#allocation6 + $0x58] sm:$0xff] %vm495_vm6, %v4880_v47  ;;  %540 = vst.msk [vmem:[#allocation6 + $0x60] sm:$0xff] %vm495_vm6, %v4880_v47 }
  0xc2   : > { %v1293_v16 = vsel %vm1277_vm3, %v1269_v9, %v1285_v12  ;;  %541 = vst.msk [vmem:[#allocation6 + $0x68] sm:$0xff] %vm495_vm6, %v4880_v47  ;;  %542 = vst.msk [vmem:[#allocation6 + $0x70] sm:$0xff] %vm495_vm6, %v4880_v47 }
  0xc3   : > { %v5288_v17 = vsel %vm626_vm2, %v1293_v16, -1e+30  ;;  %v4559_v16 = vld [vmem:[%s6932_s2 + $0x28] sm:$0xff]   ;;  %543 = vst.msk [vmem:[#allocation6 + $0x78] sm:$0xff] %vm495_vm6, %v4880_v47  ;;  %544 = vst.msk [vmem:[#allocation6 + $0x80] sm:$0xff] %vm495_vm6, %v4880_v47 }
  0xc4   : > { %1325 = vmax.xlane.f32.xlu0 %v5288_v17  ;;  %545 = vst.msk [vmem:[#allocation6 + $0x88] sm:$0xff] %vm495_vm6, %v4880_v47  ;;  %546 = vst.msk [vmem:[#allocation6 + $0x90] sm:$0xff] %vm495_vm6, %v4880_v47 }
  0xc5   : > { %547 = vst.msk [vmem:[#allocation6 + $0x98] sm:$0xff] %vm495_vm6, %v4880_v47  ;;  %548 = vst.msk [vmem:[#allocation6 + $0xa0] sm:$0xff] %vm495_vm6, %v4880_v47 }
  0xc6   : > { %549 = vst.msk [vmem:[#allocation6 + $0xa8] sm:$0xff] %vm495_vm6, %v4880_v47  ;;  %550 = vst.msk [vmem:[#allocation6 + $0xb0] sm:$0xff] %vm495_vm6, %v4880_v47 }
  0xc7   : > { %551 = vst.msk [vmem:[#allocation6 + $0xb8] sm:$0xff] %vm495_vm6, %v4880_v47  ;;  %552 = vst.msk [vmem:[#allocation6 + $0xc0] sm:$0xff] %vm495_vm6, %v4880_v47 }
  0xc8   : > { %553 = vst.msk [vmem:[#allocation6 + $0xc8] sm:$0xff] %vm495_vm6, %v4880_v47  ;;  %554 = vst.msk [vmem:[#allocation6 + $0xd0] sm:$0xff] %vm495_vm6, %v4880_v47 }
  0xc9   : > { %555 = vst.msk [vmem:[#allocation6 + $0xd8] sm:$0xff] %vm495_vm6, %v4880_v47  ;;  %556 = vst.msk [vmem:[#allocation6 + $0xe0] sm:$0xff] %vm495_vm6, %v4880_v47 }
  0xca   : > { %557 = vst.msk [vmem:[#allocation6 + $0xe8] sm:$0xff] %vm495_vm6, %v4880_v47  ;;  %558 = vst.msk [vmem:[#allocation6 + $0xf0] sm:$0xff] %vm495_vm6, %v4880_v47 }
  0xcb   : > { %559 = vst.msk [vmem:[#allocation6 + $0xf8] sm:$0xff] %vm495_vm6, %v4880_v47 }
  0xd1   : > { %1826 = vperm.xlu1 %4547, %v4968_v4   ;;  %v4554_v4 = vld [vmem:[%s6932_s2] sm:$0xff]  }
  0xd2   : > { %4381 = vmatprep.subr.bf16.mxu0 %v4554_v4 }
  0xd3   : > { %4382 = vmatpush3.bf16.msra.mxu0 %v4554_v4  ;;  %v4560_v4 = vld [vmem:[%s6932_s2 + $0x40] sm:$0xff]  }
  0xd4   : > { %4413 = vmatprep.subr.bf16.mxu1 %v4560_v4 }
  0xd5   : > { %1830 = vperm.xlu1 %4547, %v4957_v1   ;;  %v4555_v1 = vld [vmem:[%s6932_s2 + $0x8] sm:$0xff]   ;;  %4414 = vmatpush3.bf16.msra.mxu1 %v4560_v4 }
  0xd6   : > { %4383 = vmatprep.subr.bf16.mxu0 %v4555_v1  ;;  %v5424_v4 = vld [vmem:[#allocation2 + $0x68] sm:$0xff] }
  0xd7   : > { %4384 = vmatpush3.bf16.msra.mxu0 %v4555_v1  ;;  %7003 = vst [vmem:[#allocation21_spill] sm:$0xff] %v5424_v4 }
  0xd8   : > { %4385 = vmatprep.subr.bf16.mxu0 %v4556_v21 }
  0xd9   : > { %1834 = vperm.xlu1 %4547, %v4965_v3  }
  0xda   : > { %1822 = vperm.xlu0 %4546, %v4960_v2   ;;  %v711_v2 = vld [vmem:[#allocation2] sm:$0xff] }
  0xdb   : > { %4386 = vmatpush3.bf16.msra.mxu0 %v4556_v21 }
  0xdc   : > { %4387 = vmatprep.subr.bf16.mxu0 %v4557_v38 }
  0xdd   : > { %1838 = vperm.xlu1 %4547, %v4974_v6   ;;  %v5307_v6 = vld [vmem:[#allocation2 + $0x8] sm:$0xff] }
  0xde   : > { %4549 = vset.pattern.permute.xlu0 %v6938_v0 }
  0xdf   : > { %4388 = vmatpush3.bf16.msra.mxu0 %v4557_v38 }
  0xe0   : > { %4389 = vmatprep.subr.bf16.mxu0 %v4558_v54 }
  0xe1   : > { %1842 = vperm.xlu1 %4547, %v4971_v5  }
  0xe3   : > { %4390 = vmatpush3.bf16.msra.mxu0 %v4558_v54  ;;  %v5408_v54 = vld [vmem:[#allocation2 + $0x60] sm:$0xff] }
  0xe4   : > { %4391 = vmatprep.subr.bf16.mxu0 %v4559_v16 }
  0xe5   : > { %1846 = vperm.xlu1 %4547, %v4984_v8  }
  0xe7   : > { %4392 = vmatpush3.bf16.msra.mxu0 %v4559_v16 }
  0xe9   : > { %1850 = vperm.xlu1 %4547, %v4981_v7   ;;  %v713_v7 = vld [vmem:[#allocation2 + $0x10] sm:$0xff] }
  0xed   : > { %4548 = vset.pattern.permute.xlu1 %v6938_v0 }
 0x128   : > { %v720_v3 = vpop.xlane.xlu0 %719 }
 0x129   : > { %v735_v5 = vmax.f32 %v711_v2, %v720_v3  ;;  %v5365_v3 = vld [vmem:[#allocation2 + $0x50] sm:$0xff] }
 0x12b   : > { %1218 = vst.msk [vmem:[#allocation2] sm:$0xff] %vm398_vm0, %v735_v5  ;;  %769 = vperm.xlu1 %4548, %v735_v5   ;;  %v743_v27 = vsub.f32 %v711_v2, %v735_v5  ;;  %v5360_v2 = vld [vmem:[#allocation2 + $0x48] sm:$0xff] }
 0x12c   : > { %v722_v8 = vpop.xlane.xlu1 %721  ;;  %v724_v60 = vpop.xlane.xlu0 %723 }
 0x12d   : > { %v5311_v19 = vmax.f32 %v5307_v6, %v722_v8  ;;  %v737_v20 = vmax.f32 %v713_v7, %v724_v60  ;;  %v751_v42 = vmul.f32 1.442695, %v743_v27  ;;  %v4562_v27 = vld [vmem:[%s6932_s2 + $0x48] sm:$0xff]  }
 0x12e   : > { %4415 = vmatprep.subr.bf16.mxu1 %v4562_v27 }
 0x12f   : > { %1219 = vst.msk [vmem:[#allocation2 + $0x8] sm:$0xff] %vm398_vm0, %v5311_v19  ;;  %1220 = vst.msk [vmem:[#allocation2 + $0x10] sm:$0xff] %vm398_vm0, %v737_v20  ;;  %774 = vperm.xlu0 %4549, %v5311_v19   ;;  %779 = vperm.xlu1 %4548, %v737_v20   ;;  %v745_v44 = vsub.f32 %v713_v7, %v737_v20  ;;  %4586 = vpow2.f32 %v751_v42 }
 0x130   : > { %v728_v31 = vpop.xlane.xlu1 %727  ;;  %v726_v32 = vpop.xlane.xlu0 %725  ;;  %4416 = vmatpush3.bf16.msra.mxu1 %v4562_v27 }
 0x131   : > { %v739_v33 = vmax.f32 %v715_v22, %v728_v31  ;;  %v5323_v36 = vmax.f32 %v5316_v26, %v726_v32  ;;  %v755_v62 = vmul.f32 1.442695, %v745_v44  ;;  %v4563_v44 = vld [vmem:[%s6932_s2 + $0x38] sm:$0xff]  }
 0x133   : > { %1222 = vst.msk [vmem:[#allocation2 + $0x20] sm:$0xff] %vm398_vm0, %v739_v33  ;;  %1221 = vst.msk [vmem:[#allocation2 + $0x18] sm:$0xff] %vm398_vm0, %v5323_v36  ;;  %789 = vperm.xlu0 %4549, %v739_v33   ;;  %784 = vperm.xlu1 %4548, %v5323_v36   ;;  %v747_v63 = vsub.f32 %v715_v22, %v739_v33  ;;  %4588 = vpow2.f32 %v755_v62  ;;  %v4561_v22 = vld [vmem:[%s6932_s2 + $0x30] sm:$0xff]   ;;  %v5389_v33 = vld [vmem:[#allocation2 + $0x58] sm:$0xff] }
 0x134   : > { %v732_v49 = vpop.xlane.xlu1 %731  ;;  %v730_v50 = vpop.xlane.xlu0 %729  ;;  %6998 = vst [vmem:[#allocation16_spill] sm:$0xff] %v5389_v33  ;;  %4393 = vmatprep.subr.bf16.mxu0 %v4561_v22 }
 0x135   : > { %v741_v51 = vmax.f32 %v717_v39, %v732_v49  ;;  %v5335_v53 = vmax.f32 %v5328_v40, %v730_v50  ;;  %v759_v5 = vmul.f32 1.442695, %v747_v63  ;;  %4394 = vmatpush3.bf16.msra.mxu0 %v4561_v22  ;;  %v4564_v49 = vld [vmem:[%s6932_s2 + $0x50] sm:$0xff]  }
 0x136   : > { %4395 = vmatprep.subr.bf16.mxu0 %v4563_v44  ;;  %4417 = vmatprep.subr.bf16.mxu1 %v4564_v49 }
 0x137   : > { %1224 = vst.msk [vmem:[#allocation2 + $0x30] sm:$0xff] %vm398_vm0, %v741_v51  ;;  %1223 = vst.msk [vmem:[#allocation2 + $0x28] sm:$0xff] %vm398_vm0, %v5335_v53  ;;  %799 = vperm.xlu0 %4549, %v741_v51   ;;  %794 = vperm.xlu1 %4548, %v5335_v53   ;;  %v749_v7 = vsub.f32 %v717_v39, %v741_v51  ;;  %4590 = vpow2.f32 %v759_v5  ;;  %v744_v5 = vsub.f32 %v5307_v6, %v5311_v19  ;;  %v5444_v6 = vld [vmem:[#allocation2 + $0x70] sm:$0xff] }
 0x138   : > { %v734_v9 = vpop.xlane.xlu0 %733  ;;  %4418 = vmatpush3.bf16.msra.mxu1 %v4564_v49  ;;  %7006 = vst [vmem:[#allocation24_spill] sm:$0xff] %v5444_v6 }
 0x139   : > { %v5349_v10 = vmax.f32 %v5340_v55, %v734_v9  ;;  %v1312_v12 = vpop.xlane.xlu1 %1311  ;;  %v763_v38 = vmul.f32 1.442695, %v749_v7  ;;  %v5401_v50 = vpop.eup %4586  ;;  %4396 = vmatpush3.bf16.msra.mxu0 %v4563_v44  ;;  %v4565_v9 = vld [vmem:[%s6932_s2 + $0x58] sm:$0xff]   ;;  %v5446_v19 = vmul.f32 1.442695, %v744_v5 }
 0x13a   : > { %v5358_v1 = vmax.f32 %v5346_v56, %v1312_v12  ;;  %6999 = vst [vmem:[#allocation17_spill] sm:$0xff] %v5401_v50  ;;  %4419 = vmatprep.subr.bf16.mxu1 %v4565_v9  ;;  %v5594_v5 = vld [vmem:[#allocation2 + $0x78] sm:$0xff] }
 0x13b   : > { %1225 = vst.msk [vmem:[#allocation2 + $0x38] sm:$0xff] %vm398_vm0, %v5349_v10  ;;  %804 = vperm.xlu1 %4548, %v5349_v10   ;;  %4592 = vpow2.f32 %v763_v38  ;;  %v746_v38 = vsub.f32 %v5316_v26, %v5323_v36  ;;  %7009 = vst [vmem:[#allocation27_spill] sm:$0xff] %v5594_v5  ;;  %v4568_v26 = vld [vmem:[%s6932_s2 + $0x70] sm:$0xff]  }
 0x13c   : > { %1813 = vst.msk [vmem:[#allocation2 + $0x40] sm:$0xff] %vm398_vm0, %v5358_v1  ;;  %v1314_v60 = vpop.xlane.xlu0 %1313  ;;  %4420 = vmatpush3.bf16.msra.mxu1 %v4565_v9  ;;  %v4567_v9 = vld [vmem:[%s6932_s2 + $0x68] sm:$0xff]   ;;  %4594 = vpow2.f32 %v5446_v19  ;;  %v4569_v19 = vld [vmem:[%s6932_s2 + $0x78] sm:$0xff]  }
 0x13d   : > { %v5372_v20 = vmax.f32 %v5360_v2, %v1314_v60  ;;  %v1316_v21 = vpop.xlane.xlu1 %1315  ;;  %v5417_v12 = vpop.eup %4588  ;;  %v757_v47 = vmul.f32 1.442695, %v746_v38 }
 0x13e   : > { %v5381_v31 = vmax.f32 %v5365_v3, %v1316_v21  ;;  %7001 = vst [vmem:[#allocation19_spill] sm:$0xff] %v5417_v12  ;;  %v5435_v21 = vld [vmem:[%s6932_s2 + $0x60] sm:$0xff]  }
 0x13f   : > { %1814 = vst.msk [vmem:[#allocation2 + $0x48] sm:$0xff] %vm398_vm0, %v5372_v20  ;;  %1361 = vperm.xlu1 %4548, %v5358_v1   ;;  %1366 = vperm.xlu0 %4549, %v5372_v20   ;;  %4596 = vpow2.f32 %v757_v47 }
 0x140   : > { %1815 = vst.msk [vmem:[#allocation2 + $0x50] sm:$0xff] %vm398_vm0, %v5381_v31  ;;  %4421 = vmatprep.subr.bf16.mxu1 %v5435_v21 }
 0x141   : > { %v1318_v42 = vpop.xlane.xlu0 %1317  ;;  %v5437_v22 = vpop.eup %4590  ;;  %4422 = vmatpush3.bf16.msra.mxu1 %v5435_v21 }
 0x142   : > { %v5404_v51 = vmax.f32 %v5389_v33, %v1318_v42  ;;  %7004 = vst [vmem:[#allocation22_spill] sm:$0xff] %v5437_v22  ;;  %4423 = vmatprep.subr.bf16.mxu1 %v4567_v9 }
 0x143   : > { %1371 = vperm.xlu1 %4548, %v5381_v31   ;;  %1026 = vperm.xlu0 %4549, %v5401_v50  }
 0x144   : > { %7000 = vst [vmem:[#allocation18_spill] sm:$0xff] %v5404_v51  ;;  %1816 = vst.msk [vmem:[#allocation2 + $0x58] sm:$0xff] %vm398_vm0, %v5404_v51 }
 0x145   : > { %v1320_v63 = vpop.xlane.xlu1 %1319  ;;  %v5584_v49 = vpop.eup %4592  ;;  %4424 = vmatpush3.bf16.msra.mxu1 %v4567_v9 }
 0x146   : > { %v5420_v16 = vmax.f32 %v5408_v54, %v1320_v63  ;;  %7007 = vst [vmem:[#allocation25_spill] sm:$0xff] %v5584_v49  ;;  %4425 = vmatprep.subr.bf16.mxu1 %v4568_v26  ;;  %v5623_v9 = vpop.eup %4594 }
 0x147   : > { %1036 = vperm.xlu0 %4549, %v5417_v12   ;;  %1376 = vperm.xlu1 %4548, %v5404_v51   ;;  %7011 = vst [vmem:[#allocation29_spill] sm:$0xff] %v5623_v9 }
 0x148   : > { %7002 = vst [vmem:[#allocation20_spill] sm:$0xff] %v5420_v16  ;;  %1817 = vst.msk [vmem:[#allocation2 + $0x60] sm:$0xff] %vm398_vm0, %v5420_v16 }
 0x149   : > { %v1322_v60 = vpop.xlane.xlu0 %1321  ;;  %4426 = vmatpush3.bf16.msra.mxu1 %v4568_v26 }
 0x14a   : > { %v5440_v27 = vmax.f32 %v5424_v4, %v1322_v60  ;;  %v748_v60 = vsub.f32 %v5328_v40, %v5335_v53  ;;  %v750_v40 = vsub.f32 %v5340_v55, %v5349_v10  ;;  %4427 = vmatprep.subr.bf16.mxu1 %v4569_v19  ;;  %v5626_v55 = vpop.eup %4596 }
 0x14b   : > { %1046 = vperm.xlu0 %4549, %v5437_v22   ;;  %1381 = vperm.xlu1 %4548, %v5420_v16   ;;  %7012 = vst [vmem:[#allocation30_spill] sm:$0xff] %v5626_v55 }
 0x14c   : > { %7005 = vst [vmem:[#allocation23_spill] sm:$0xff] %v5440_v27  ;;  %1818 = vst.msk [vmem:[#allocation2 + $0x68] sm:$0xff] %vm398_vm0, %v5440_v27  ;;  %v761_v36 = vmul.f32 1.442695, %v748_v60  ;;  %v765_v38 = vmul.f32 1.442695, %v750_v40 }
 0x14d   : > { %v1324_v44 = vpop.xlane.xlu1 %1323  ;;  %4428 = vmatpush3.bf16.msra.mxu1 %v4569_v19 }
 0x14e   : > { %v5587_v63 = vmax.f32 %v5444_v6, %v1324_v44  ;;  %4598 = vpow2.f32 %v761_v36 }
 0x14f   : > { %1056 = vperm.xlu0 %4549, %v5584_v49   ;;  %1386 = vperm.xlu1 %4548, %v5440_v27   ;;  %4600 = vpow2.f32 %v765_v38 }
 0x150   : > { %7008 = vst [vmem:[#allocation26_spill] sm:$0xff] %v5587_v63  ;;  %1819 = vst.msk [vmem:[#allocation2 + $0x70] sm:$0xff] %vm398_vm0, %v5587_v63 }
 0x151   : > { %v1326_v44 = vpop.xlane.xlu0 %1325  ;;  %v5635_v60 = vpop.permute.xlu1 %1826 }
 0x152   : > { %v5607_v0 = vmax.f32 %v5594_v5, %v1326_v44 }
 0x153   : > { %1391 = vperm.xlu1 %4548, %v5587_v63  }
 0x154   : > { %7010 = vst [vmem:[#allocation28_spill] sm:$0xff] %v5607_v0  ;;  %1820 = vst.msk [vmem:[#allocation2 + $0x78] sm:$0xff] %vm398_vm0, %v5607_v0 }
 0x155   : > { %v5637_v44 = vpop.permute.xlu1 %1830 }
 0x157   : > { %1396 = vperm.xlu1 %4548, %v5607_v0  }
 0x158   : > { %v5629_v10 = vpop.eup %4598 }
 0x159   : > { %7013 = vst [vmem:[#allocation31_spill] sm:$0xff] %v5629_v10  ;;  %v5632_v47 = vpop.eup %4600  ;;  %v5639_v26 = vpop.permute.xlu1 %1834 }
 0x15a   : > { %7014 = vst [vmem:[#allocation32_spill] sm:$0xff] %v5632_v47  ;;  %v5649_v53 = vpop.permute.xlu0 %1822 }
 0x15b   : > { %1031 = vperm.xlu1 %4548, %v5623_v9  }
 0x15d   : > { %v5641_v36 = vpop.permute.xlu1 %1838 }
 0x15f   : > { %1041 = vperm.xlu1 %4548, %v5626_v55   ;;  %v579_v55 = vand.u32 1, %v5038_v18 }
 0x161   : > { %v5643_v40 = vpop.permute.xlu1 %1842  ;;  %v5657_v50 = vcvt.s32.f32 %v579_v55  ;;  %v595_v55 = vshra.s32 %v5038_v18, 1  ;;  %v1172_v18 = vld [vmem:[#allocation4 + $0x10] sm:$0xff] }
 0x163   : > { %1051 = vperm.xlu1 %4548, %v5629_v10   ;;  %7015 = vst [vmem:[#allocation33_spill] sm:$0xff] %v5657_v50 }
 0x165   : > { %v5645_v19 = vpop.permute.xlu1 %1846 }
 0x167   : > { %1061 = vperm.xlu1 %4548, %v5632_v47  }
 0x169   : > { %v5647_v38 = vpop.permute.xlu1 %1850 }
 0x1aa   : > { %v770_v42 = vpop.permute.xlu1 %769 }
 0x1ab   : > { %v807_v21 = vsub.f32 %v5051_v35, %v770_v42 }
 0x1ad   : > { %v815_v62 = vmul.f32 1.442695, %v807_v21 }
 0x1ae   : > { %v780_v7 = vpop.permute.xlu1 %779  ;;  %v775_v32 = vpop.permute.xlu0 %774 }
 0x1af   : > { %4602 = vpow2.f32 %v815_v62  ;;  %v809_v39 = vsub.f32 %v5062_v45, %v780_v7  ;;  %v808_v8 = vsub.f32 %v5066_v46, %v775_v32  ;;  %v581_v45 = vand.u32 1, %v5040_v23 }
 0x1b0   : > { %v580_v32 = vand.u32 1, %v5042_v24 }
 0x1b1   : > { %v819_v47 = vmul.f32 1.442695, %v809_v39  ;;  %v817_v49 = vmul.f32 1.442695, %v808_v8 }
 0x1b2   : > { %v785_v10 = vpop.permute.xlu1 %784  ;;  %v790_v22 = vpop.permute.xlu0 %789 }
 0x1b3   : > { %4604 = vpow2.f32 %v819_v47  ;;  %v810_v9 = vsub.f32 %v5078_v58, %v785_v10  ;;  %v811_v12 = vsub.f32 %v5082_v59, %v790_v22  ;;  %v596_v47 = vshra.s32 %v5042_v24, 1 }
 0x1b4   : > { %4606 = vpow2.f32 %v817_v49  ;;  %v5668_v49 = vcvt.s32.f32 %v581_v45 }
 0x1b5   : > { %v821_v35 = vmul.f32 1.442695, %v810_v9  ;;  %v823_v42 = vmul.f32 1.442695, %v811_v12  ;;  %v582_v12 = vand.u32 1, %v5045_v30  ;;  %v583_v9 = vand.u32 1, %v5047_v34 }
 0x1b6   : > { %v795_v21 = vpop.permute.xlu1 %794  ;;  %v800_v62 = vpop.permute.xlu0 %799  ;;  %v604_v27 = vand.u32 1, %v596_v47 }
 0x1b7   : > { %4608 = vpow2.f32 %v821_v35  ;;  %v812_v46 = vsub.f32 %v5092_v14, %v795_v21  ;;  %v813_v8 = vsub.f32 %v5096_v15, %v800_v62  ;;  %v5672_v15 = vcvt.s32.f32 %v580_v32 }
 0x1b8   : > { %4610 = vpow2.f32 %v823_v42  ;;  %v5678_v42 = vcvt.s32.f32 %v582_v12  ;;  %v585_v32 = vand.u32 1, %v5069_v48  ;;  %v5706_v6 = vcvt.s32.f32 %v604_v27 }
 0x1b9   : > { %v5663_v58 = vpop.eup %4602  ;;  %v825_v59 = vmul.f32 1.442695, %v812_v46  ;;  %v827_v39 = vmul.f32 1.442695, %v813_v8  ;;  %v584_v8 = vand.u32 1, %v5057_v41 }
 0x1ba   : > { %v805_v7 = vpop.permute.xlu1 %804  ;;  %v831_v22 = vmul.f32 %v5663_v58, %v5657_v50  ;;  %v5702_v47 = vcvt.s32.f32 %v585_v32 }
 0x1bb   : > { %4612 = vpow2.f32 %v825_v59  ;;  %v814_v14 = vsub.f32 %v5105_v25, %v805_v7  ;;  %v5682_v25 = vcvt.s32.f32 %v583_v9  ;;  %v603_v7 = vand.u32 1, %v595_v55 }
 0x1bc   : > { %4614 = vpow2.f32 %v827_v39  ;;  %1137 = vadd.xlane.f32.xlu0 %v831_v22 }
 0x1bd   : > { %v5675_v10 = vpop.eup %4604  ;;  %v829_v35 = vmul.f32 1.442695, %v814_v14 }
 0x1be   : > { %v4607_v21 = vpop.eup %4606  ;;  %v1362_v62 = vpop.permute.xlu1 %1361  ;;  %v833_v46 = vmul.f32 %v5675_v10, %v5668_v49 }
 0x1bf   : > { %v1367_v45 = vpop.permute.xlu0 %1366  ;;  %4616 = vpow2.f32 %v829_v35  ;;  %v1399_v59 = vsub.f32 %v5110_v28, %v1362_v62  ;;  %v832_v12 = vmul.f32 %v4607_v21, %v5672_v15  ;;  %v5695_v28 = vcvt.s32.f32 %v584_v8 }
 0x1c0   : > { %v1400_v39 = vsub.f32 %v5115_v29, %v1367_v45  ;;  %1141 = vadd.xlane.f32.xlu0 %v833_v46  ;;  %v586_v29 = vand.u32 1, %v5074_v57  ;;  %v597_v62 = vshra.s32 %v5040_v23, 1 }
 0x1c1   : > { %v5689_v14 = vpop.eup %4608  ;;  %v1407_v0 = vmul.f32 1.442695, %v1399_v59  ;;  %1139 = vadd.xlane.f32.xlu1 %v832_v12  ;;  %v847_v9 = vpack.c.bf16 %v832_v12, %v831_v22  ;;  %v598_v59 = vshra.s32 %v5045_v30, 1 }
 0x1c2   : > { %v1409_v5 = vmul.f32 1.442695, %v1400_v39  ;;  %v5691_v4 = vpop.eup %4610  ;;  %v1372_v63 = vpop.permute.xlu1 %1371  ;;  %v834_v35 = vmul.f32 %v5689_v14, %v5678_v42  ;;  %v600_v39 = vshra.s32 %v5057_v41, 1  ;;  %v5711_v32 = vcvt.s32.f32 %v586_v29 }
 0x1c3   : > { %4618 = vpow2.f32 %v1407_v0  ;;  %v1401_v55 = vsub.f32 %v5121_v37, %v1372_v63  ;;  %4397 = vmatprep.mubr.bf16.mxu0 %v847_v9  ;;  %v835_v22 = vmul.f32 %v5691_v4, %v5682_v25  ;;  %v606_v51 = vand.u32 1, %v598_v59 }
 0x1c4   : > { %4620 = vpow2.f32 %v1409_v5  ;;  %v848_v45 = vpack.c.bf16 %v834_v35, %v833_v46  ;;  %1143 = vadd.xlane.f32.xlu0 %v834_v35  ;;  %v605_v5 = vand.u32 1, %v597_v62  ;;  %v599_v46 = vshra.s32 %v5047_v34, 1  ;;  %v1127_v34 = vld [vmem:[#allocation3 + $0x30] sm:$0xff] }
 0x1c5   : > { %v4613_v8 = vpop.eup %4612  ;;  %v1411_v12 = vmul.f32 1.442695, %v1401_v55  ;;  %1145 = vadd.xlane.f32.xlu1 %v835_v22  ;;  %v5717_v55 = vcvt.s32.f32 %v603_v7  ;;  %v840_v29 = vmul.f32 %v4607_v21, %v5706_v6  ;;  %v608_v62 = vand.u32 1, %v600_v39 }
 0x1c6   : > { %v5708_v0 = vpop.eup %4614  ;;  %v1377_v37 = vpop.permute.xlu1 %1376  ;;  %4398 = vmatmul.mubr.bf16.vlgmr.msra.gmra.mrb[0].mxu0 %v848_v45  ;;  %v836_v63 = vmul.f32 %v4613_v8, %v5695_v28  ;;  %v607_v7 = vand.u32 1, %v599_v46  ;;  %v5730_v21 = vcvt.s32.f32 %v606_v51  ;;  %v602_v39 = vshra.s32 %v5074_v57, 1 }
 0x1c7   : > { %v1402_v9 = vsub.f32 %v5129_v43, %v1377_v37  ;;  %v837_v35 = vmul.f32 %v5708_v0, %v5702_v47  ;;  %4622 = vpow2.f32 %v1411_v12  ;;  %v5724_v37 = vcvt.s32.f32 %v605_v5 }
 0x1c8   : > { %1147 = vadd.xlane.f32.xlu0 %v836_v63  ;;  %v849_v27 = vpack.c.bf16 %v836_v63, %v835_v22  ;;  %v839_v59 = vmul.f32 %v5663_v58, %v5717_v55  ;;  %v601_v12 = vshra.s32 %v5069_v48, 1  ;;  %v5735_v46 = vcvt.s32.f32 %v608_v62 }
 0x1c9   : > { %v5719_v33 = vpop.eup %4616  ;;  %v1413_v45 = vmul.f32 1.442695, %v1402_v9  ;;  %1149 = vadd.xlane.f32.xlu1 %v837_v35  ;;  %v5741_v58 = vcvt.s32.f32 %v607_v7 }
 0x1ca   : > { %v1382_v16 = vpop.permute.xlu1 %1381  ;;  %4401 = vmatprep.mubr.bf16.mxu0 %v849_v27  ;;  %v838_v43 = vmul.f32 %v5719_v33, %v5711_v32  ;;  %v851_v5 = vpack.c.bf16 %v840_v29, %v839_v59  ;;  %v609_v62 = vand.u32 1, %v601_v12 }
 0x1cb   : > { %4624 = vpow2.f32 %v1413_v45  ;;  %v1403_v22 = vsub.f32 %v5271_v52, %v1382_v16  ;;  %v843_v12 = vmul.f32 %v5691_v4, %v5741_v58 }
 0x1cc   : > { %1151 = vadd.xlane.f32.xlu0 %v838_v43  ;;  %v850_v63 = vpack.c.bf16 %v838_v43, %v837_v35  ;;  %v841_v35 = vmul.f32 %v5675_v10, %v5724_v37 }
 0x1cd   : > { %v5733_v9 = vpop.eup %4618  ;;  %v1415_v27 = vmul.f32 1.442695, %v1403_v22  ;;  %1186 = vadd.xlane.f32.xlu1 %v839_v59  ;;  %v842_v22 = vmul.f32 %v5689_v14, %v5730_v21  ;;  %v610_v59 = vand.u32 1, %v602_v39 }
 0x1ce   : > { %v5737_v45 = vpop.eup %4620  ;;  %v1387_v52 = vpop.permute.xlu1 %1386  ;;  %4402 = vmatmul.mubr.bf16.gmra.mrb[4].mxu0 %v850_v63  ;;  %v1423_v16 = vmul.f32 %v5733_v9, %v5657_v50  ;;  %v844_v50 = vmul.f32 %v4613_v8, %v5735_v46 }
 0x1cf   : > { %v1404_v51 = vsub.f32 %v5277_v61, %v1387_v52  ;;  %4405 = vmatprep.mubr.bf16.mxu0 %v851_v5  ;;  %v1424_v43 = vmul.f32 %v5737_v45, %v5672_v15  ;;  %4626 = vpow2.f32 %v1415_v27  ;;  %v852_v52 = vpack.c.bf16 %v842_v22, %v841_v35 }
 0x1d0   : > { %1188 = vadd.xlane.f32.xlu0 %v840_v29  ;;  %v5754_v29 = vcvt.s32.f32 %v609_v62  ;;  %v5756_v14 = vcvt.s32.f32 %v610_v59 }
 0x1d1   : > { %v1417_v63 = vmul.f32 1.442695, %v1404_v51  ;;  %1190 = vadd.xlane.f32.xlu1 %v841_v35  ;;  %v1439_v7 = vpack.c.bf16 %v1424_v43, %v1423_v16  ;;  %v4623_v5 = vpop.eup %4622  ;;  %v853_v51 = vpack.c.bf16 %v844_v50, %v843_v12 }
 0x1d2   : > { %v1392_v61 = vpop.permute.xlu1 %1391  ;;  %v845_v4 = vmul.f32 %v5708_v0, %v5754_v29  ;;  %v846_v62 = vmul.f32 %v5719_v33, %v5756_v14 }
 0x1d3   : > { %4628 = vpow2.f32 %v1417_v63  ;;  %v1405_v10 = vsub.f32 %v5283_v11, %v1392_v61  ;;  %4429 = vmatprep.mubr.bf16.mxu1 %v1439_v7  ;;  %v1425_v63 = vmul.f32 %v4623_v5, %v5668_v49 }
 0x1d4   : > { %1192 = vadd.xlane.f32.xlu0 %v842_v22  ;;  %v854_v61 = vpack.c.bf16 %v846_v62, %v845_v4 }
 0x1d5   : > { %v4625_v39 = vpop.eup %4624  ;;  %v1419_v27 = vmul.f32 1.442695, %v1405_v10  ;;  %1194 = vadd.xlane.f32.xlu1 %v843_v12 }
 0x1d6   : > { %v1397_v8 = vpop.permute.xlu1 %1396  ;;  %4406 = vmatmul.mubr.bf16.gmra.mrb[8].mxu0 %v852_v52  ;;  %v1426_v11 = vmul.f32 %v4625_v39, %v5678_v42  ;;  %v1431_v52 = vmul.f32 %v5733_v9, %v5717_v55 }
 0x1d7   : > { %v1406_v7 = vsub.f32 %v5288_v17, %v1397_v8  ;;  %4409 = vmatprep.mubr.bf16.mxu0 %v853_v51  ;;  %4630 = vpow2.f32 %v1419_v27  ;;  %v1432_v27 = vmul.f32 %v5737_v45, %v5706_v6  ;;  %v1433_v45 = vmul.f32 %v4623_v5, %v5724_v37 }
 0x1d8   : > { %1196 = vadd.xlane.f32.xlu0 %v844_v50  ;;  %v1440_v35 = vpack.c.bf16 %v1426_v11, %v1425_v63 }
 0x1d9   : > { %v1421_v22 = vmul.f32 1.442695, %v1406_v7  ;;  %1198 = vadd.xlane.f32.xlu1 %v845_v4  ;;  %v4627_v59 = vpop.eup %4626  ;;  %v4842_v7 = vld [vmem:[%s6931_s1] sm:$0xff] }
 0x1da   : > { %4430 = vmatmul.mubr.bf16.vlgmr.msra.gmra.mrb[0].mxu1 %v1440_v35  ;;  %v1427_v17 = vmul.f32 %v4627_v59, %v5682_v25  ;;  %v1435_v35 = vmul.f32 %v4627_v59, %v5741_v58 }
 0x1db   : > { %4632 = vpow2.f32 %v1421_v22 }
 0x1dc   : > { %1200 = vadd.xlane.f32.xlu0 %v846_v62 }
 0x1dd   : > { %v4629_v10 = vpop.eup %4628  ;;  %1732 = vadd.xlane.f32.xlu1 %v1423_v16 }
 0x1de   : > { %4410 = vmatmul.mubr.bf16.gmra.mrb[12].mxu0 %v854_v61  ;;  %v1428_v0 = vmul.f32 %v4629_v10, %v5695_v28  ;;  %v1436_v9 = vmul.f32 %v4629_v10, %v5735_v46 }
 0x1e0   : > { %1734 = vadd.xlane.f32.xlu0 %v1424_v43  ;;  %v1441_v50 = vpack.c.bf16 %v1428_v0, %v1427_v17  ;;  %v1443_v43 = vpack.c.bf16 %v1432_v27, %v1431_v52  ;;  %v1445_v61 = vpack.c.bf16 %v1436_v9, %v1435_v35 }
 0x1e1   : > { %1738 = vadd.xlane.f32.xlu1 %v1426_v11  ;;  %v4631_v33 = vpop.eup %4630  ;;  %v1855_v11 = vsub.s32 2, %v5029_v13 }
 0x1e2   : > { %4433 = vmatprep.mubr.bf16.mxu1 %v1441_v50  ;;  %v1429_v51 = vmul.f32 %v4631_v33, %v5702_v47 }
 0x1e3   : > { %v1856_v4 = vrot.slane %v4842_v7, %v1855_v11 }
 0x1e4   : > { %1736 = vadd.xlane.f32.xlu0 %v1425_v63  ;;  %v1434_v63 = vmul.f32 %v4625_v39, %v5730_v21 }
 0x1e5   : > { %v4633_v12 = vpop.eup %4632  ;;  %1742 = vadd.xlane.f32.xlu1 %v1428_v0  ;;  %v1857_v22 = vadd.f32 %v1856_v4, %v5649_v53  ;;  %v1858_v39 = vadd.f32 %v1856_v4, %v5635_v60  ;;  %v1860_v10 = vadd.f32 %v1856_v4, %v5639_v26  ;;  %v1437_v0 = vmul.f32 %v4631_v33, %v5754_v29 }
 0x1e6   : > { %v1430_v16 = vmul.f32 %v4633_v12, %v5711_v32  ;;  %v1444_v62 = vpack.c.bf16 %v1434_v63, %v1433_v45  ;;  %v1438_v5 = vmul.f32 %v4633_v12, %v5756_v14  ;;  %v1859_v59 = vadd.f32 %v1856_v4, %v5637_v44 }
 0x1e7   : > { %vm1865_vm8 = vcmp.gt.f32.partialorder %v1857_v22, 0.0  ;;  %v1874_v50 = vmul.f32 0.2, %v1858_v39  ;;  %vm1866_vm10 = vcmp.gt.f32.partialorder %v1858_v39, 0.0  ;;  %vm1868_vm12 = vcmp.gt.f32.partialorder %v1860_v10, 0.0 }
 0x1e8   : > { %1740 = vadd.xlane.f32.xlu0 %v1427_v17  ;;  %v1442_v8 = vpack.c.bf16 %v1430_v16, %v1429_v51  ;;  %v1873_v17 = vmul.f32 0.2, %v1857_v22  ;;  %v1446_v53 = vpack.c.bf16 %v1438_v5, %v1437_v0  ;;  %v1861_v26 = vadd.f32 %v1856_v4, %v5641_v36 }
 0x1e9   : > { %1746 = vadd.xlane.f32.xlu1 %v1430_v16  ;;  %v1882_v33 = vsel %vm1866_vm10, %v1858_v39, %v1874_v50  ;;  %v1875_v44 = vmul.f32 0.2, %v1859_v59  ;;  %vm1867_vm14 = vcmp.gt.f32.partialorder %v1859_v59, 0.0  ;;  %v1863_v36 = vadd.f32 %v1856_v4, %v5645_v19  ;;  %v7019_v50 = vld [vmem:[#allocation20_spill] sm:$0xff] }
 0x1ea   : > { %4434 = vmatmul.mubr.bf16.gmra.mrb[4].mxu1 %v1442_v8  ;;  %v1881_v60 = vsel %vm1865_vm8, %v1857_v22, %v1873_v17  ;;  %v5797_v8 = vsel %vm620_vm5, %v1882_v33, -1e+30  ;;  %vm1869_vm3 = vcmp.gt.f32.partialorder %v1861_v26, 0.0  ;;  %v7016_v39 = vsub.f32 %v5346_v56, %v5358_v1  ;;  %v7024_v33 = vld [vmem:[#allocation24_spill] sm:$0xff] }
 0x1eb   : > { %4437 = vmatprep.mubr.bf16.mxu1 %v1443_v43  ;;  %v5791_v12 = vsel %vm619_vm1, %v1881_v60, -1e+30  ;;  %v1883_v11 = vsel %vm1867_vm14, %v1859_v59, %v1875_v44  ;;  %vm1871_vm10 = vcmp.gt.f32.partialorder %v1863_v36, 0.0  ;;  %v7017_v17 = vsub.f32 %v5365_v3, %v5381_v31  ;;  %v7025_v44 = vld [vmem:[#allocation26_spill] sm:$0xff] }
 0x1ec   : > { %1744 = vadd.xlane.f32.xlu0 %v1429_v51  ;;  %v1864_v51 = vadd.f32 %v1856_v4, %v5647_v38  ;;  %v7018_v59 = vsub.f32 %v5360_v2, %v5372_v20  ;;  %v7020_v56 = vsub.f32 %v5408_v54, %v7019_v50  ;;  %v7027_v2 = vld [vmem:[#allocation21_spill] sm:$0xff]  ;;  %v7028_v20 = vld [vmem:[#allocation23_spill] sm:$0xff] }
 0x1ed   : > { %1783 = vadd.xlane.f32.xlu1 %v1432_v27  ;;  %v1862_v27 = vadd.f32 %v1856_v4, %v5643_v40  ;;  %v1879_v4 = vmul.f32 0.2, %v1863_v36 }
 0x1ee   : > { %v1880_v38 = vmul.f32 0.2, %v1864_v51  ;;  %vm1872_vm8 = vcmp.gt.f32.partialorder %v1864_v51, 0.0  ;;  %v1351_v1 = vmul.f32 1.442695, %v7020_v56 }
 0x1ef   : > { %v1878_v16 = vmul.f32 0.2, %v1862_v27  ;;  %vm1870_vm15 = vcmp.gt.f32.partialorder %v1862_v27, 0.0 }
 0x1f0   : > { %1781 = vadd.xlane.f32.xlu0 %v1431_v52  ;;  %v1876_v52 = vmul.f32 0.2, %v1860_v10 }
 0x1f1   : > { %1787 = vadd.xlane.f32.xlu1 %v1434_v63  ;;  %v1877_v63 = vmul.f32 0.2, %v1861_v26 }
 0x1f2   : > { %4438 = vmatmul.mubr.bf16.gmra.mrb[8].mxu1 %v1444_v62  ;;  %v1884_v40 = vsel %vm1868_vm12, %v1860_v10, %v1876_v52  ;;  %v7021_v52 = vld [vmem:[#allocation16_spill] sm:$0xff] }
 0x1f3   : > { %4441 = vmatprep.mubr.bf16.mxu1 %v1445_v61  ;;  %v5802_v43 = vsel %vm622_vm7, %v1884_v40, -1e+30  ;;  %v1885_v7 = vsel %vm1869_vm3, %v1861_v26, %v1877_v63  ;;  %v1887_v61 = vsel %vm1871_vm10, %v1863_v36, %v1879_v4  ;;  %v7030_v36 = vld [vmem:[#allocation27_spill] sm:$0xff] }
 0x1f4   : > { %1785 = vadd.xlane.f32.xlu0 %v1433_v45  ;;  %v5808_v45 = vsel %vm621_vm4, %v1883_v11, -1e+30  ;;  %v5818_v62 = vsel %vm623_vm9, %v1885_v7, -1e+30  ;;  %v5831_v10 = vsel %vm625_vm13, %v1887_v61, -1e+30 }
 0x1f5   : > { %1791 = vadd.xlane.f32.xlu1 %v1436_v9  ;;  %v1886_v9 = vsel %vm1870_vm15, %v1862_v27, %v1878_v16  ;;  %v7022_v27 = vld [vmem:[#allocation18_spill] sm:$0xff]  ;;  %v7026_v16 = vsub.f32 %v7024_v33, %v7025_v44  ;;  %v7031_v11 = vld [vmem:[#allocation28_spill] sm:$0xff] }
 0x1f6   : > { %v5812_v19 = vsel %vm624_vm11, %v1886_v9, -1e+30  ;;  %v7023_v60 = vsub.f32 %v7021_v52, %v7022_v27  ;;  %v7032_v63 = vsub.f32 %v7030_v36, %v7031_v11  ;;  %v7033_v52 = vld [vmem:[#allocation17_spill] sm:$0xff]  ;;  %v1124_v36 = vld [vmem:[#allocation3 + $0x18] sm:$0xff] }
 0x1f7   : > { %v1355_v3 = vmul.f32 1.442695, %v7026_v16  ;;  %v1122_v16 = vld [vmem:[#allocation3 + $0x8] sm:$0xff] }
 0x1f8   : > { %1789 = vadd.xlane.f32.xlu0 %v1435_v35  ;;  %v1888_v35 = vsel %vm1872_vm8, %v1864_v51, %v1880_v38  ;;  %v1349_v26 = vmul.f32 1.442695, %v7023_v60  ;;  %v7029_v51 = vsub.f32 %v7027_v2, %v7028_v20  ;;  %v1357_v38 = vmul.f32 1.442695, %v7032_v63  ;;  %v7035_v20 = vld [vmem:[#allocation29_spill] sm:$0xff] }
 0x1f9   : > { %1795 = vadd.xlane.f32.xlu1 %v1438_v5  ;;  %v5822_v22 = vsel %vm626_vm2, %v1888_v35, -1e+30  ;;  %v1343_v5 = vmul.f32 1.442695, %v7016_v39 }
 0x1fa   : > { %4442 = vmatmul.mubr.bf16.gmra.mrb[12].mxu1 %v1446_v53  ;;  %v1345_v53 = vmul.f32 1.442695, %v7018_v59  ;;  %v1353_v54 = vmul.f32 1.442695, %v7029_v51  ;;  %v1130_v51 = vmul.f32 %v7035_v20, %v1122_v16 }
 0x1fb   : > { %4634 = vpow2.f32 %v1343_v5  ;;  %v5879_v5 = vpop.permute.xlu0 %1026 }
 0x1fc   : > { %1793 = vadd.xlane.f32.xlu0 %v1437_v0  ;;  %v1347_v0 = vmul.f32 1.442695, %v7017_v17  ;;  %v5881_v17 = vpop.permute.xlu1 %1031 }
 0x1fd   : > { %1906 = vmax.xlane.f32.xlu1 %v5791_v12 }
 0x1fe   : > { %4636 = vpow2.f32 %v1347_v0 }
 0x1ff   : > { %4638 = vpow2.f32 %v1345_v53  ;;  %v5883_v0 = vpop.permute.xlu0 %1036 }
 0x200   : > { %1908 = vmax.xlane.f32.xlu0 %v5797_v8  ;;  %4640 = vpow2.f32 %v1351_v1  ;;  %v5885_v59 = vpop.permute.xlu1 %1041  ;;  %v1121_v1 = vld [vmem:[#allocation3] sm:$0xff] }
 0x201   : > { %1912 = vmax.xlane.f32.xlu1 %v5802_v43  ;;  %4642 = vpow2.f32 %v1349_v26  ;;  %v1129_v27 = vmul.f32 %v7033_v52, %v1121_v1  ;;  %v1123_v26 = vld [vmem:[#allocation3 + $0x10] sm:$0xff]  ;;  %v7036_v1 = vld [vmem:[#allocation30_spill] sm:$0xff] }
 0x202   : > { %4644 = vpow2.f32 %v1355_v3  ;;  %v7034_v3 = vld [vmem:[#allocation19_spill] sm:$0xff]  ;;  %v1132_v48 = vmul.f32 %v7036_v1, %v1124_v36  ;;  %v7039_v36 = vld [vmem:[#allocation25_spill] sm:$0xff] }
 0x203   : > { %4646 = vpow2.f32 %v1353_v54  ;;  %v5887_v53 = vpop.permute.xlu0 %1046  ;;  %v1131_v2 = vmul.f32 %v7034_v3, %v1123_v26 }
 0x204   : > { %1910 = vmax.xlane.f32.xlu0 %v5808_v45  ;;  %4648 = vpow2.f32 %v1357_v38  ;;  %v5889_v50 = vpop.permute.xlu1 %1051  ;;  %v1125_v38 = vld [vmem:[#allocation3 + $0x20] sm:$0xff] }
 0x205   : > { %1916 = vmax.xlane.f32.xlu1 %v5812_v19  ;;  %v5849_v31 = vpop.eup %4634 }
 0x207   : > { %v5891_v56 = vpop.permute.xlu0 %1056 }
 0x208   : > { %1914 = vmax.xlane.f32.xlu0 %v5818_v62  ;;  %v5855_v40 = vpop.eup %4636  ;;  %v5894_v33 = vpop.permute.xlu1 %1061 }
 0x209   : > { %1920 = vmax.xlane.f32.xlu1 %v5822_v22  ;;  %v5861_v9 = vpop.eup %4638 }
 0x20a   : > { %v5863_v7 = vpop.eup %4640 }
 0x20b   : > { %v5867_v4 = vpop.eup %4642 }
 0x20c   : > { %1918 = vmax.xlane.f32.xlu0 %v5831_v10  ;;  %v5869_v35 = vpop.eup %4644 }
 0x20d   : > { %v5873_v61 = vpop.eup %4646 }
 0x20e   : > { %v5876_v39 = vpop.eup %4648 }
 0x21a   : > { %1620 = vperm.xlu1 %4548, %v5849_v31  }
 0x21e   : > { %1630 = vperm.xlu1 %4548, %v5855_v40  }
 0x222   : > { %1640 = vperm.xlu1 %4548, %v5863_v7   ;;  %1625 = vperm.xlu0 %4549, %v5861_v9  }
 0x226   : > { %1650 = vperm.xlu1 %4548, %v5869_v35   ;;  %1635 = vperm.xlu0 %4549, %v5867_v4  }
 0x22a   : > { %1645 = vperm.xlu0 %4549, %v5873_v61  }
 0x22e   : > { %1655 = vperm.xlu0 %4549, %v5876_v39  }
 0x249   : > { %v1138_v60 = vpop.xlane.xlu0 %1137 }
 0x24a   : > { %v1153_v44 = vadd.f32 %v1138_v60, %v1129_v27  ;;  %v7037_v27 = vld [vmem:[#allocation22_spill] sm:$0xff] }
 0x24b   : > { %v1133_v60 = vmul.f32 %v7037_v27, %v1125_v38 }
 0x24c   : > { %1162 = vst.msk [vmem:[#allocation3] sm:$0xff] %vm398_vm0, %v1153_v44  ;;  %v1126_v44 = vld [vmem:[#allocation3 + $0x28] sm:$0xff] }
 0x24d   : > { %v1142_v54 = vpop.xlane.xlu0 %1141 }
 0x24e   : > { %v1140_v11 = vpop.xlane.xlu1 %1139  ;;  %v1155_v63 = vadd.f32 %v1142_v54, %v1131_v2  ;;  %v4570_v2 = vld [vmem:[%s6932_s2 + $0x80] sm:$0xff]  }
 0x24f   : > { %v1154_v57 = vadd.f32 %v1140_v11, %v1130_v51  ;;  %v7038_v51 = vld [vmem:[#allocation31_spill] sm:$0xff]  ;;  %4445 = vmatprep.subr.bf16.mxu0 %v4570_v2 }
 0x250   : > { %1164 = vst.msk [vmem:[#allocation3 + $0x10] sm:$0xff] %vm398_vm0, %v1155_v63  ;;  %v1134_v54 = vmul.f32 %v7038_v51, %v1126_v44  ;;  %v1128_v63 = vld [vmem:[#allocation3 + $0x38] sm:$0xff]  ;;  %4446 = vmatpush3.bf16.msra.mxu0 %v4570_v2 }
 0x251   : > { %1163 = vst.msk [vmem:[#allocation3 + $0x8] sm:$0xff] %vm398_vm0, %v1154_v57  ;;  %v1144_v41 = vpop.xlane.xlu0 %1143  ;;  %v1135_v57 = vmul.f32 %v7039_v36, %v1127_v34 }
 0x252   : > { %v1146_v30 = vpop.xlane.xlu1 %1145  ;;  %v1156_v26 = vadd.f32 %v1144_v41, %v1132_v48  ;;  %v1170_v41 = vld [vmem:[#allocation4] sm:$0xff]  ;;  %v7040_v48 = vld [vmem:[#allocation32_spill] sm:$0xff] }
 0x253   : > { %v1157_v16 = vadd.f32 %v1146_v30, %v1133_v60  ;;  %v1136_v60 = vmul.f32 %v7040_v48, %v1128_v63  ;;  %v1178_v44 = vmul.f32 %v7033_v52, %v1170_v41 }
 0x254   : > { %1165 = vst.msk [vmem:[#allocation3 + $0x18] sm:$0xff] %vm398_vm0, %v1156_v26 }
 0x255   : > { %1166 = vst.msk [vmem:[#allocation3 + $0x20] sm:$0xff] %vm398_vm0, %v1157_v16  ;;  %v1148_v11 = vpop.xlane.xlu0 %1147  ;;  %v1171_v16 = vld [vmem:[#allocation4 + $0x8] sm:$0xff] }
 0x256   : > { %v1150_v38 = vpop.xlane.xlu1 %1149  ;;  %v1158_v24 = vadd.f32 %v1148_v11, %v1134_v54  ;;  %v1179_v54 = vmul.f32 %v7035_v20, %v1171_v16  ;;  %v1175_v20 = vld [vmem:[#allocation4 + $0x28] sm:$0xff] }
 0x257   : > { %v1159_v30 = vadd.f32 %v1150_v38, %v1135_v57  ;;  %v1173_v57 = vld [vmem:[#allocation4 + $0x18] sm:$0xff]  ;;  %v1174_v38 = vld [vmem:[#allocation4 + $0x20] sm:$0xff] }
 0x258   : > { %1167 = vst.msk [vmem:[#allocation3 + $0x28] sm:$0xff] %vm398_vm0, %v1158_v24  ;;  %v1180_v24 = vmul.f32 %v7034_v3, %v1172_v18  ;;  %v1181_v41 = vmul.f32 %v7036_v1, %v1173_v57  ;;  %v1183_v3 = vmul.f32 %v7038_v51, %v1175_v20  ;;  %v1177_v1 = vld [vmem:[#allocation4 + $0x38] sm:$0xff]  ;;  %v1717_v51 = vld [vmem:[#allocation3 + $0x48] sm:$0xff] }
 0x259   : > { %1168 = vst.msk [vmem:[#allocation3 + $0x30] sm:$0xff] %vm398_vm0, %v1159_v30  ;;  %v1152_v26 = vpop.xlane.xlu0 %1151 }
 0x25a   : > { %v1187_v23 = vpop.xlane.xlu1 %1186  ;;  %v1160_v34 = vadd.f32 %v1152_v26, %v1136_v60 }
 0x25b   : > { %v1202_v13 = vadd.f32 %v1187_v23, %v1178_v44  ;;  %v1182_v23 = vmul.f32 %v7037_v27, %v1174_v38  ;;  %v1176_v44 = vld [vmem:[#allocation4 + $0x30] sm:$0xff] }
 0x25c   : > { %1169 = vst.msk [vmem:[#allocation3 + $0x38] sm:$0xff] %vm398_vm0, %v1160_v34  ;;  %v1184_v26 = vmul.f32 %v7039_v36, %v1176_v44 }
 0x25d   : > { %1210 = vst.msk [vmem:[#allocation4] sm:$0xff] %vm398_vm0, %v1202_v13  ;;  %v1189_v2 = vpop.xlane.xlu0 %1188 }
 0x25e   : > { %v1191_v11 = vpop.xlane.xlu1 %1190  ;;  %v1203_v63 = vadd.f32 %v1189_v2, %v1179_v54  ;;  %v1185_v2 = vmul.f32 %v7040_v48, %v1177_v1  ;;  %v1718_v48 = vld [vmem:[#allocation3 + $0x50] sm:$0xff] }
 0x25f   : > { %v1204_v52 = vadd.f32 %v1191_v11, %v1180_v24  ;;  %v1716_v24 = vld [vmem:[#allocation3 + $0x40] sm:$0xff] }
 0x260   : > { %1211 = vst.msk [vmem:[#allocation4 + $0x8] sm:$0xff] %vm398_vm0, %v1203_v63  ;;  %v1724_v57 = vmul.f32 %v5849_v31, %v1716_v24 }
 0x261   : > { %1212 = vst.msk [vmem:[#allocation4 + $0x10] sm:$0xff] %vm398_vm0, %v1204_v52  ;;  %v1193_v30 = vpop.xlane.xlu0 %1192  ;;  %v1719_v52 = vld [vmem:[#allocation3 + $0x58] sm:$0xff] }
 0x262   : > { %v1195_v60 = vpop.xlane.xlu1 %1194  ;;  %v1205_v13 = vadd.f32 %v1193_v30, %v1181_v41  ;;  %v1725_v41 = vmul.f32 %v5861_v9, %v1717_v51 }
 0x263   : > { %v1206_v18 = vadd.f32 %v1195_v60, %v1182_v23  ;;  %v1727_v23 = vmul.f32 %v5867_v4, %v1719_v52 }
 0x264   : > { %1213 = vst.msk [vmem:[#allocation4 + $0x18] sm:$0xff] %vm398_vm0, %v1205_v13  ;;  %v1721_v13 = vld [vmem:[#allocation3 + $0x68] sm:$0xff] }
 0x265   : > { %1214 = vst.msk [vmem:[#allocation4 + $0x20] sm:$0xff] %vm398_vm0, %v1206_v18  ;;  %v1197_v16 = vpop.xlane.xlu0 %1196  ;;  %v1726_v18 = vmul.f32 %v5855_v40, %v1718_v48 }
 0x266   : > { %v1199_v34 = vpop.xlane.xlu1 %1198  ;;  %v1207_v54 = vadd.f32 %v1197_v16, %v1183_v3  ;;  %v1729_v3 = vmul.f32 %v5873_v61, %v1721_v13  ;;  %v1720_v16 = vld [vmem:[#allocation3 + $0x60] sm:$0xff] }
 0x267   : > { %v1208_v27 = vadd.f32 %v1199_v34, %v1184_v26 }
 0x268   : > { %1215 = vst.msk [vmem:[#allocation4 + $0x28] sm:$0xff] %vm398_vm0, %v1207_v54  ;;  %v1723_v54 = vld [vmem:[#allocation3 + $0x78] sm:$0xff] }
 0x269   : > { %1216 = vst.msk [vmem:[#allocation4 + $0x30] sm:$0xff] %vm398_vm0, %v1208_v27  ;;  %v1201_v11 = vpop.xlane.xlu0 %1200  ;;  %v1728_v27 = vmul.f32 %v5863_v7, %v1720_v16 }
 0x26a   : > { %v1733_v63 = vpop.xlane.xlu1 %1732  ;;  %v1209_v38 = vadd.f32 %v1201_v11, %v1185_v2  ;;  %v1731_v2 = vmul.f32 %v5876_v39, %v1723_v54  ;;  %v1722_v11 = vld [vmem:[#allocation3 + $0x70] sm:$0xff] }
 0x26b   : > { %v1748_v36 = vadd.f32 %v1733_v63, %v1724_v57 }
 0x26c   : > { %1217 = vst.msk [vmem:[#allocation4 + $0x38] sm:$0xff] %vm398_vm0, %v1209_v38  ;;  %v1766_v38 = vld [vmem:[#allocation4 + $0x48] sm:$0xff] }
 0x26d   : > { %1756 = vst.msk [vmem:[#allocation3 + $0x40] sm:$0xff] %vm398_vm0, %v1748_v36  ;;  %v1735_v30 = vpop.xlane.xlu0 %1734  ;;  %v1730_v36 = vmul.f32 %v5869_v35, %v1722_v11  ;;  %v1772_v11 = vld [vmem:[#allocation4 + $0x78] sm:$0xff] }
 0x26e   : > { %v1739_v20 = vpop.xlane.xlu1 %1738  ;;  %v1749_v60 = vadd.f32 %v1735_v30, %v1725_v41  ;;  %v1774_v41 = vmul.f32 %v5861_v9, %v1766_v38  ;;  %v1765_v30 = vld [vmem:[#allocation4 + $0x40] sm:$0xff] }
 0x26f   : > { %v1751_v44 = vadd.f32 %v1739_v20, %v1727_v23 }
 0x270   : > { %1757 = vst.msk [vmem:[#allocation3 + $0x48] sm:$0xff] %vm398_vm0, %v1749_v60  ;;  %v1768_v60 = vld [vmem:[#allocation4 + $0x58] sm:$0xff] }
 0x271   : > { %1759 = vst.msk [vmem:[#allocation3 + $0x58] sm:$0xff] %vm398_vm0, %v1751_v44  ;;  %v1737_v26 = vpop.xlane.xlu0 %1736  ;;  %v1773_v44 = vmul.f32 %v5849_v31, %v1765_v30  ;;  %v1769_v31 = vld [vmem:[#allocation4 + $0x60] sm:$0xff] }
 0x272   : > { %v1743_v1 = vpop.xlane.xlu1 %1742  ;;  %v1750_v34 = vadd.f32 %v1737_v26, %v1726_v18  ;;  %v1776_v18 = vmul.f32 %v5867_v4, %v1768_v60  ;;  %v1767_v26 = vld [vmem:[#allocation4 + $0x50] sm:$0xff]  ;;  %v5969_v60 = vld [vmem:[#allocation2 + $0x98] sm:$0xff] }
 0x273   : > { %v1753_v24 = vadd.f32 %v1743_v1, %v1729_v3  ;;  %v1775_v54 = vmul.f32 %v5855_v40, %v1767_v26  ;;  %v1771_v40 = vld [vmem:[#allocation4 + $0x70] sm:$0xff] }
 0x274   : > { %1758 = vst.msk [vmem:[#allocation3 + $0x50] sm:$0xff] %vm398_vm0, %v1750_v34  ;;  %v1770_v34 = vld [vmem:[#allocation4 + $0x68] sm:$0xff]  ;;  %v5982_v26 = vld [vmem:[#allocation2 + $0x90] sm:$0xff] }
 0x275   : > { %1761 = vst.msk [vmem:[#allocation3 + $0x68] sm:$0xff] %vm398_vm0, %v1753_v24  ;;  %v1741_v57 = vpop.xlane.xlu0 %1740  ;;  %v1778_v24 = vmul.f32 %v5873_v61, %v1770_v34  ;;  %v5959_v61 = vld [vmem:[#allocation2 + $0x80] sm:$0xff] }
 0x276   : > { %v1747_v51 = vpop.xlane.xlu1 %1746  ;;  %v1752_v63 = vadd.f32 %v1741_v57, %v1728_v27 }
 0x277   : > { %v1755_v52 = vadd.f32 %v1747_v51, %v1731_v2  ;;  %v1777_v51 = vmul.f32 %v5863_v7, %v1769_v31 }
 0x278   : > { %1760 = vst.msk [vmem:[#allocation3 + $0x60] sm:$0xff] %vm398_vm0, %v1752_v63  ;;  %v1780_v63 = vmul.f32 %v5876_v39, %v1772_v11  ;;  %v5966_v39 = vld [vmem:[#allocation2 + $0x88] sm:$0xff]  ;;  %v6011_v11 = vld [vmem:[#allocation2 + $0xb8] sm:$0xff] }
 0x279   : > { %1763 = vst.msk [vmem:[#allocation3 + $0x78] sm:$0xff] %vm398_vm0, %v1755_v52  ;;  %v1745_v23 = vpop.xlane.xlu0 %1744  ;;  %7041 = vst [vmem:[#allocation20_spill] sm:$0xff] %v6011_v11 }
 0x27a   : > { %v1784_v48 = vpop.xlane.xlu1 %1783  ;;  %v1754_v20 = vadd.f32 %v1745_v23, %v1730_v36  ;;  %v1779_v23 = vmul.f32 %v5869_v35, %v1771_v40 }
 0x27b   : > { %v1798_v13 = vadd.f32 %v1784_v48, %v1774_v41 }
 0x27c   : > { %1762 = vst.msk [vmem:[#allocation3 + $0x70] sm:$0xff] %vm398_vm0, %v1754_v20 }
 0x27d   : > { %1806 = vst.msk [vmem:[#allocation4 + $0x48] sm:$0xff] %vm398_vm0, %v1798_v13  ;;  %v1782_v3 = vpop.xlane.xlu0 %1781  ;;  %v1610_v13 = vld [vmem:[#allocation5 + $0x40] sm:$0xff] }
 0x27e   : > { %v1788_v16 = vpop.xlane.xlu1 %1787  ;;  %v1797_v1 = vadd.f32 %v1782_v3, %v1773_v44 }
 0x27f   : > { %v1800_v9 = vadd.f32 %v1788_v16, %v1776_v18 }
 0x280   : > { %1805 = vst.msk [vmem:[#allocation4 + $0x40] sm:$0xff] %vm398_vm0, %v1797_v1  ;;  %v5989_v1 = vld [vmem:[#allocation2 + $0xa8] sm:$0xff] }
 0x281   : > { %1808 = vst.msk [vmem:[#allocation4 + $0x58] sm:$0xff] %vm398_vm0, %v1800_v9  ;;  %v1786_v27 = vpop.xlane.xlu0 %1785 }
 0x282   : > { %v1792_v2 = vpop.xlane.xlu1 %1791  ;;  %v1799_v57 = vadd.f32 %v1786_v27, %v1775_v54  ;;  %v4571_v54 = vld [vmem:[%s6932_s2 + $0x88] sm:$0xff]  }
 0x283   : > { %v1802_v4 = vadd.f32 %v1792_v2, %v1778_v24  ;;  %v6004_v2 = vld [vmem:[#allocation2 + $0xa0] sm:$0xff]  ;;  %4447 = vmatprep.subr.bf16.mxu0 %v4571_v54 }
 0x284   : > { %1807 = vst.msk [vmem:[#allocation4 + $0x50] sm:$0xff] %vm398_vm0, %v1799_v57  ;;  %4448 = vmatpush3.bf16.msra.mxu0 %v4571_v54 }
 0x285   : > { %1810 = vst.msk [vmem:[#allocation4 + $0x68] sm:$0xff] %vm398_vm0, %v1802_v4  ;;  %v1790_v38 = vpop.xlane.xlu0 %1789  ;;  %v4572_v4 = vld [vmem:[%s6932_s2 + $0x90] sm:$0xff]  }
 0x286   : > { %v1796_v52 = vpop.xlane.xlu1 %1795  ;;  %v1801_v36 = vadd.f32 %v1790_v38, %v1777_v51  ;;  %v1018_v38 = vld [vmem:[#allocation5 + $0x10] sm:$0xff]  ;;  %4449 = vmatprep.subr.bf16.mxu0 %v4572_v4 }
 0x287   : > { %v1804_v41 = vadd.f32 %v1796_v52, %v1780_v63 }
 0x288   : > { %1809 = vst.msk [vmem:[#allocation4 + $0x60] sm:$0xff] %vm398_vm0, %v1801_v36  ;;  %v1016_v36 = vld [vmem:[#allocation5] sm:$0xff]  ;;  %4450 = vmatpush3.bf16.msra.mxu0 %v4572_v4 }
 0x289   : > { %1812 = vst.msk [vmem:[#allocation4 + $0x78] sm:$0xff] %vm398_vm0, %v1804_v41  ;;  %v1794_v30 = vpop.xlane.xlu0 %1793 }
 0x28a   : > { %v1907_v48 = vpop.xlane.xlu1 %1906  ;;  %v1803_v7 = vadd.f32 %v1794_v30, %v1779_v23  ;;  %v6026_v23 = vld [vmem:[#allocation2 + $0xb0] sm:$0xff]  ;;  %v1019_v30 = vld [vmem:[#allocation5 + $0x18] sm:$0xff] }
 0x28b   : > { %v5964_v20 = vmax.f32 %v5959_v61, %v1907_v48  ;;  %7043 = vst [vmem:[#allocation18_spill] sm:$0xff] %v6026_v23  ;;  %v1067_v4 = vmul.f32 %v5885_v59, %v1019_v30  ;;  %v4574_v30 = vld [vmem:[%s6932_s2 + $0xa0] sm:$0xff]  }
 0x28c   : > { %1811 = vst.msk [vmem:[#allocation4 + $0x70] sm:$0xff] %vm398_vm0, %v1803_v7  ;;  %v1066_v7 = vmul.f32 %v5883_v0, %v1018_v38 }
 0x28d   : > { %2408 = vst.msk [vmem:[#allocation2 + $0x80] sm:$0xff] %vm398_vm0, %v5964_v20  ;;  %1956 = vperm.xlu0 %4549, %v5964_v20   ;;  %v1909_v35 = vpop.xlane.xlu0 %1908 }
 0x28e   : > { %v1913_v44 = vpop.xlane.xlu1 %1912  ;;  %v5977_v18 = vmax.f32 %v5966_v39, %v1909_v35  ;;  %v1017_v35 = vld [vmem:[#allocation5 + $0x8] sm:$0xff] }
 0x28f   : > { %v5980_v3 = vmax.f32 %v5969_v60, %v1913_v44  ;;  %v4573_v44 = vld [vmem:[%s6932_s2 + $0x98] sm:$0xff]   ;;  %v1065_v57 = vmul.f32 %v5881_v17, %v1017_v35 }
 0x290   : > { %2409 = vst.msk [vmem:[#allocation2 + $0x88] sm:$0xff] %vm398_vm0, %v5977_v18  ;;  %1961 = vperm.xlu1 %4548, %v5977_v18   ;;  %4451 = vmatprep.subr.bf16.mxu0 %v4573_v44 }
 0x291   : > { %2411 = vst.msk [vmem:[#allocation2 + $0x98] sm:$0xff] %vm398_vm0, %v5980_v3  ;;  %v1911_v9 = vpop.xlane.xlu0 %1910  ;;  %4452 = vmatpush3.bf16.msra.mxu0 %v4573_v44  ;;  %v1021_v44 = vld [vmem:[#allocation5 + $0x28] sm:$0xff] }
 0x292   : > { %v1917_v24 = vpop.xlane.xlu1 %1916  ;;  %v5999_v27 = vmax.f32 %v5982_v26, %v1911_v9  ;;  %4453 = vmatprep.subr.bf16.mxu0 %v4574_v30 }
 0x293   : > { %v6002_v31 = vmax.f32 %v5989_v1, %v1917_v24 }
 0x294   : > { %2410 = vst.msk [vmem:[#allocation2 + $0x90] sm:$0xff] %vm398_vm0, %v5999_v27  ;;  %1966 = vperm.xlu1 %4548, %v5999_v27  }
 0x295   : > { %2413 = vst.msk [vmem:[#allocation2 + $0xa8] sm:$0xff] %vm398_vm0, %v6002_v31  ;;  %v1915_v63 = vpop.xlane.xlu0 %1914  ;;  %4454 = vmatpush3.bf16.msra.mxu0 %v4574_v30 }
 0x296   : > { %v1921_v40 = vpop.xlane.xlu1 %1920  ;;  %v6021_v52 = vmax.f32 %v6004_v2, %v1915_v63  ;;  %v1064_v63 = vmul.f32 %v5879_v5, %v1016_v36 }
 0x297   : > { %v6024_v41 = vmax.f32 %v6011_v11, %v1921_v40  ;;  %v1613_v11 = vld [vmem:[#allocation5 + $0x58] sm:$0xff] }
 0x298   : > { %2412 = vst.msk [vmem:[#allocation2 + $0xa0] sm:$0xff] %vm398_vm0, %v6021_v52  ;;  %1971 = vperm.xlu1 %4548, %v5980_v3  }
 0x299   : > { %7042 = vst [vmem:[#allocation16_spill] sm:$0xff] %v6024_v41  ;;  %2415 = vst.msk [vmem:[#allocation2 + $0xb8] sm:$0xff] %vm398_vm0, %v6024_v41  ;;  %v4399_v54 = vpop.f32.mrb[0].mxu0  ;;  %v1919_v24 = vpop.xlane.xlu0 %1918 }
 0x29a   : > { %v1074_v40 = vadd.f32 %v4399_v54, %v1066_v7  ;;  %v6043_v51 = vmax.f32 %v6026_v23, %v1919_v24  ;;  %v953_v38 = vpop.f32.mrb[1].mxu0  ;;  %v1022_v54 = vld [vmem:[#allocation5 + $0x30] sm:$0xff]  ;;  %v1020_v24 = vld [vmem:[#allocation5 + $0x20] sm:$0xff] }
 0x29b   : > { %v1072_v48 = vadd.f32 %v1064_v63, %v953_v38  ;;  %v4400_v34 = vpop.f32.mrb[2].mxu0  ;;  %v1023_v63 = vld [vmem:[#allocation5 + $0x38] sm:$0xff] }
 0x29c   : > { %7044 = vst [vmem:[#allocation24_spill] sm:$0xff] %v6043_v51  ;;  %1083 = vst.msk [vmem:[#allocation5 + $0x10] sm:$0xff] %vm495_vm6, %v1074_v40  ;;  %v1075_v36 = vadd.f32 %v4400_v34, %v1067_v4  ;;  %v956_v7 = vpop.f32.mrb[3].mxu0  ;;  %1976 = vperm.xlu1 %4548, %v6021_v52   ;;  %v1070_v34 = vmul.f32 %v5891_v56, %v1022_v54  ;;  %v4575_v40 = vld [vmem:[%s6932_s2 + $0xa8] sm:$0xff]   ;;  %v1069_v54 = vmul.f32 %v5889_v50, %v1021_v44  ;;  %v1089_v44 = vld [vmem:[#allocation6] sm:$0xff] }
 0x29d   : > { %2414 = vst.msk [vmem:[#allocation2 + $0xb0] sm:$0xff] %vm398_vm0, %v6043_v51  ;;  %v1073_v35 = vadd.f32 %v1065_v57, %v956_v7  ;;  %v1068_v57 = vmul.f32 %v5887_v53, %v1020_v24  ;;  %4455 = vmatprep.subr.bf16.mxu0 %v4575_v40  ;;  %v6066_v7 = vpop.permute.xlu1 %1620  ;;  %v4576_v24 = vld [vmem:[%s6932_s2 + $0xb0] sm:$0xff]  }
 0x29e   : > { %1081 = vst.msk [vmem:[#allocation5] sm:$0xff] %vm495_vm6, %v1072_v48  ;;  %1084 = vst.msk [vmem:[#allocation5 + $0x18] sm:$0xff] %vm495_vm6, %v1075_v36  ;;  %v1071_v36 = vmul.f32 %v5894_v33, %v1023_v63  ;;  %4456 = vmatpush3.bf16.msra.mxu0 %v4575_v40 }
 0x29f   : > { %1082 = vst.msk [vmem:[#allocation5 + $0x8] sm:$0xff] %vm495_vm6, %v1073_v35  ;;  %4457 = vmatprep.subr.bf16.mxu0 %v4576_v24 }
 0x2a0   : > { %1981 = vperm.xlu1 %4548, %v6002_v31  }
 0x2a1   : > { %v4403_v48 = vpop.f32.mrb[4].mxu0 }
 0x2a2   : > { %v1078_v38 = vadd.f32 %v4403_v48, %v1070_v34  ;;  %v969_v4 = vpop.f32.mrb[5].mxu0  ;;  %v6074_v34 = vpop.permute.xlu0 %1625  ;;  %v1091_v48 = vld [vmem:[#allocation6 + $0x10] sm:$0xff]  ;;  %4458 = vmatpush3.bf16.msra.mxu0 %v4576_v24 }
 0x2a3   : > { %v1076_v35 = vadd.f32 %v1068_v57, %v969_v4  ;;  %v4404_v9 = vpop.f32.mrb[6].mxu0  ;;  %v1099_v40 = vmul.f32 %v1091_v48, %v5883_v0  ;;  %v1090_v57 = vld [vmem:[#allocation6 + $0x8] sm:$0xff]  ;;  %v6084_v4 = vpop.permute.xlu1 %1630 }
 0x2a4   : > { %1087 = vst.msk [vmem:[#allocation5 + $0x30] sm:$0xff] %vm495_vm6, %v1078_v38  ;;  %v1079_v30 = vadd.f32 %v4404_v9, %v1071_v36  ;;  %v972_v16 = vpop.f32.mrb[7].mxu0  ;;  %1986 = vperm.xlu1 %4548, %v6043_v51   ;;  %v1092_v9 = vld [vmem:[#allocation6 + $0x18] sm:$0xff]  ;;  %v1097_v36 = vmul.f32 %v1089_v44, %v5879_v5  ;;  %v1098_v48 = vmul.f32 %v1090_v57, %v5881_v17  ;;  %v1611_v44 = vld [vmem:[#allocation5 + $0x48] sm:$0xff] }
 0x2a5   : > { %1085 = vst.msk [vmem:[#allocation5 + $0x20] sm:$0xff] %vm495_vm6, %v1076_v35  ;;  %v1077_v63 = vadd.f32 %v1069_v54, %v972_v16  ;;  %v4577_v38 = vld [vmem:[%s6932_s2 + $0xb8] sm:$0xff]   ;;  %v1612_v35 = vld [vmem:[#allocation5 + $0x50] sm:$0xff] }
 0x2a6   : > { %1088 = vst.msk [vmem:[#allocation5 + $0x38] sm:$0xff] %vm495_vm6, %v1079_v30  ;;  %4459 = vmatprep.subr.bf16.mxu0 %v4577_v38  ;;  %v1660_v5 = vmul.f32 %v6084_v4, %v1612_v35 }
 0x2a7   : > { %1086 = vst.msk [vmem:[#allocation5 + $0x28] sm:$0xff] %vm495_vm6, %v1077_v63  ;;  %v1100_v63 = vmul.f32 %v1092_v9, %v5885_v59  ;;  %4460 = vmatpush3.bf16.msra.mxu0 %v4577_v38  ;;  %v1659_v38 = vmul.f32 %v6074_v34, %v1611_v44 }
 0x2a8   : > { %1991 = vperm.xlu1 %4548, %v6024_v41   ;;  %v6088_v41 = vpop.permute.xlu0 %1635 }
 0x2a9   : > { %v4407_v16 = vpop.f32.mrb[8].mxu0  ;;  %v1661_v57 = vmul.f32 %v6088_v41, %v1613_v11 }
 0x2aa   : > { %v1107_v54 = vadd.f32 %v4407_v16, %v1099_v40  ;;  %v985_v30 = vpop.f32.mrb[9].mxu0  ;;  %v1658_v40 = vmul.f32 %v6066_v7, %v1610_v13  ;;  %v1095_v16 = vld [vmem:[#allocation6 + $0x30] sm:$0xff] }
 0x2ab   : > { %v1105_v0 = vadd.f32 %v1097_v36, %v985_v30  ;;  %v4408_v24 = vpop.f32.mrb[10].mxu0  ;;  %v1103_v13 = vmul.f32 %v1095_v16, %v5891_v56 }
 0x2ac   : > { %1115 = vst.msk [vmem:[#allocation6 + $0x10] sm:$0xff] %vm495_vm6, %v1107_v54  ;;  %v1108_v51 = vadd.f32 %v4408_v24, %v1100_v63  ;;  %v988_v23 = vpop.f32.mrb[11].mxu0  ;;  %v1093_v54 = vld [vmem:[#allocation6 + $0x20] sm:$0xff]  ;;  %v1096_v63 = vld [vmem:[#allocation6 + $0x38] sm:$0xff]  ;;  %v1094_v24 = vld [vmem:[#allocation6 + $0x28] sm:$0xff] }
 0x2ad   : > { %1113 = vst.msk [vmem:[#allocation6] sm:$0xff] %vm495_vm6, %v1105_v0  ;;  %v1106_v59 = vadd.f32 %v1098_v48, %v988_v23  ;;  %v4431_v9 = vpop.f32.mrb[0].mxu1  ;;  %v1101_v11 = vmul.f32 %v1093_v54, %v5887_v53  ;;  %v1104_v44 = vmul.f32 %v1096_v63, %v5894_v33  ;;  %v1102_v56 = vmul.f32 %v1094_v24, %v5889_v50  ;;  %v1616_v54 = vld [vmem:[#allocation5 + $0x70] sm:$0xff] }
 0x2ae   : > { %1116 = vst.msk [vmem:[#allocation6 + $0x18] sm:$0xff] %vm495_vm6, %v1108_v51  ;;  %v1668_v36 = vadd.f32 %v4431_v9, %v1660_v5  ;;  %v1546_v17 = vpop.f32.mrb[1].mxu1  ;;  %v6105_v9 = vpop.permute.xlu1 %1640 }
 0x2af   : > { %1114 = vst.msk [vmem:[#allocation6 + $0x8] sm:$0xff] %vm495_vm6, %v1106_v59  ;;  %v1666_v30 = vadd.f32 %v1658_v40, %v1546_v17  ;;  %v4432_v35 = vpop.f32.mrb[2].mxu1 }
 0x2b0   : > { %1676 = vst.msk [vmem:[#allocation5 + $0x50] sm:$0xff] %vm495_vm6, %v1668_v36  ;;  %v1669_v23 = vadd.f32 %v4432_v35, %v1661_v57  ;;  %v1549_v0 = vpop.f32.mrb[3].mxu1  ;;  %v1646_v57 = vpop.permute.xlu0 %1645 }
 0x2b1   : > { %1674 = vst.msk [vmem:[#allocation5 + $0x40] sm:$0xff] %vm495_vm6, %v1666_v30  ;;  %v1667_v51 = vadd.f32 %v1659_v38, %v1549_v0  ;;  %v4411_v48 = vpop.f32.mrb[12].mxu0  ;;  %v1614_v30 = vld [vmem:[#allocation5 + $0x60] sm:$0xff]  ;;  %v1617_v38 = vld [vmem:[#allocation5 + $0x78] sm:$0xff] }
 0x2b2   : > { %1677 = vst.msk [vmem:[#allocation5 + $0x58] sm:$0xff] %vm495_vm6, %v1669_v23  ;;  %v1111_v5 = vadd.f32 %v4411_v48, %v1103_v13  ;;  %v1001_v59 = vpop.f32.mrb[13].mxu0  ;;  %v1651_v33 = vpop.permute.xlu1 %1650  ;;  %v1615_v23 = vld [vmem:[#allocation5 + $0x68] sm:$0xff]  ;;  %v1662_v0 = vmul.f32 %v6105_v9, %v1614_v30 }
 0x2b3   : > { %1675 = vst.msk [vmem:[#allocation5 + $0x48] sm:$0xff] %vm495_vm6, %v1667_v51  ;;  %v1109_v40 = vadd.f32 %v1101_v11, %v1001_v59  ;;  %v4412_v36 = vpop.f32.mrb[14].mxu0  ;;  %v1664_v63 = vmul.f32 %v1651_v33, %v1616_v54 }
 0x2b4   : > { %1119 = vst.msk [vmem:[#allocation6 + $0x30] sm:$0xff] %vm495_vm6, %v1111_v5  ;;  %v1112_v16 = vadd.f32 %v4412_v36, %v1104_v44  ;;  %v1004_v17 = vpop.f32.mrb[15].mxu0  ;;  %v1656_v35 = vpop.permute.xlu0 %1655  ;;  %v1663_v5 = vmul.f32 %v1646_v57, %v1615_v23  ;;  %v1685_v36 = vld [vmem:[#allocation6 + $0x50] sm:$0xff] }
 0x2b5   : > { %1117 = vst.msk [vmem:[#allocation6 + $0x20] sm:$0xff] %vm495_vm6, %v1109_v40  ;;  %v1110_v53 = vadd.f32 %v1102_v56, %v1004_v17  ;;  %v1665_v51 = vmul.f32 %v1656_v35, %v1617_v38  ;;  %v1683_v56 = vld [vmem:[#allocation6 + $0x40] sm:$0xff]  ;;  %v1693_v17 = vmul.f32 %v1685_v36, %v6084_v4  ;;  %v1689_v4 = vld [vmem:[#allocation6 + $0x70] sm:$0xff] }
 0x2b6   : > { %1120 = vst.msk [vmem:[#allocation6 + $0x38] sm:$0xff] %vm495_vm6, %v1112_v16  ;;  %v1686_v16 = vld [vmem:[#allocation6 + $0x58] sm:$0xff]  ;;  %v1691_v30 = vmul.f32 %v1683_v56, %v6066_v7 }
 0x2b7   : > { %1118 = vst.msk [vmem:[#allocation6 + $0x28] sm:$0xff] %vm495_vm6, %v1110_v53  ;;  %v1684_v53 = vld [vmem:[#allocation6 + $0x48] sm:$0xff]  ;;  %v1694_v23 = vmul.f32 %v1686_v16, %v6088_v41  ;;  %v1690_v7 = vld [vmem:[#allocation6 + $0x78] sm:$0xff] }
 0x2b8   : > { %v1688_v41 = vld [vmem:[#allocation6 + $0x68] sm:$0xff]  ;;  %v1698_v56 = vmul.f32 %v1690_v7, %v1656_v35  ;;  %v7045_v7 = vld [vmem:[#allocation33_spill] sm:$0xff] }
 0x2bd   : > { %v4435_v50 = vpop.f32.mrb[4].mxu1 }
 0x2be   : > { %v1672_v13 = vadd.f32 %v4435_v50, %v1664_v63  ;;  %v1562_v24 = vpop.f32.mrb[5].mxu1 }
 0x2bf   : > { %v1670_v48 = vadd.f32 %v1662_v0, %v1562_v24  ;;  %v4436_v11 = vpop.f32.mrb[6].mxu1 }
 0x2c0   : > { %1680 = vst.msk [vmem:[#allocation5 + $0x70] sm:$0xff] %vm495_vm6, %v1672_v13  ;;  %v1673_v59 = vadd.f32 %v4436_v11, %v1665_v51  ;;  %v1565_v44 = vpop.f32.mrb[7].mxu1  ;;  %v1692_v13 = vmul.f32 %v1684_v53, %v6074_v34  ;;  %v1687_v11 = vld [vmem:[#allocation6 + $0x60] sm:$0xff]  ;;  %v1696_v53 = vmul.f32 %v1688_v41, %v1646_v57 }
 0x2c1   : > { %1678 = vst.msk [vmem:[#allocation5 + $0x60] sm:$0xff] %vm495_vm6, %v1670_v48  ;;  %v1671_v40 = vadd.f32 %v1663_v5, %v1565_v44  ;;  %v1697_v5 = vmul.f32 %v1689_v4, %v1651_v33  ;;  %v1695_v44 = vmul.f32 %v1687_v11, %v6105_v9 }
 0x2c2   : > { %1681 = vst.msk [vmem:[#allocation5 + $0x78] sm:$0xff] %vm495_vm6, %v1673_v59  ;;  %v4881_v59 = vmov 3  }
 0x2c3   : > { %1679 = vst.msk [vmem:[#allocation5 + $0x68] sm:$0xff] %vm495_vm6, %v1671_v40  ;;  %4550 = vset.pattern.permute.xlu1 %v4881_v59  ;;  %4551 = vset.pattern.permute.xlu0 %v4881_v59 }
 0x2c5   : > { %v4439_v54 = vpop.f32.mrb[8].mxu1 }
 0x2c6   : > { %v1701_v38 = vadd.f32 %v4439_v54, %v1693_v17  ;;  %v1578_v63 = vpop.f32.mrb[9].mxu1 }
 0x2c7   : > { %v1699_v50 = vadd.f32 %v1691_v30, %v1578_v63  ;;  %v4440_v0 = vpop.f32.mrb[10].mxu1 }
 0x2c8   : > { %1709 = vst.msk [vmem:[#allocation6 + $0x50] sm:$0xff] %vm495_vm6, %v1701_v38  ;;  %v1702_v24 = vadd.f32 %v4440_v0, %v1694_v23  ;;  %v1581_v51 = vpop.f32.mrb[11].mxu1 }
 0x2c9   : > { %1707 = vst.msk [vmem:[#allocation6 + $0x40] sm:$0xff] %vm495_vm6, %v1699_v50  ;;  %v1700_v48 = vadd.f32 %v1692_v13, %v1581_v51 }
 0x2ca   : > { %1710 = vst.msk [vmem:[#allocation6 + $0x58] sm:$0xff] %vm495_vm6, %v1702_v24 }
 0x2cb   : > { %1708 = vst.msk [vmem:[#allocation6 + $0x48] sm:$0xff] %vm495_vm6, %v1700_v48 }
 0x2cd   : > { %v4443_v34 = vpop.f32.mrb[12].mxu1 }
 0x2ce   : > { %v1705_v40 = vadd.f32 %v4443_v34, %v1697_v5  ;;  %v1594_v36 = vpop.f32.mrb[13].mxu1 }
 0x2cf   : > { %v1703_v16 = vadd.f32 %v1695_v44, %v1594_v36  ;;  %v4444_v17 = vpop.f32.mrb[14].mxu1 }
 0x2d0   : > { %1713 = vst.msk [vmem:[#allocation6 + $0x70] sm:$0xff] %vm495_vm6, %v1705_v40  ;;  %v1706_v54 = vadd.f32 %v4444_v17, %v1698_v56  ;;  %v1597_v30 = vpop.f32.mrb[15].mxu1 }
 0x2d1   : > { %1711 = vst.msk [vmem:[#allocation6 + $0x60] sm:$0xff] %vm495_vm6, %v1703_v16  ;;  %v1704_v33 = vadd.f32 %v1696_v53, %v1597_v30 }
 0x2d2   : > { %1714 = vst.msk [vmem:[#allocation6 + $0x78] sm:$0xff] %vm495_vm6, %v1706_v54 }
 0x2d3   : > { %1712 = vst.msk [vmem:[#allocation6 + $0x68] sm:$0xff] %vm495_vm6, %v1704_v33 }
 0x30c   : > { %v1957_v38 = vpop.permute.xlu0 %1956 }
 0x30d   : > { %v1994_v9 = vsub.f32 %v5791_v12, %v1957_v38 }
 0x30f   : > { %v2002_v63 = vmul.f32 1.442695, %v1994_v9  ;;  %v1962_v23 = vpop.permute.xlu1 %1961 }
 0x310   : > { %v1995_v35 = vsub.f32 %v5797_v8, %v1962_v23 }
 0x311   : > { %4650 = vpow2.f32 %v2002_v63 }
 0x312   : > { %v2004_v57 = vmul.f32 1.442695, %v1995_v35 }
 0x313   : > { %v1967_v50 = vpop.permute.xlu1 %1966 }
 0x314   : > { %4652 = vpow2.f32 %v2004_v57  ;;  %v1996_v0 = vsub.f32 %v5808_v45, %v1967_v50 }
 0x316   : > { %v2006_v13 = vmul.f32 1.442695, %v1996_v0 }
 0x317   : > { %v1972_v24 = vpop.permute.xlu1 %1971 }
 0x318   : > { %4654 = vpow2.f32 %v2006_v13  ;;  %v1997_v51 = vsub.f32 %v5802_v43, %v1972_v24 }
 0x31a   : > { %v2008_v48 = vmul.f32 1.442695, %v1997_v51 }
 0x31b   : > { %v4651_v4 = vpop.eup %4650  ;;  %v1977_v11 = vpop.permute.xlu1 %1976 }
 0x31c   : > { %4656 = vpow2.f32 %v2008_v48  ;;  %v1998_v12 = vsub.f32 %v5818_v62, %v1977_v11  ;;  %v2018_v5 = vmul.f32 %v4651_v4, %v7045_v7  ;;  %v2026_v0 = vmul.f32 %v4651_v4, %v5717_v55 }
 0x31e   : > { %v4653_v8 = vpop.eup %4652  ;;  %v2010_v41 = vmul.f32 1.442695, %v1998_v12  ;;  %2327 = vadd.xlane.f32.xlu0 %v2018_v5 }
 0x31f   : > { %v1982_v59 = vpop.permute.xlu1 %1981  ;;  %v2019_v34 = vmul.f32 %v4653_v8, %v5672_v15  ;;  %v2027_v50 = vmul.f32 %v4653_v8, %v5706_v6 }
 0x320   : > { %4658 = vpow2.f32 %v2010_v41  ;;  %v1999_v45 = vsub.f32 %v5812_v19, %v1982_v59 }
 0x321   : > { %2329 = vadd.xlane.f32.xlu1 %v2019_v34  ;;  %v2034_v44 = vpack.c.bf16 %v2019_v34, %v2018_v5  ;;  %v2038_v51 = vpack.c.bf16 %v2027_v50, %v2026_v0 }
 0x322   : > { %v4655_v43 = vpop.eup %4654  ;;  %v2012_v40 = vmul.f32 1.442695, %v1999_v45  ;;  %v4843_v45 = vld [vmem:[%s4954_s9] sm:$0xff] }
 0x323   : > { %v1987_v36 = vpop.permute.xlu1 %1986  ;;  %4461 = vmatprep.mubr.bf16.mxu0 %v2034_v44  ;;  %v2020_v56 = vmul.f32 %v4655_v43, %v5668_v49  ;;  %v2028_v48 = vmul.f32 %v4655_v43, %v5724_v37  ;;  %v4844_v44 = vld [vmem:[%s4954_s9 + $0x10] sm:$0xff]  ;;  %v4845_v43 = vld [vmem:[%s4954_s9 + $0x18] sm:$0xff] }
 0x324   : > { %4660 = vpow2.f32 %v2012_v40  ;;  %v2000_v62 = vsub.f32 %v5831_v10, %v1987_v36  ;;  %v4846_v40 = vld [vmem:[%s4954_s9 + $0x8] sm:$0xff]  ;;  %v4847_v36 = vld [vmem:[%s4954_s9 + $0x20] sm:$0xff] }
 0x325   : > { %2331 = vadd.xlane.f32.xlu0 %v2020_v56 }
 0x326   : > { %v4657_v16 = vpop.eup %4656  ;;  %v2014_v17 = vmul.f32 1.442695, %v2000_v62  ;;  %v4848_v62 = vld [vmem:[%s4954_s9 + $0x28] sm:$0xff] }
 0x327   : > { %v1992_v53 = vpop.permute.xlu1 %1991  ;;  %v2021_v54 = vmul.f32 %v4657_v16, %v5678_v42  ;;  %v2029_v11 = vmul.f32 %v4657_v16, %v5730_v21  ;;  %v4849_v16 = vld [vmem:[%s4954_s9 + $0x30] sm:$0xff] }
 0x328   : > { %4662 = vpow2.f32 %v2014_v17  ;;  %v2001_v19 = vsub.f32 %v5822_v22, %v1992_v53  ;;  %v4850_v17 = vld [vmem:[%s4954_s9 + $0x38] sm:$0xff]  ;;  %v7047_v53 = vsub.f32 %v5959_v61, %v5964_v20  ;;  %v7051_v61 = vsub.f32 %v6004_v2, %v6021_v52  ;;  %v2313_v52 = vld [vmem:[#allocation3 + $0x90] sm:$0xff]  ;;  %s4883_s9 = smov 64  }
 0x329   : > { %v2035_v30 = vpack.c.bf16 %v2021_v54, %v2020_v56  ;;  %2333 = vadd.xlane.f32.xlu0 %v2021_v54  ;;  %v2039_v4 = vpack.c.bf16 %v2029_v11, %v2028_v48  ;;  %v7046_v56 = vmov 0  }
 0x32a   : > { %v4659_v33 = vpop.eup %4658  ;;  %v2016_v38 = vmul.f32 1.442695, %v2001_v19  ;;  %v1938_v54 = vmul.f32 1.442695, %v7047_v53  ;;  %v7048_v19 = vsub.f32 %v5966_v39, %v5977_v18  ;;  %v1946_v20 = vmul.f32 1.442695, %v7051_v61 }
 0x32b   : > { %4462 = vmatmul.mubr.bf16.vlgmr.msra.gmra.mrb[16].mxu0 %v2035_v30  ;;  %v2022_v9 = vmul.f32 %v4659_v33, %v5682_v25  ;;  %v2030_v5 = vmul.f32 %v4659_v33, %v5741_v58  ;;  %v7049_v33 = vsub.f32 %v5982_v26, %v5999_v27  ;;  %v7052_v27 = vsub.f32 %v5989_v1, %v6002_v31 }
 0x32c   : > { %4664 = vpow2.f32 %v2016_v38  ;;  %v1940_v30 = vmul.f32 1.442695, %v7048_v19  ;;  %v2317_v19 = vld [vmem:[#allocation3 + $0xb0] sm:$0xff] }
 0x32d   : > { %2335 = vadd.xlane.f32.xlu1 %v2022_v9  ;;  %4666 = vpow2.f32 %v1938_v54  ;;  %v1942_v38 = vmul.f32 1.442695, %v7049_v33 }
 0x32e   : > { %v4661_v63 = vpop.eup %4660  ;;  %4668 = vpow2.f32 %v1940_v30 }
 0x32f   : > { %v2023_v10 = vmul.f32 %v4661_v63, %v5695_v28  ;;  %v2031_v12 = vmul.f32 %v4661_v63, %v5735_v46  ;;  %4670 = vpow2.f32 %v1942_v38 }
 0x331   : > { %2337 = vadd.xlane.f32.xlu0 %v2023_v10  ;;  %v2036_v23 = vpack.c.bf16 %v2023_v10, %v2022_v9  ;;  %v2040_v8 = vpack.c.bf16 %v2031_v12, %v2030_v5  ;;  %v7050_v9 = vsub.f32 %v5969_v60, %v5980_v3  ;;  %v1948_v60 = vmul.f32 1.442695, %v7052_v27  ;;  %v2362_v27 = vld [vmem:[#allocation4 + $0x90] sm:$0xff] }
 0x332   : > { %v4663_v35 = vpop.eup %4662 }
 0x333   : > { %4465 = vmatprep.mubr.bf16.mxu0 %v2036_v23  ;;  %v2024_v57 = vmul.f32 %v4663_v35, %v5702_v47  ;;  %v2032_v41 = vmul.f32 %v4663_v35, %v5754_v29  ;;  %v1944_v63 = vmul.f32 1.442695, %v7050_v9  ;;  %v2311_v23 = vld [vmem:[#allocation3 + $0x80] sm:$0xff]  ;;  %v2312_v35 = vld [vmem:[#allocation3 + $0x88] sm:$0xff] }
 0x335   : > { %2339 = vadd.xlane.f32.xlu1 %v2024_v57  ;;  %4672 = vpow2.f32 %v1944_v63  ;;  %v2360_v63 = vld [vmem:[#allocation4 + $0x80] sm:$0xff] }
 0x336   : > { %v4665_v22 = vpop.eup %4664  ;;  %4674 = vpow2.f32 %v1946_v20 }
 0x337   : > { %v2025_v13 = vmul.f32 %v4665_v22, %v5711_v32  ;;  %v2033_v59 = vmul.f32 %v4665_v22, %v5756_v14  ;;  %v6177_v10 = vpop.eup %4666  ;;  %4676 = vpow2.f32 %v1948_v60  ;;  %v2361_v60 = vld [vmem:[#allocation4 + $0x88] sm:$0xff] }
 0x338   : > { %v6182_v39 = vpop.eup %4668  ;;  %v2319_v18 = vmul.f32 %v6177_v10, %v2311_v23  ;;  %v2318_v23 = vld [vmem:[#allocation3 + $0xb8] sm:$0xff]  ;;  %v2368_v20 = vmul.f32 %v6177_v10, %v2360_v63 }
 0x339   : > { %2376 = vadd.xlane.f32.xlu1 %v2026_v0  ;;  %2341 = vadd.xlane.f32.xlu0 %v2025_v13  ;;  %v2037_v24 = vpack.c.bf16 %v2025_v13, %v2024_v57  ;;  %v2041_v34 = vpack.c.bf16 %v2033_v59, %v2032_v41  ;;  %v2320_v57 = vmul.f32 %v6182_v39, %v2312_v35  ;;  %v6189_v22 = vpop.eup %4670  ;;  %v7053_v0 = vld [vmem:[#allocation18_spill] sm:$0xff]  ;;  %v7054_v13 = vld [vmem:[#allocation24_spill] sm:$0xff] }
 0x33a   : > { %v2321_v1 = vmul.f32 %v6189_v22, %v2313_v52  ;;  %v2369_v52 = vmul.f32 %v6182_v39, %v2361_v60 }
 0x33b   : > { %4466 = vmatmul.mubr.bf16.gmra.mrb[20].mxu0 %v2037_v24  ;;  %v7055_v24 = vsub.f32 %v7053_v0, %v7054_v13  ;;  %v2364_v13 = vld [vmem:[#allocation4 + $0xa0] sm:$0xff] }
 0x33c   : > { %4469 = vmatprep.mubr.bf16.mxu0 %v2038_v51 }
 0x33d   : > { %2380 = vadd.xlane.f32.xlu1 %v2028_v48  ;;  %2378 = vadd.xlane.f32.xlu0 %v2027_v50  ;;  %v1950_v51 = vmul.f32 1.442695, %v7055_v24  ;;  %v2363_v24 = vld [vmem:[#allocation4 + $0x98] sm:$0xff] }
 0x33f   : > { %v6197_v31 = vpop.eup %4672  ;;  %4678 = vpow2.f32 %v1950_v51 }
 0x341   : > { %2384 = vadd.xlane.f32.xlu1 %v2030_v5  ;;  %2382 = vadd.xlane.f32.xlu0 %v2029_v11  ;;  %v2314_v11 = vld [vmem:[#allocation3 + $0x98] sm:$0xff]  ;;  %v7056_v5 = vld [vmem:[#allocation20_spill] sm:$0xff] }
 0x343   : > { %4470 = vmatmul.mubr.bf16.gmra.mrb[24].mxu0 %v2039_v4  ;;  %v7057_v4 = vld [vmem:[#allocation16_spill] sm:$0xff] }
 0x344   : > { %4473 = vmatprep.mubr.bf16.mxu0 %v2040_v8  ;;  %v7058_v8 = vsub.f32 %v7056_v5, %v7057_v4  ;;  %v2366_v4 = vld [vmem:[#allocation4 + $0xb0] sm:$0xff] }
 0x345   : > { %2388 = vadd.xlane.f32.xlu1 %v2032_v41  ;;  %2386 = vadd.xlane.f32.xlu0 %v2031_v12 }
 0x346   : > { %v1952_v41 = vmul.f32 1.442695, %v7058_v8  ;;  %v2365_v8 = vld [vmem:[#allocation4 + $0xa8] sm:$0xff] }
 0x348   : > { %4680 = vpow2.f32 %v1952_v41 }
 0x349   : > { %2390 = vadd.xlane.f32.xlu0 %v2033_v59  ;;  %v2322_v59 = vmul.f32 %v6197_v31, %v2314_v11  ;;  %v2371_v11 = vmul.f32 %v6197_v31, %v2363_v24 }
 0x34b   : > { %4474 = vmatmul.mubr.bf16.gmra.mrb[28].mxu0 %v2041_v34  ;;  %v6204_v34 = vpop.eup %4674 }
 0x356   : > { %2417 = vperm.xlu1 %4550, %v4843_v45  }
 0x35a   : > { %2425 = vperm.xlu1 %4550, %v4844_v44   ;;  %v2315_v44 = vld [vmem:[#allocation3 + $0xa0] sm:$0xff] }
 0x35e   : > { %2429 = vperm.xlu1 %4550, %v4845_v43  }
 0x35f   : > { %2421 = vperm.xlu0 %4551, %v4846_v40   ;;  %v2323_v40 = vmul.f32 %v6204_v34, %v2315_v44 }
 0x362   : > { %2433 = vperm.xlu1 %4550, %v4847_v36   ;;  %v6208_v36 = vpop.eup %4676 }
 0x363   : > { %4553 = vset.pattern.permute.xlu0 %v7046_v56  ;;  %v6212_v53 = vpop.eup %4678 }
 0x364   : > { %v2325_v33 = vmul.f32 %v6212_v53, %v2317_v19  ;;  %v6216_v38 = vpop.eup %4680  ;;  %v4851_v19 = vld [vmem:[%s6931_s1] sm:$0xff] }
 0x366   : > { %2437 = vperm.xlu1 %4550, %v4848_v62   ;;  %v2316_v62 = vld [vmem:[#allocation3 + $0xa8] sm:$0xff] }
 0x36a   : > { %2441 = vperm.xlu1 %4550, %v4849_v16  }
 0x36e   : > { %2445 = vperm.xlu1 %4550, %v4850_v17   ;;  %v2324_v17 = vmul.f32 %v6208_v36, %v2316_v62 }
 0x372   : > { %4552 = vset.pattern.permute.xlu1 %v7046_v56 }
 0x3ab   : > { %v2328_v26 = vpop.xlane.xlu0 %2327 }
 0x3ac   : > { %v2343_v3 = vadd.f32 %v2328_v26, %v2319_v18  ;;  %v2326_v18 = vmul.f32 %v6216_v38, %v2318_v23 }
 0x3ae   : > { %2351 = vst.msk [vmem:[#allocation3 + $0x80] sm:$0xff] %vm398_vm0, %v2343_v3  ;;  %v2330_v2 = vpop.xlane.xlu1 %2329 }
 0x3af   : > { %v2344_v50 = vadd.f32 %v2330_v2, %v2320_v57  ;;  %v2370_v2 = vmul.f32 %v6189_v22, %v2362_v27 }
 0x3b1   : > { %2352 = vst.msk [vmem:[#allocation3 + $0x88] sm:$0xff] %vm398_vm0, %v2344_v50 }
 0x3b2   : > { %v2332_v48 = vpop.xlane.xlu0 %2331 }
 0x3b3   : > { %v2345_v12 = vadd.f32 %v2332_v48, %v2321_v1  ;;  %v2372_v48 = vmul.f32 %v6204_v34, %v2364_v13 }
 0x3b5   : > { %2353 = vst.msk [vmem:[#allocation3 + $0x90] sm:$0xff] %vm398_vm0, %v2345_v12 }
 0x3b6   : > { %v2334_v45 = vpop.xlane.xlu0 %2333 }
 0x3b7   : > { %v2346_v43 = vadd.f32 %v2334_v45, %v2322_v59  ;;  %v7059_v45 = vld [vmem:[#allocation7_spill] sm:$0xff] }
 0x3b8   : > { %v2450_v44 = vsub.s32 3, %v7059_v45 }
 0x3b9   : > { %2354 = vst.msk [vmem:[#allocation3 + $0x98] sm:$0xff] %vm398_vm0, %v2346_v43  ;;  %v2374_v43 = vmul.f32 %v6212_v53, %v2366_v4 }
 0x3ba   : > { %v2336_v56 = vpop.xlane.xlu1 %2335 }
 0x3bb   : > { %v2347_v16 = vadd.f32 %v2336_v56, %v2323_v40  ;;  %v2373_v40 = vmul.f32 %v6208_v36, %v2365_v8 }
 0x3bd   : > { %2355 = vst.msk [vmem:[#allocation3 + $0xa0] sm:$0xff] %vm398_vm0, %v2347_v16  ;;  %v2367_v16 = vld [vmem:[#allocation4 + $0xb8] sm:$0xff] }
 0x3be   : > { %v2338_v54 = vpop.xlane.xlu0 %2337 }
 0x3bf   : > { %v2348_v30 = vadd.f32 %v2338_v54, %v2324_v17 }
 0x3c1   : > { %2356 = vst.msk [vmem:[#allocation3 + $0xa8] sm:$0xff] %vm398_vm0, %v2348_v30  ;;  %v2451_v30 = vrot.slane %v4851_v19, %v2450_v44 }
 0x3c2   : > { %v2340_v9 = vpop.xlane.xlu1 %2339 }
 0x3c3   : > { %v2349_v61 = vadd.f32 %v2340_v9, %v2325_v33  ;;  %v2375_v33 = vmul.f32 %v6216_v38, %v2367_v16 }
 0x3c5   : > { %2357 = vst.msk [vmem:[#allocation3 + $0xb0] sm:$0xff] %vm398_vm0, %v2349_v61 }
 0x3c6   : > { %v2377_v35 = vpop.xlane.xlu1 %2376  ;;  %v2342_v26 = vpop.xlane.xlu0 %2341 }
 0x3c7   : > { %v2392_v3 = vadd.f32 %v2377_v35, %v2368_v20  ;;  %v2350_v57 = vadd.f32 %v2342_v26, %v2326_v18 }
 0x3c9   : > { %2400 = vst.msk [vmem:[#allocation4 + $0x80] sm:$0xff] %vm398_vm0, %v2392_v3  ;;  %2358 = vst.msk [vmem:[#allocation3 + $0xb8] sm:$0xff] %vm398_vm0, %v2350_v57 }
 0x3ca   : > { %v2381_v50 = vpop.xlane.xlu1 %2380  ;;  %v2379_v0 = vpop.xlane.xlu0 %2378 }
 0x3cb   : > { %v2394_v51 = vadd.f32 %v2381_v50, %v2370_v2  ;;  %v2393_v1 = vadd.f32 %v2379_v0, %v2369_v52 }
 0x3cd   : > { %2402 = vst.msk [vmem:[#allocation4 + $0x90] sm:$0xff] %vm398_vm0, %v2394_v51  ;;  %2401 = vst.msk [vmem:[#allocation4 + $0x88] sm:$0xff] %vm398_vm0, %v2393_v1 }
 0x3ce   : > { %v2385_v12 = vpop.xlane.xlu1 %2384  ;;  %v2383_v5 = vpop.xlane.xlu0 %2382 }
 0x3cf   : > { %v2396_v41 = vadd.f32 %v2385_v12, %v2372_v48  ;;  %v2395_v59 = vadd.f32 %v2383_v5, %v2371_v11 }
 0x3d1   : > { %2404 = vst.msk [vmem:[#allocation4 + $0xa0] sm:$0xff] %vm398_vm0, %v2396_v41  ;;  %2403 = vst.msk [vmem:[#allocation4 + $0x98] sm:$0xff] %vm398_vm0, %v2395_v59 }
 0x3d2   : > { %v2389_v56 = vpop.xlane.xlu1 %2388  ;;  %v2387_v62 = vpop.xlane.xlu0 %2386 }
 0x3d3   : > { %v2398_v17 = vadd.f32 %v2389_v56, %v2374_v43  ;;  %v2397_v54 = vadd.f32 %v2387_v62, %v2373_v40  ;;  %v4579_v56 = vld [vmem:[%s6932_s2 + $0xc8] sm:$0xff]  }
 0x3d5   : > { %2406 = vst.msk [vmem:[#allocation4 + $0xb0] sm:$0xff] %vm398_vm0, %v2398_v17  ;;  %2405 = vst.msk [vmem:[#allocation4 + $0xa8] sm:$0xff] %vm398_vm0, %v2397_v54 }
 0x3d6   : > { %v2418_v9 = vpop.permute.xlu1 %2417  ;;  %v2391_v63 = vpop.xlane.xlu0 %2390 }
 0x3d7   : > { %v2452_v23 = vadd.f32 %v2451_v30, %v2418_v9  ;;  %v2399_v61 = vadd.f32 %v2391_v63, %v2375_v33 }
 0x3d9   : > { %v2468_v20 = vmul.f32 0.2, %v2452_v23  ;;  %2407 = vst.msk [vmem:[#allocation4 + $0xb8] sm:$0xff] %vm398_vm0, %v2399_v61  ;;  %vm2460_vm12 = vcmp.gt.f32.partialorder %v2452_v23, 0.0 }
 0x3da   : > { %v2426_v18 = vpop.permute.xlu1 %2425 }
 0x3db   : > { %v2454_v35 = vadd.f32 %v2451_v30, %v2426_v18  ;;  %v2476_v26 = vsel %vm2460_vm12, %v2452_v23, %v2468_v20 }
 0x3dc   : > { %v6243_v60 = vsel %vm619_vm1, %v2476_v26, -1e+30 }
 0x3dd   : > { %v2470_v3 = vmul.f32 0.2, %v2454_v35  ;;  %2501 = vmax.xlane.f32.xlu1 %v6243_v60  ;;  %vm2462_vm14 = vcmp.gt.f32.partialorder %v2454_v35, 0.0 }
 0x3de   : > { %v2430_v57 = vpop.permute.xlu1 %2429  ;;  %v2422_v2 = vpop.permute.xlu0 %2421 }
 0x3df   : > { %v2455_v52 = vadd.f32 %v2451_v30, %v2430_v57  ;;  %v2453_v50 = vadd.f32 %v2451_v30, %v2422_v2  ;;  %v2478_v0 = vsel %vm2462_vm14, %v2454_v35, %v2470_v3  ;;  %v4583_v3 = vld [vmem:[%s6932_s2 + $0xe8] sm:$0xff]  }
 0x3e0   : > { %v6248_v24 = vsel %vm621_vm4, %v2478_v0, -1e+30 }
 0x3e1   : > { %v2471_v51 = vmul.f32 0.2, %v2455_v52  ;;  %v2469_v1 = vmul.f32 0.2, %v2453_v50  ;;  %2505 = vmax.xlane.f32.xlu1 %v6248_v24  ;;  %vm2461_vm15 = vcmp.gt.f32.partialorder %v2453_v50, 0.0  ;;  %vm2463_vm1 = vcmp.gt.f32.partialorder %v2455_v52, 0.0 }
 0x3e2   : > { %v2434_v48 = vpop.permute.xlu1 %2433 }
 0x3e3   : > { %v2456_v11 = vadd.f32 %v2451_v30, %v2434_v48  ;;  %v2477_v12 = vsel %vm2461_vm15, %v2453_v50, %v2469_v1  ;;  %v2479_v41 = vsel %vm2463_vm1, %v2455_v52, %v2471_v51 }
 0x3e4   : > { %v6253_v4 = vsel %vm620_vm5, %v2477_v12, -1e+30  ;;  %v6262_v62 = vsel %vm622_vm7, %v2479_v41, -1e+30 }
 0x3e5   : > { %v2472_v8 = vmul.f32 0.2, %v2456_v11  ;;  %2503 = vmax.xlane.f32.xlu0 %v6253_v4  ;;  %vm2464_vm3 = vcmp.gt.f32.partialorder %v2456_v11, 0.0 }
 0x3e6   : > { %v2438_v59 = vpop.permute.xlu1 %2437 }
 0x3e7   : > { %v2457_v45 = vadd.f32 %v2451_v30, %v2438_v59  ;;  %v2480_v44 = vsel %vm2464_vm3, %v2456_v11, %v2472_v8  ;;  %v6329_v8 = vld [vmem:[#allocation2 + $0xd0] sm:$0xff] }
 0x3e8   : > { %v6258_v40 = vsel %vm623_vm9, %v2480_v44, -1e+30  ;;  %v6339_v44 = vld [vmem:[#allocation2 + $0xc8] sm:$0xff] }
 0x3e9   : > { %v2473_v16 = vmul.f32 0.2, %v2457_v45  ;;  %2509 = vmax.xlane.f32.xlu1 %v6258_v40  ;;  %2507 = vmax.xlane.f32.xlu0 %v6262_v62  ;;  %vm2465_vm4 = vcmp.gt.f32.partialorder %v2457_v45, 0.0 }
 0x3ea   : > { %v2442_v17 = vpop.permute.xlu1 %2441 }
 0x3eb   : > { %v2458_v54 = vadd.f32 %v2451_v30, %v2442_v17  ;;  %v2481_v19 = vsel %vm2465_vm4, %v2457_v45, %v2473_v16 }
 0x3ec   : > { %v6268_v9 = vsel %vm624_vm11, %v2481_v19, -1e+30  ;;  %v6354_v19 = vld [vmem:[#allocation2 + $0xd8] sm:$0xff] }
 0x3ed   : > { %v2474_v63 = vmul.f32 0.2, %v2458_v54  ;;  %2511 = vmax.xlane.f32.xlu0 %v6268_v9  ;;  %vm2466_vm5 = vcmp.gt.f32.partialorder %v2458_v54, 0.0 }
 0x3ee   : > { %v2446_v23 = vpop.permute.xlu1 %2445 }
 0x3ef   : > { %v2459_v61 = vadd.f32 %v2451_v30, %v2446_v23  ;;  %v2482_v20 = vsel %vm2466_vm5, %v2458_v54, %v2474_v63  ;;  %v6352_v54 = vld [vmem:[#allocation2 + $0xe0] sm:$0xff]  ;;  %v4580_v63 = vld [vmem:[%s6932_s2 + $0xd0] sm:$0xff]  }
 0x3f0   : > { %v6273_v35 = vsel %vm625_vm13, %v2482_v20, -1e+30  ;;  %7068 = vst [vmem:[#allocation26_spill] sm:$0xff] %v6352_v54 }
 0x3f1   : > { %v2475_v26 = vmul.f32 0.2, %v2459_v61  ;;  %2513 = vmax.xlane.f32.xlu1 %v6273_v35  ;;  %vm2467_vm7 = vcmp.gt.f32.partialorder %v2459_v61, 0.0 }
 0x3f3   : > { %v2483_v27 = vsel %vm2467_vm7, %v2459_v61, %v2475_v26  ;;  %v6370_v26 = vld [vmem:[#allocation2 + $0xe8] sm:$0xff] }
 0x3f4   : > { %v6278_v57 = vsel %vm626_vm2, %v2483_v27, -1e+30  ;;  %7071 = vst [vmem:[#allocation27_spill] sm:$0xff] %v6370_v26  ;;  %v2279_v27 = vld [vmem:[#allocation6 + $0x88] sm:$0xff] }
 0x3f5   : > { %2515 = vmax.xlane.f32.xlu0 %v6278_v57 }
 0x3fe   : > { %v6281_v2 = vpop.f32.mrb[16].mxu0 }
 0x3ff   : > { %v6283_v52 = vpop.f32.mrb[17].mxu0 }
 0x400   : > { %v6285_v30 = vpop.f32.mrb[18].mxu0 }
 0x401   : > { %v6287_v50 = vpop.f32.mrb[19].mxu0 }
 0x402   : > { %2220 = vperm.xlu1 %4552, %v6182_v39  }
 0x406   : > { %2230 = vperm.xlu1 %4552, %v6197_v31  }
 0x40a   : > { %2240 = vperm.xlu1 %4552, %v6208_v36  }
 0x40b   : > { %2215 = vperm.xlu0 %4553, %v6177_v10  }
 0x40e   : > { %2250 = vperm.xlu1 %4552, %v6216_v38   ;;  %v6294_v0 = vpop.f32.mrb[20].mxu0 }
 0x40f   : > { %2225 = vperm.xlu0 %4553, %v6189_v22   ;;  %v6297_v13 = vpop.f32.mrb[21].mxu0  ;;  %v4578_v22 = vld [vmem:[%s6932_s2 + $0xc0] sm:$0xff]  }
 0x410   : > { %v6299_v51 = vpop.f32.mrb[22].mxu0  ;;  %4477 = vmatprep.subr.bf16.mxu1 %v4578_v22 }
 0x411   : > { %v6301_v1 = vpop.f32.mrb[23].mxu0  ;;  %4478 = vmatpush3.bf16.msra.mxu1 %v4578_v22  ;;  %v4581_v22 = vld [vmem:[%s6932_s2 + $0xd8] sm:$0xff]  }
 0x412   : > { %4479 = vmatprep.subr.bf16.mxu1 %v4579_v56 }
 0x413   : > { %2235 = vperm.xlu0 %4553, %v6204_v34  }
 0x415   : > { %4480 = vmatpush3.bf16.msra.mxu1 %v4579_v56  ;;  %v6387_v56 = vld [vmem:[#allocation2 + $0xf0] sm:$0xff] }
 0x416   : > { %v6304_v39 = vpop.f32.mrb[24].mxu0  ;;  %4481 = vmatprep.subr.bf16.mxu1 %v4580_v63  ;;  %7073 = vst [vmem:[#allocation17_spill] sm:$0xff] %v6387_v56 }
 0x417   : > { %2245 = vperm.xlu0 %4553, %v6212_v53   ;;  %v6307_v31 = vpop.f32.mrb[25].mxu0  ;;  %v6324_v53 = vld [vmem:[#allocation2 + $0xc0] sm:$0xff] }
 0x418   : > { %v6309_v10 = vpop.f32.mrb[26].mxu0 }
 0x419   : > { %v6311_v36 = vpop.f32.mrb[27].mxu0  ;;  %4482 = vmatpush3.bf16.msra.mxu1 %v4580_v63  ;;  %v4582_v63 = vld [vmem:[%s6932_s2 + $0xe0] sm:$0xff]  }
 0x41a   : > { %4483 = vmatprep.subr.bf16.mxu1 %v4581_v22 }
 0x41d   : > { %4484 = vmatpush3.bf16.msra.mxu1 %v4581_v22  ;;  %v6400_v22 = vld [vmem:[#allocation2 + $0xf8] sm:$0xff] }
 0x41e   : > { %v6316_v38 = vpop.f32.mrb[28].mxu0  ;;  %4485 = vmatprep.subr.bf16.mxu1 %v4582_v63  ;;  %7075 = vst [vmem:[#allocation29_spill] sm:$0xff] %v6400_v22 }
 0x41f   : > { %v6318_v48 = vpop.f32.mrb[29].mxu0 }
 0x420   : > { %v6320_v34 = vpop.f32.mrb[30].mxu0 }
 0x421   : > { %v6322_v11 = vpop.f32.mrb[31].mxu0  ;;  %4486 = vmatpush3.bf16.msra.mxu1 %v4582_v63  ;;  %v2208_v63 = vld [vmem:[#allocation5 + $0x98] sm:$0xff] }
 0x422   : > { %4487 = vmatprep.subr.bf16.mxu1 %v4583_v3 }
 0x425   : > { %4488 = vmatpush3.bf16.msra.mxu1 %v4583_v3  ;;  %v2205_v3 = vld [vmem:[#allocation5 + $0x80] sm:$0xff] }
 0x46a   : > { %v2502_v12 = vpop.xlane.xlu1 %2501 }
 0x46b   : > { %v6327_v5 = vmax.f32 %v6324_v53, %v2502_v12 }
 0x46d   : > { %3003 = vst.msk [vmem:[#allocation2 + $0xc0] sm:$0xff] %vm398_vm0, %v6327_v5  ;;  %2551 = vperm.xlu1 %4552, %v6327_v5  }
 0x46e   : > { %v2506_v59 = vpop.xlane.xlu1 %2505 }
 0x46f   : > { %v6337_v45 = vmax.f32 %v6329_v8, %v2506_v59 }
 0x471   : > { %3005 = vst.msk [vmem:[#allocation2 + $0xd0] sm:$0xff] %vm398_vm0, %v6337_v45  ;;  %2561 = vperm.xlu1 %4552, %v6337_v45  }
 0x472   : > { %v2504_v16 = vpop.xlane.xlu0 %2503 }
 0x473   : > { %v6350_v17 = vmax.f32 %v6339_v44, %v2504_v16 }
 0x475   : > { %3004 = vst.msk [vmem:[#allocation2 + $0xc8] sm:$0xff] %vm398_vm0, %v6350_v17  ;;  %2556 = vperm.xlu0 %4553, %v6350_v17  }
 0x476   : > { %v2510_v23 = vpop.xlane.xlu1 %2509  ;;  %v2508_v61 = vpop.xlane.xlu0 %2507 }
 0x477   : > { %v6365_v20 = vmax.f32 %v6352_v54, %v2510_v23  ;;  %v6368_v18 = vmax.f32 %v6354_v19, %v2508_v61 }
 0x479   : > { %7069 = vst [vmem:[#allocation21_spill] sm:$0xff] %v6365_v20  ;;  %7070 = vst [vmem:[#allocation23_spill] sm:$0xff] %v6368_v18  ;;  %2566 = vperm.xlu1 %4552, %v6368_v18  }
 0x47a   : > { %3007 = vst.msk [vmem:[#allocation2 + $0xe0] sm:$0xff] %vm398_vm0, %v6365_v20  ;;  %3006 = vst.msk [vmem:[#allocation2 + $0xd8] sm:$0xff] %vm398_vm0, %v6368_v18  ;;  %v2512_v12 = vpop.xlane.xlu0 %2511 }
 0x47b   : > { %v6385_v59 = vmax.f32 %v6370_v26, %v2512_v12  ;;  %v2206_v12 = vld [vmem:[#allocation5 + $0x88] sm:$0xff] }
 0x47d   : > { %7072 = vst [vmem:[#allocation28_spill] sm:$0xff] %v6385_v59  ;;  %3008 = vst.msk [vmem:[#allocation2 + $0xe8] sm:$0xff] %vm398_vm0, %v6385_v59  ;;  %2571 = vperm.xlu1 %4552, %v6365_v20   ;;  %v2281_v20 = vld [vmem:[#allocation6 + $0x98] sm:$0xff] }
 0x47e   : > { %v2514_v23 = vpop.xlane.xlu1 %2513 }
 0x47f   : > { %v6398_v61 = vmax.f32 %v6387_v56, %v2514_v23 }
 0x481   : > { %7074 = vst [vmem:[#allocation19_spill] sm:$0xff] %v6398_v61  ;;  %3009 = vst.msk [vmem:[#allocation2 + $0xf0] sm:$0xff] %vm398_vm0, %v6398_v61  ;;  %2576 = vperm.xlu1 %4552, %v6385_v59  }
 0x482   : > { %v2221_v23 = vpop.permute.xlu1 %2220  ;;  %v2516_v43 = vpop.xlane.xlu0 %2515 }
 0x483   : > { %v2254_v33 = vmul.f32 %v2221_v23, %v2206_v12  ;;  %v2287_v41 = vmul.f32 %v2279_v27, %v2221_v23  ;;  %v6411_v26 = vmax.f32 %v6400_v22, %v2516_v43  ;;  %v4584_v43 = vld [vmem:[%s6932_s2 + $0xf0] sm:$0xff]   ;;  %v2278_v12 = vld [vmem:[#allocation6 + $0x80] sm:$0xff] }
 0x484   : > { %4489 = vmatprep.subr.bf16.mxu1 %v4584_v43 }
 0x485   : > { %7076 = vst [vmem:[#allocation30_spill] sm:$0xff] %v6411_v26  ;;  %v2262_v16 = vadd.f32 %v2254_v33, %v6287_v50  ;;  %v2295_v56 = vadd.f32 %v2287_v41, %v6311_v36  ;;  %3010 = vst.msk [vmem:[#allocation2 + $0xf8] sm:$0xff] %vm398_vm0, %v6411_v26  ;;  %2581 = vperm.xlu1 %4552, %v6398_v61   ;;  %v2210_v36 = vld [vmem:[#allocation5 + $0xa8] sm:$0xff]  ;;  %4490 = vmatpush3.bf16.msra.mxu1 %v4584_v43  ;;  %v2212_v61 = vld [vmem:[#allocation5 + $0xb8] sm:$0xff] }
 0x486   : > { %v2231_v27 = vpop.permute.xlu1 %2230  ;;  %v2283_v41 = vld [vmem:[#allocation6 + $0xa8] sm:$0xff] }
 0x487   : > { %2270 = vst.msk [vmem:[#allocation5 + $0x88] sm:$0xff] %vm495_vm6, %v2262_v16  ;;  %2303 = vst.msk [vmem:[#allocation6 + $0x88] sm:$0xff] %vm495_vm6, %v2295_v56  ;;  %v2256_v50 = vmul.f32 %v2231_v27, %v2208_v63  ;;  %v2289_v33 = vmul.f32 %v2281_v20, %v2231_v27  ;;  %v4585_v16 = vld [vmem:[%s6932_s2 + $0xf8] sm:$0xff]  }
 0x488   : > { %4491 = vmatprep.subr.bf16.mxu1 %v4585_v16 }
 0x489   : > { %v2264_v23 = vadd.f32 %v6285_v30, %v2256_v50  ;;  %v2297_v59 = vadd.f32 %v6309_v10, %v2289_v33  ;;  %2586 = vperm.xlu1 %4552, %v6411_v26   ;;  %v2285_v30 = vld [vmem:[#allocation6 + $0xb8] sm:$0xff]  ;;  %v2207_v10 = vld [vmem:[#allocation5 + $0x90] sm:$0xff]  ;;  %4492 = vmatpush3.bf16.msra.mxu1 %v4585_v16 }
 0x48a   : > { %v2241_v22 = vpop.permute.xlu1 %2240  ;;  %v2216_v56 = vpop.permute.xlu0 %2215  ;;  %v2280_v50 = vld [vmem:[#allocation6 + $0x90] sm:$0xff] }
 0x48b   : > { %2272 = vst.msk [vmem:[#allocation5 + $0x98] sm:$0xff] %vm495_vm6, %v2264_v23  ;;  %2305 = vst.msk [vmem:[#allocation6 + $0x98] sm:$0xff] %vm495_vm6, %v2297_v59  ;;  %v2258_v20 = vmul.f32 %v2241_v22, %v2210_v36  ;;  %v2291_v63 = vmul.f32 %v2283_v41, %v2241_v22  ;;  %v2253_v27 = vmul.f32 %v2216_v56, %v2205_v3  ;;  %v2209_v3 = vld [vmem:[#allocation5 + $0xa0] sm:$0xff] }
 0x48c   : > { %v2286_v43 = vmul.f32 %v2278_v12, %v2216_v56 }
 0x48d   : > { %v2266_v33 = vadd.f32 %v2258_v20, %v6301_v1  ;;  %v2299_v26 = vadd.f32 %v2291_v63, %v6322_v11  ;;  %v2261_v54 = vadd.f32 %v2253_v27, %v6283_v52  ;;  %v2282_v11 = vld [vmem:[#allocation6 + $0xa0] sm:$0xff] }
 0x48e   : > { %v2294_v23 = vadd.f32 %v2286_v43, %v6307_v31  ;;  %v2251_v18 = vpop.permute.xlu1 %2250  ;;  %v2226_v59 = vpop.permute.xlu0 %2225 }
 0x48f   : > { %2274 = vst.msk [vmem:[#allocation5 + $0xa8] sm:$0xff] %vm495_vm6, %v2266_v33  ;;  %2307 = vst.msk [vmem:[#allocation6 + $0xa8] sm:$0xff] %vm495_vm6, %v2299_v26  ;;  %v2260_v22 = vmul.f32 %v2251_v18, %v2212_v61  ;;  %v2293_v36 = vmul.f32 %v2285_v30, %v2251_v18  ;;  %v2255_v41 = vmul.f32 %v2226_v59, %v2207_v10  ;;  %v2211_v26 = vld [vmem:[#allocation5 + $0xb0] sm:$0xff] }
 0x490   : > { %2269 = vst.msk [vmem:[#allocation5 + $0x80] sm:$0xff] %vm495_vm6, %v2261_v54  ;;  %2302 = vst.msk [vmem:[#allocation6 + $0x80] sm:$0xff] %vm495_vm6, %v2294_v23  ;;  %v2288_v1 = vmul.f32 %v2280_v50, %v2226_v59  ;;  %v2284_v61 = vld [vmem:[#allocation6 + $0xb0] sm:$0xff] }
 0x491   : > { %v2268_v52 = vadd.f32 %v6299_v51, %v2260_v22  ;;  %v2301_v31 = vadd.f32 %v6320_v34, %v2293_v36  ;;  %v2263_v12 = vadd.f32 %v6281_v2, %v2255_v41 }
 0x492   : > { %v2296_v16 = vadd.f32 %v6304_v39, %v2288_v1  ;;  %v2236_v56 = vpop.permute.xlu0 %2235 }
 0x493   : > { %2276 = vst.msk [vmem:[#allocation5 + $0xb8] sm:$0xff] %vm495_vm6, %v2268_v52  ;;  %2309 = vst.msk [vmem:[#allocation6 + $0xb8] sm:$0xff] %vm495_vm6, %v2301_v31  ;;  %v2257_v54 = vmul.f32 %v2236_v56, %v2209_v3  ;;  %v2290_v18 = vmul.f32 %v2282_v11, %v2236_v56 }
 0x494   : > { %2271 = vst.msk [vmem:[#allocation5 + $0x90] sm:$0xff] %vm495_vm6, %v2263_v12  ;;  %2304 = vst.msk [vmem:[#allocation6 + $0x90] sm:$0xff] %vm495_vm6, %v2296_v16 }
 0x495   : > { %v2265_v51 = vadd.f32 %v2257_v54, %v6297_v13  ;;  %v2298_v34 = vadd.f32 %v2290_v18, %v6318_v48 }
 0x496   : > { %v2246_v2 = vpop.permute.xlu0 %2245 }
 0x497   : > { %2273 = vst.msk [vmem:[#allocation5 + $0xa0] sm:$0xff] %vm495_vm6, %v2265_v51  ;;  %2306 = vst.msk [vmem:[#allocation6 + $0xa0] sm:$0xff] %vm495_vm6, %v2298_v34  ;;  %v2259_v39 = vmul.f32 %v2246_v2, %v2211_v26  ;;  %v2292_v20 = vmul.f32 %v2284_v61, %v2246_v2 }
 0x499   : > { %v2267_v63 = vadd.f32 %v6294_v0, %v2259_v39  ;;  %v2300_v27 = vadd.f32 %v6316_v38, %v2292_v20 }
 0x49b   : > { %2275 = vst.msk [vmem:[#allocation5 + $0xb0] sm:$0xff] %vm495_vm6, %v2267_v63  ;;  %2308 = vst.msk [vmem:[#allocation6 + $0xb0] sm:$0xff] %vm495_vm6, %v2300_v27 }
 0x4ec   : > { %v2552_v43 = vpop.permute.xlu1 %2551 }
 0x4ed   : > { %v2589_v13 = vsub.f32 %v6243_v60, %v2552_v43 }
 0x4ef   : > { %v2597_v30 = vmul.f32 1.442695, %v2589_v13 }
 0x4f0   : > { %v2562_v48 = vpop.permute.xlu1 %2561 }
 0x4f1   : > { %4682 = vpow2.f32 %v2597_v30  ;;  %v2591_v10 = vsub.f32 %v6248_v24, %v2562_v48 }
 0x4f3   : > { %v2601_v23 = vmul.f32 1.442695, %v2591_v10 }
 0x4f4   : > { %v2557_v50 = vpop.permute.xlu0 %2556 }
 0x4f5   : > { %v2590_v33 = vsub.f32 %v6253_v4, %v2557_v50 }
 0x4f7   : > { %v2599_v59 = vmul.f32 1.442695, %v2590_v33  ;;  %v7080_v33 = vld [vmem:[#allocation23_spill] sm:$0xff] }
 0x4f8   : > { %v2567_v0 = vpop.permute.xlu1 %2566 }
 0x4f9   : > { %4684 = vpow2.f32 %v2599_v59  ;;  %v2592_v38 = vsub.f32 %v6262_v62, %v2567_v0  ;;  %v7082_v59 = vld [vmem:[#allocation26_spill] sm:$0xff]  ;;  %v7083_v0 = vld [vmem:[#allocation21_spill] sm:$0xff] }
 0x4fa   : > { %4686 = vpow2.f32 %v2601_v23 }
 0x4fb   : > { %v4683_v22 = vpop.eup %4682  ;;  %v2603_v36 = vmul.f32 1.442695, %v2592_v38  ;;  %v7085_v38 = vld [vmem:[#allocation27_spill] sm:$0xff] }
 0x4fc   : > { %v2572_v41 = vpop.permute.xlu1 %2571  ;;  %v2613_v60 = vmul.f32 %v4683_v22, %v7045_v7  ;;  %v2621_v27 = vmul.f32 %v4683_v22, %v5717_v55  ;;  %v7086_v22 = vld [vmem:[#allocation28_spill] sm:$0xff] }
 0x4fd   : > { %4688 = vpow2.f32 %v2603_v36  ;;  %v2593_v1 = vsub.f32 %v6258_v40, %v2572_v41  ;;  %v3016_v36 = vld [vmem:[#allocation3 + $0x8] sm:$0xff]  ;;  %v3015_v41 = vld [vmem:[#allocation3] sm:$0xff] }
 0x4fe   : > { %2922 = vadd.xlane.f32.xlu1 %v2613_v60  ;;  %vm3032_vm9 = vcmp.gt.f32.partialorder %v3016_v36, 0.0  ;;  %vm3031_vm11 = vcmp.gt.f32.partialorder %v3015_v41, 0.0 }
 0x4ff   : > { %v2605_v24 = vmul.f32 1.442695, %v2593_v1 }
 0x500   : > { %v2577_v3 = vpop.permute.xlu1 %2576 }
 0x501   : > { %4690 = vpow2.f32 %v2605_v24  ;;  %v2594_v4 = vsub.f32 %v6268_v9, %v2577_v3  ;;  %v7092_v24 = vld [vmem:[#allocation30_spill] sm:$0xff] }
 0x503   : > { %v4685_v11 = vpop.eup %4684  ;;  %v2607_v52 = vmul.f32 1.442695, %v2594_v4 }
 0x504   : > { %v2582_v31 = vpop.permute.xlu1 %2581  ;;  %v2614_v62 = vmul.f32 %v4685_v11, %v5672_v15  ;;  %v4687_v12 = vpop.eup %4686  ;;  %v2622_v20 = vmul.f32 %v4685_v11, %v5706_v6 }
 0x505   : > { %4692 = vpow2.f32 %v2607_v52  ;;  %v2595_v16 = vsub.f32 %v6273_v35, %v2582_v31  ;;  %v2615_v26 = vmul.f32 %v4687_v12, %v5668_v49  ;;  %v3017_v31 = vld [vmem:[#allocation3 + $0x10] sm:$0xff] }
 0x506   : > { %2924 = vadd.xlane.f32.xlu0 %v2614_v62  ;;  %v2629_v7 = vpack.c.bf16 %v2614_v62, %v2613_v60  ;;  %v2633_v43 = vpack.c.bf16 %v2622_v20, %v2621_v27  ;;  %v3018_v62 = vld [vmem:[#allocation3 + $0x18] sm:$0xff]  ;;  %vm3033_vm13 = vcmp.gt.f32.partialorder %v3017_v31, 0.0 }
 0x507   : > { %v4689_v56 = vpop.eup %4688  ;;  %v2609_v54 = vmul.f32 1.442695, %v2595_v16  ;;  %vm3034_vm2 = vcmp.gt.f32.partialorder %v3018_v62, 0.0 }
 0x508   : > { %v2587_v40 = vpop.permute.xlu1 %2586  ;;  %4493 = vmatprep.mubr.bf16.mxu1 %v2629_v7  ;;  %v2616_v18 = vmul.f32 %v4689_v56, %v5678_v42  ;;  %v3039_v7 = vsel %vm3031_vm11, %v3015_v41, 1.0 }
 0x509   : > { %4694 = vpow2.f32 %v2609_v54  ;;  %v2596_v9 = vsub.f32 %v6278_v57, %v2587_v40  ;;  %v3019_v54 = vld [vmem:[#allocation3 + $0x20] sm:$0xff]  ;;  %v3020_v40 = vld [vmem:[#allocation3 + $0x28] sm:$0xff] }
 0x50a   : > { %2928 = vadd.xlane.f32.xlu1 %v2616_v18  ;;  %v2630_v61 = vpack.c.bf16 %v2616_v18, %v2615_v26  ;;  %2926 = vadd.xlane.f32.xlu0 %v2615_v26  ;;  %v3041_v18 = vsel %vm3033_vm13, %v3017_v31, 1.0  ;;  %vm3035_vm8 = vcmp.gt.f32.partialorder %v3019_v54, 0.0  ;;  %vm3036_vm10 = vcmp.gt.f32.partialorder %v3020_v40, 0.0 }
 0x50b   : > { %v4691_v15 = vpop.eup %4690  ;;  %v2611_v51 = vmul.f32 1.442695, %v2596_v9  ;;  %v3042_v9 = vsel %vm3034_vm2, %v3018_v62, 1.0 }
 0x50c   : > { %4494 = vmatmul.mubr.bf16.vlgmr.msra.gmra.mrb[16].mxu1 %v2630_v61  ;;  %v2617_v35 = vmul.f32 %v4691_v15, %v5682_v25  ;;  %v2625_v6 = vmul.f32 %v4691_v15, %v5741_v58  ;;  %v7078_v58 = vsub.f32 %v6339_v44, %v6350_v17  ;;  %v7087_v44 = vsub.f32 %v7085_v38, %v7086_v22  ;;  %v3021_v15 = vld [vmem:[#allocation3 + $0x30] sm:$0xff]  ;;  %v3194_v22 = vld [vmem:[#allocation3 + $0x58] sm:$0xff] }
 0x50d   : > { %4696 = vpow2.f32 %v2611_v51  ;;  %v3022_v51 = vld [vmem:[#allocation3 + $0x38] sm:$0xff]  ;;  %vm3037_vm12 = vcmp.gt.f32.partialorder %v3021_v15, 0.0  ;;  %v3193_v38 = vld [vmem:[#allocation3 + $0x50] sm:$0xff] }
 0x50e   : > { %2930 = vadd.xlane.f32.xlu0 %v2617_v35  ;;  %v2535_v10 = vmul.f32 1.442695, %v7078_v58  ;;  %v2543_v17 = vmul.f32 1.442695, %v7087_v44  ;;  %vm3038_vm14 = vcmp.gt.f32.partialorder %v3022_v51, 0.0  ;;  %v3030_v58 = vld [vmem:[#allocation4 + $0x38] sm:$0xff] }
 0x50f   : > { %v4693_v34 = vpop.eup %4692  ;;  %vm3062_vm11 = vcmp.gt.f32.partialorder %v3030_v58, 0.0 }
 0x510   : > { %v2618_v2 = vmul.f32 %v4693_v34, %v5695_v28  ;;  %v2623_v28 = vmul.f32 %v4687_v12, %v5724_v37  ;;  %v2626_v13 = vmul.f32 %v4693_v34, %v5735_v46  ;;  %v3040_v12 = vsel %vm3032_vm9, %v3016_v36, 1.0 }
 0x512   : > { %2932 = vadd.xlane.f32.xlu1 %v2618_v2  ;;  %v2631_v42 = vpack.c.bf16 %v2618_v2, %v2617_v35  ;;  %v2635_v55 = vpack.c.bf16 %v2626_v13, %v2625_v6  ;;  %v3043_v35 = vsel %vm3035_vm8, %v3019_v54, 1.0  ;;  %v3044_v2 = vsel %vm3036_vm10, %v3020_v40, 1.0  ;;  %v3199_v54 = vld [vmem:[#allocation4 + $0x40] sm:$0xff]  ;;  %v3200_v40 = vld [vmem:[#allocation4 + $0x48] sm:$0xff] }
 0x513   : > { %v4695_v39 = vpop.eup %4694  ;;  %vm3209_vm8 = vcmp.gt.f32.partialorder %v3193_v38, 0.0  ;;  %vm3210_vm10 = vcmp.gt.f32.partialorder %v3194_v22, 0.0 }
 0x514   : > { %4497 = vmatprep.mubr.bf16.mxu1 %v2631_v42  ;;  %v2619_v49 = vmul.f32 %v4695_v39, %v5702_v47  ;;  %v2624_v47 = vmul.f32 %v4689_v56, %v5730_v21  ;;  %v2627_v30 = vmul.f32 %v4695_v39, %v5754_v29  ;;  %v7077_v21 = vsub.f32 %v6324_v53, %v6327_v5  ;;  %v3023_v39 = vld [vmem:[#allocation4] sm:$0xff] }
 0x515   : > { %v7079_v29 = vsub.f32 %v6329_v8, %v6337_v45  ;;  %v7084_v53 = vsub.f32 %v7082_v59, %v7083_v0  ;;  %v7088_v8 = vld [vmem:[#allocation17_spill] sm:$0xff]  ;;  %v7089_v45 = vld [vmem:[#allocation19_spill] sm:$0xff]  ;;  %vm3055_vm15 = vcmp.gt.f32.partialorder %v3023_v39, 0.0 }
 0x516   : > { %2934 = vadd.xlane.f32.xlu0 %v2619_v49  ;;  %v2533_v46 = vmul.f32 1.442695, %v7077_v21  ;;  %v7090_v60 = vsub.f32 %v7088_v8, %v7089_v45  ;;  %v3195_v8 = vld [vmem:[#allocation3 + $0x60] sm:$0xff]  ;;  %v3196_v45 = vld [vmem:[#allocation3 + $0x68] sm:$0xff] }
 0x517   : > { %v4697_v57 = vpop.eup %4696  ;;  %v2537_v50 = vmul.f32 1.442695, %v7079_v29  ;;  %v2541_v5 = vmul.f32 1.442695, %v7084_v53  ;;  %v3070_v53 = vsel %vm3062_vm11, %v3030_v58, 1.0 }
 0x518   : > { %v2620_v63 = vmul.f32 %v4697_v57, %v5711_v32  ;;  %v2634_v32 = vpack.c.bf16 %v2624_v47, %v2623_v28  ;;  %v2628_v37 = vmul.f32 %v4697_v57, %v5756_v14  ;;  %4698 = vpow2.f32 %v2533_v46  ;;  %v3029_v46 = vld [vmem:[#allocation4 + $0x30] sm:$0xff] }
 0x519   : > { %4700 = vpow2.f32 %v2535_v10  ;;  %v7081_v14 = vsub.f32 %v6354_v19, %v7080_v33  ;;  %v2545_v1 = vmul.f32 1.442695, %v7090_v60  ;;  %v7091_v19 = vld [vmem:[#allocation29_spill] sm:$0xff]  ;;  %v3045_v57 = vsel %vm3037_vm12, %v3021_v15, 1.0 }
 0x51a   : > { %2936 = vadd.xlane.f32.xlu1 %v2620_v63  ;;  %2971 = vadd.xlane.f32.xlu0 %v2621_v27  ;;  %v2632_v25 = vpack.c.bf16 %v2620_v63, %v2619_v49  ;;  %v2636_v48 = vpack.c.bf16 %v2628_v37, %v2627_v30  ;;  %4702 = vpow2.f32 %v2537_v50  ;;  %v7093_v3 = vsub.f32 %v7091_v19, %v7092_v24  ;;  %v3024_v49 = vld [vmem:[#allocation4 + $0x8] sm:$0xff] }
 0x51b   : > { %v2539_v23 = vmul.f32 1.442695, %v7081_v14  ;;  %v3046_v63 = vsel %vm3038_vm14, %v3022_v51, 1.0  ;;  %vm3056_vm1 = vcmp.gt.f32.partialorder %v3024_v49, 0.0  ;;  %vm3061_vm9 = vcmp.gt.f32.partialorder %v3029_v46, 0.0  ;;  %v3191_v14 = vld [vmem:[#allocation3 + $0x40] sm:$0xff] }
 0x51c   : > { %4498 = vmatmul.mubr.bf16.gmra.mrb[20].mxu1 %v2632_v25  ;;  %v2547_v4 = vmul.f32 1.442695, %v7093_v3  ;;  %v3025_v25 = vld [vmem:[#allocation4 + $0x10] sm:$0xff]  ;;  %v3069_v59 = vsel %vm3061_vm9, %v3029_v46, 1.0  ;;  %vm3207_vm13 = vcmp.gt.f32.partialorder %v3191_v14, 0.0  ;;  %v3217_v60 = vsel %vm3209_vm8, %v3193_v38, 1.0 }
 0x51d   : > { %4501 = vmatprep.mubr.bf16.mxu1 %v2633_v43  ;;  %4704 = vpow2.f32 %v2539_v23  ;;  %v3026_v43 = vld [vmem:[#allocation4 + $0x18] sm:$0xff]  ;;  %vm3057_vm3 = vcmp.gt.f32.partialorder %v3025_v25, 0.0  ;;  %v3192_v23 = vld [vmem:[#allocation3 + $0x48] sm:$0xff]  ;;  %v3215_v44 = vsel %vm3207_vm13, %v3191_v14, 1.0  ;;  %v3218_v19 = vsel %vm3210_vm10, %v3194_v22, 1.0  ;;  %v3197_v3 = vld [vmem:[#allocation3 + $0x70] sm:$0xff] }
 0x51e   : > { %2973 = vadd.xlane.f32.xlu1 %v2622_v20  ;;  %2975 = vadd.xlane.f32.xlu0 %v2623_v28  ;;  %4706 = vpow2.f32 %v2541_v5  ;;  %v3063_v28 = vsel %vm3055_vm15, %v3023_v39, 1.0  ;;  %vm3058_vm4 = vcmp.gt.f32.partialorder %v3026_v43, 0.0  ;;  %vm3208_vm2 = vcmp.gt.f32.partialorder %v3192_v23, 0.0 }
 0x51f   : > { %4708 = vpow2.f32 %v2543_v17  ;;  %v3216_v36 = vsel %vm3208_vm2, %v3192_v23, 1.0  ;;  %vm3211_vm12 = vcmp.gt.f32.partialorder %v3195_v8, 0.0  ;;  %vm3212_vm14 = vcmp.gt.f32.partialorder %v3196_v45, 0.0 }
 0x520   : > { %4710 = vpow2.f32 %v2545_v1  ;;  %v3219_v31 = vsel %vm3211_vm12, %v3195_v8, 1.0  ;;  %vm3213_vm15 = vcmp.gt.f32.partialorder %v3197_v3, 0.0 }
 0x521   : > { %4712 = vpow2.f32 %v2547_v4  ;;  %v3198_v4 = vld [vmem:[#allocation3 + $0x78] sm:$0xff] }
 0x522   : > { %2977 = vadd.xlane.f32.xlu1 %v2624_v47  ;;  %2979 = vadd.xlane.f32.xlu0 %v2625_v6  ;;  %v6505_v11 = vpop.eup %4698  ;;  %4714 = vrcp.f32 %v3040_v12  ;;  %v3220_v12 = vsel %vm3212_vm14, %v3196_v45, 1.0 }
 0x523   : > { %v6507_v52 = vpop.eup %4700  ;;  %4716 = vrcp.f32 %v3039_v7 }
 0x524   : > { %4502 = vmatmul.mubr.bf16.gmra.mrb[24].mxu1 %v2634_v32  ;;  %v6511_v16 = vpop.eup %4702  ;;  %4718 = vrcp.f32 %v3041_v18  ;;  %v3027_v32 = vld [vmem:[#allocation4 + $0x20] sm:$0xff]  ;;  %v3221_v18 = vsel %vm3213_vm15, %v3197_v3, 1.0  ;;  %v3376_v3 = vld [vmem:[#allocation4 + $0x88] sm:$0xff] }
 0x525   : > { %4505 = vmatprep.mubr.bf16.mxu1 %v2635_v55  ;;  %4720 = vrcp.f32 %v3042_v9  ;;  %v3028_v55 = vld [vmem:[#allocation4 + $0x28] sm:$0xff]  ;;  %vm3059_vm5 = vcmp.gt.f32.partialorder %v3027_v32, 0.0 }
 0x526   : > { %2981 = vadd.xlane.f32.xlu1 %v2626_v13  ;;  %2983 = vadd.xlane.f32.xlu0 %v2627_v30  ;;  %4722 = vrcp.f32 %v3043_v35  ;;  %v3064_v13 = vsel %vm3056_vm1, %v3024_v49, 1.0  ;;  %v3065_v30 = vsel %vm3057_vm3, %v3025_v25, 1.0  ;;  %vm3060_vm7 = vcmp.gt.f32.partialorder %v3028_v55, 0.0  ;;  %v3201_v35 = vld [vmem:[#allocation4 + $0x50] sm:$0xff] }
 0x527   : > { %v6513_v56 = vpop.eup %4704  ;;  %4724 = vrcp.f32 %v3044_v2  ;;  %v3067_v10 = vsel %vm3059_vm5, %v3027_v32, 1.0  ;;  %v3068_v50 = vsel %vm3060_vm7, %v3028_v55, 1.0  ;;  %vm3214_vm1 = vcmp.gt.f32.partialorder %v3198_v4, 0.0  ;;  %v3202_v2 = vld [vmem:[#allocation4 + $0x58] sm:$0xff] }
 0x528   : > { %v6517_v26 = vpop.eup %4706  ;;  %4726 = vrcp.f32 %v3045_v57  ;;  %v3222_v15 = vsel %vm3214_vm1, %v3198_v4, 1.0  ;;  %vm3231_vm3 = vcmp.gt.f32.partialorder %v3199_v54, 0.0  ;;  %vm3233_vm5 = vcmp.gt.f32.partialorder %v3201_v35, 0.0 }
 0x529   : > { %v6519_v61 = vpop.eup %4708  ;;  %4728 = vrcp.f32 %v3046_v63  ;;  %v3239_v39 = vsel %vm3231_vm3, %v3199_v54, 1.0  ;;  %vm3234_vm7 = vcmp.gt.f32.partialorder %v3202_v2, 0.0  ;;  %v3203_v63 = vld [vmem:[#allocation4 + $0x60] sm:$0xff]  ;;  %v3241_v25 = vsel %vm3233_vm5, %v3201_v35, 1.0  ;;  %v3377_v54 = vld [vmem:[#allocation4 + $0x90] sm:$0xff] }
 0x52a   : > { %2985 = vadd.xlane.f32.xlu1 %v2628_v37  ;;  %v6523_v34 = vpop.eup %4710  ;;  %4730 = vrcp.f32 %v3063_v28  ;;  %v3242_v28 = vsel %vm3234_vm7, %v3202_v2, 1.0  ;;  %vm3235_vm9 = vcmp.gt.f32.partialorder %v3203_v63, 0.0  ;;  %vm3408_vm7 = vcmp.gt.f32.partialorder %v3376_v3, 0.0 }
 0x52b   : > { %v6525_v42 = vpop.eup %4712  ;;  %4732 = vrcp.f32 %v3064_v13  ;;  %v3205_v13 = vld [vmem:[#allocation4 + $0x70] sm:$0xff]  ;;  %v3243_v32 = vsel %vm3235_vm9, %v3203_v63, 1.0  ;;  %vm3409_vm9 = vcmp.gt.f32.partialorder %v3377_v54, 0.0  ;;  %v3416_v35 = vsel %vm3408_vm7, %v3376_v3, 1.0 }
 0x52c   : > { %4506 = vmatmul.mubr.bf16.gmra.mrb[28].mxu1 %v2636_v48  ;;  %v4715_v20 = vpop.eup %4714  ;;  %v3066_v48 = vsel %vm3058_vm4, %v3026_v43, 1.0  ;;  %4734 = vrcp.f32 %v3065_v30  ;;  %vm3232_vm4 = vcmp.gt.f32.partialorder %v3200_v40, 0.0  ;;  %vm3237_vm13 = vcmp.gt.f32.partialorder %v3205_v13, 0.0 }
 0x52d   : > { %v4717_v27 = vpop.eup %4716  ;;  %4736 = vrcp.f32 %v3066_v48  ;;  %v3240_v57 = vsel %vm3232_vm4, %v3200_v40, 1.0  ;;  %v3367_v48 = vld [vmem:[#allocation3 + $0x80] sm:$0xff]  ;;  %v3245_v46 = vsel %vm3237_vm13, %v3205_v13, 1.0  ;;  %v2909_v13 = vld [vmem:[#allocation3 + $0xd8] sm:$0xff] }
 0x52e   : > { %v4719_v47 = vpop.eup %4718  ;;  %4738 = vrcp.f32 %v3067_v10  ;;  %vm3383_vm8 = vcmp.gt.f32.partialorder %v3367_v48, 0.0 }
 0x52f   : > { %v4721_v6 = vpop.eup %4720  ;;  %4740 = vrcp.f32 %v3068_v50  ;;  %v3369_v50 = vld [vmem:[#allocation3 + $0x90] sm:$0xff]  ;;  %v3391_v14 = vsel %vm3383_vm8, %v3367_v48, 1.0 }
 0x530   : > { %v4723_v37 = vpop.eup %4722  ;;  %4742 = vrcp.f32 %v3069_v59  ;;  %vm3385_vm12 = vcmp.gt.f32.partialorder %v3369_v50, 0.0 }
 0x531   : > { %v4725_v21 = vpop.eup %4724  ;;  %4744 = vrcp.f32 %v3070_v53  ;;  %v3371_v53 = vld [vmem:[#allocation3 + $0xa0] sm:$0xff]  ;;  %v3393_v38 = vsel %vm3385_vm12, %v3369_v50, 1.0 }
 0x532   : > { %v4727_v29 = vpop.eup %4726  ;;  %4746 = vrcp.f32 %v3215_v44  ;;  %vm3387_vm15 = vcmp.gt.f32.partialorder %v3371_v53, 0.0 }
 0x533   : > { %v4729_v33 = vpop.eup %4728  ;;  %4748 = vrcp.f32 %v3216_v36  ;;  %v3373_v36 = vld [vmem:[#allocation3 + $0xb0] sm:$0xff]  ;;  %v3395_v8 = vsel %vm3387_vm15, %v3371_v53, 1.0 }
 0x534   : > { %v4731_v0 = vpop.eup %4730  ;;  %4750 = vrcp.f32 %v3217_v60  ;;  %vm3389_vm3 = vcmp.gt.f32.partialorder %v3373_v36, 0.0 }
 0x535   : > { %v4733_v5 = vpop.eup %4732  ;;  %4752 = vrcp.f32 %v3218_v19  ;;  %v3375_v19 = vld [vmem:[#allocation4 + $0x80] sm:$0xff]  ;;  %v3397_v4 = vsel %vm3389_vm3, %v3373_v36, 1.0 }
 0x536   : > { %v4735_v17 = vpop.eup %4734  ;;  %4754 = vrcp.f32 %v3219_v31  ;;  %vm3407_vm5 = vcmp.gt.f32.partialorder %v3375_v19, 0.0 }
 0x537   : > { %v4737_v41 = vpop.eup %4736  ;;  %4756 = vrcp.f32 %v3220_v12 }
 0x538   : > { %v4739_v1 = vpop.eup %4738  ;;  %4758 = vrcp.f32 %v3221_v18  ;;  %v3378_v18 = vld [vmem:[#allocation4 + $0x98] sm:$0xff] }
 0x539   : > { %v4741_v24 = vpop.eup %4740  ;;  %4760 = vrcp.f32 %v3222_v15  ;;  %v3415_v15 = vsel %vm3407_vm5, %v3375_v19, 1.0 }
 0x53a   : > { %v4743_v62 = vpop.eup %4742  ;;  %4762 = vrcp.f32 %v3239_v39  ;;  %v3379_v39 = vld [vmem:[#allocation4 + $0xa0] sm:$0xff] }
 0x53b   : > { %2810 = vperm.xlu1 %4552, %v6505_v11   ;;  %v4745_v7 = vpop.eup %4744  ;;  %4764 = vrcp.f32 %v3240_v57  ;;  %v3380_v57 = vld [vmem:[#allocation4 + $0xa8] sm:$0xff]  ;;  %vm3411_vm13 = vcmp.gt.f32.partialorder %v3379_v39, 0.0 }
 0x53c   : > { %2815 = vperm.xlu0 %4553, %v6507_v52   ;;  %v4747_v9 = vpop.eup %4746  ;;  %4766 = vrcp.f32 %v3241_v25 }
 0x53d   : > { %v4749_v51 = vpop.eup %4748  ;;  %4768 = vrcp.f32 %v3242_v28  ;;  %v3381_v28 = vld [vmem:[#allocation4 + $0xb0] sm:$0xff] }
 0x53e   : > { %v4751_v49 = vpop.eup %4750  ;;  %4770 = vrcp.f32 %v3243_v32  ;;  %v3382_v32 = vld [vmem:[#allocation4 + $0xb8] sm:$0xff]  ;;  %vm3413_vm8 = vcmp.gt.f32.partialorder %v3381_v28, 0.0 }
 0x53f   : > { %2820 = vperm.xlu1 %4552, %v6511_v16  }
 0x540   : > { %2825 = vperm.xlu0 %4553, %v6513_v56  }
 0x543   : > { %2830 = vperm.xlu1 %4552, %v6517_v26  }
 0x544   : > { %2835 = vperm.xlu0 %4553, %v6519_v61  }
 0x547   : > { %2840 = vperm.xlu1 %4552, %v6523_v34  }
 0x548   : > { %2845 = vperm.xlu0 %4553, %v6525_v42  }
 0x54b   : > { %3094 = vperm.xlu1 %4552, %v4715_v20   ;;  %v4753_v20 = vpop.eup %4752 }
 0x54c   : > { %3089 = vperm.xlu0 %4553, %v4717_v27   ;;  %v3204_v27 = vld [vmem:[#allocation4 + $0x68] sm:$0xff]  ;;  %v4755_v43 = vpop.eup %4754 }
 0x54d   : > { %vm3236_vm11 = vcmp.gt.f32.partialorder %v3204_v27, 0.0 }
 0x54e   : > { %v3244_v30 = vsel %vm3236_vm11, %v3204_v27, 1.0  ;;  %vm3410_vm11 = vcmp.gt.f32.partialorder %v3378_v18, 0.0 }
 0x54f   : > { %3099 = vperm.xlu1 %4552, %v4719_v47   ;;  %v4757_v47 = vpop.eup %4756  ;;  %4772 = vrcp.f32 %v3244_v30  ;;  %v3418_v27 = vsel %vm3410_vm11, %v3378_v18, 1.0  ;;  %v3419_v30 = vsel %vm3411_vm13, %v3379_v39, 1.0 }
 0x550   : > { %3104 = vperm.xlu0 %4553, %v4721_v6   ;;  %v3206_v6 = vld [vmem:[#allocation4 + $0x78] sm:$0xff]  ;;  %v4759_v55 = vpop.eup %4758  ;;  %4774 = vrcp.f32 %v3245_v46  ;;  %v2917_v46 = vmul.f32 %v6513_v56, %v2909_v13 }
 0x551   : > { %vm3238_vm2 = vcmp.gt.f32.partialorder %v3206_v6, 0.0 }
 0x552   : > { %v3246_v10 = vsel %vm3238_vm2, %v3206_v6, 1.0  ;;  %vm3412_vm2 = vcmp.gt.f32.partialorder %v3380_v57, 0.0  ;;  %v2908_v6 = vld [vmem:[#allocation3 + $0xd0] sm:$0xff] }
 0x553   : > { %3109 = vperm.xlu1 %4552, %v4723_v37   ;;  %v4761_v37 = vpop.eup %4760  ;;  %4776 = vrcp.f32 %v3246_v10  ;;  %v3420_v48 = vsel %vm3412_vm2, %v3380_v57, 1.0 }
 0x554   : > { %3114 = vperm.xlu0 %4553, %v4725_v21   ;;  %v3368_v21 = vld [vmem:[#allocation3 + $0x88] sm:$0xff]  ;;  %v4763_v58 = vpop.eup %4762  ;;  %4778 = vrcp.f32 %v3391_v14 }
 0x555   : > { %vm3384_vm10 = vcmp.gt.f32.partialorder %v3368_v21, 0.0 }
 0x556   : > { %v3392_v59 = vsel %vm3384_vm10, %v3368_v21, 1.0  ;;  %vm3414_vm10 = vcmp.gt.f32.partialorder %v3382_v32, 0.0 }
 0x557   : > { %3119 = vperm.xlu1 %4552, %v4727_v29   ;;  %v4765_v29 = vpop.eup %4764  ;;  %4780 = vrcp.f32 %v3392_v59  ;;  %v3421_v59 = vsel %vm3413_vm8, %v3381_v28, 1.0  ;;  %v3422_v53 = vsel %vm3414_vm10, %v3382_v32, 1.0 }
 0x558   : > { %3124 = vperm.xlu0 %4553, %v4729_v33   ;;  %v3370_v33 = vld [vmem:[#allocation3 + $0x98] sm:$0xff]  ;;  %v4767_v23 = vpop.eup %4766  ;;  %4782 = vrcp.f32 %v3393_v38 }
 0x559   : > { %vm3386_vm14 = vcmp.gt.f32.partialorder %v3370_v33, 0.0 }
 0x55a   : > { %v3394_v44 = vsel %vm3386_vm14, %v3370_v33, 1.0  ;;  %v2910_v33 = vld [vmem:[#allocation3 + $0xe0] sm:$0xff] }
 0x55b   : > { %3145 = vperm.xlu1 %4552, %v4731_v0   ;;  %v4769_v0 = vpop.eup %4768  ;;  %4784 = vrcp.f32 %v3394_v44  ;;  %v2911_v44 = vld [vmem:[#allocation3 + $0xe8] sm:$0xff] }
 0x55c   : > { %3150 = vperm.xlu0 %4553, %v4733_v5   ;;  %v3372_v5 = vld [vmem:[#allocation3 + $0xa8] sm:$0xff]  ;;  %v4771_v22 = vpop.eup %4770  ;;  %4786 = vrcp.f32 %v3395_v8 }
 0x55d   : > { %vm3388_vm1 = vcmp.gt.f32.partialorder %v3372_v5, 0.0 }
 0x55e   : > { %v3396_v60 = vsel %vm3388_vm1, %v3372_v5, 1.0  ;;  %v2918_v5 = vmul.f32 %v6517_v26, %v2910_v33 }
 0x55f   : > { %3155 = vperm.xlu1 %4552, %v4735_v17   ;;  %v4773_v17 = vpop.eup %4772  ;;  %4788 = vrcp.f32 %v3396_v60 }
 0x560   : > { %3160 = vperm.xlu0 %4553, %v4737_v41   ;;  %v3374_v41 = vld [vmem:[#allocation3 + $0xb8] sm:$0xff]  ;;  %v4775_v45 = vpop.eup %4774  ;;  %4790 = vrcp.f32 %v3397_v4 }
 0x561   : > { %vm3390_vm4 = vcmp.gt.f32.partialorder %v3374_v41, 0.0 }
 0x563   : > { %3165 = vperm.xlu1 %4552, %v4739_v1   ;;  %v4777_v1 = vpop.eup %4776 }
 0x564   : > { %3170 = vperm.xlu0 %4553, %v4741_v24   ;;  %v2906_v24 = vld [vmem:[#allocation3 + $0xc0] sm:$0xff]  ;;  %v4779_v31 = vpop.eup %4778 }
 0x565   : > { %v2914_v12 = vmul.f32 %v6505_v11, %v2906_v24  ;;  %v2912_v24 = vld [vmem:[#allocation3 + $0xf0] sm:$0xff] }
 0x567   : > { %3175 = vperm.xlu1 %4552, %v4743_v62   ;;  %v3398_v62 = vsel %vm3390_vm4, %v3374_v41, 1.0 }
 0x568   : > { %3180 = vperm.xlu0 %4553, %v4745_v7   ;;  %v4781_v7 = vpop.eup %4780  ;;  %4792 = vrcp.f32 %v3398_v62 }
 0x569   : > { %4794 = vrcp.f32 %v3415_v15  ;;  %v2955_v15 = vld [vmem:[#allocation4 + $0xc0] sm:$0xff] }
 0x56a   : > { %4796 = vrcp.f32 %v3416_v35 }
 0x56b   : > { %3265 = vperm.xlu1 %4552, %v4747_v9  }
 0x56c   : > { %3270 = vperm.xlu0 %4553, %v4749_v51   ;;  %v4783_v51 = vpop.eup %4782 }
 0x56d   : > { %v4785_v2 = vpop.eup %4784 }
 0x56e   : > { %v4787_v63 = vpop.eup %4786 }
 0x56f   : > { %3275 = vperm.xlu1 %4552, %v4751_v49   ;;  %v2907_v49 = vld [vmem:[#allocation3 + $0xc8] sm:$0xff] }
 0x570   : > { %3280 = vperm.xlu0 %4553, %v4753_v20   ;;  %v3417_v20 = vsel %vm3409_vm9, %v3377_v54, 1.0  ;;  %v2915_v25 = vmul.f32 %v6507_v52, %v2907_v49  ;;  %v2963_v49 = vmul.f32 %v6505_v11, %v2955_v15 }
 0x571   : > { %4798 = vrcp.f32 %v3417_v20 }
 0x572   : > { %4800 = vrcp.f32 %v3418_v27 }
 0x573   : > { %3285 = vperm.xlu1 %4552, %v4755_v43   ;;  %v4789_v43 = vpop.eup %4788  ;;  %4802 = vrcp.f32 %v3419_v30 }
 0x574   : > { %3290 = vperm.xlu0 %4553, %v4757_v47   ;;  %4804 = vrcp.f32 %v3420_v48 }
 0x575   : > { %4806 = vrcp.f32 %v3421_v59 }
 0x576   : > { %4808 = vrcp.f32 %v3422_v53  ;;  %v2961_v53 = vld [vmem:[#allocation4 + $0xf0] sm:$0xff] }
 0x577   : > { %3295 = vperm.xlu1 %4552, %v4759_v55  }
 0x578   : > { %3300 = vperm.xlu0 %4553, %v4761_v37   ;;  %v4791_v37 = vpop.eup %4790 }
 0x579   : > { %v4793_v10 = vpop.eup %4792 }
 0x57b   : > { %3321 = vperm.xlu1 %4552, %v4763_v58   ;;  %v2916_v58 = vmul.f32 %v6511_v16, %v2908_v6 }
 0x57c   : > { %3326 = vperm.xlu0 %4553, %v4765_v29  }
 0x57f   : > { %3331 = vperm.xlu1 %4552, %v4767_v23  }
 0x580   : > { %3336 = vperm.xlu0 %4553, %v4769_v0   ;;  %v4795_v0 = vpop.eup %4794 }
 0x581   : > { %v4797_v38 = vpop.eup %4796 }
 0x582   : > { %v4799_v8 = vpop.eup %4798 }
 0x583   : > { %3341 = vperm.xlu1 %4552, %v4771_v22   ;;  %v4801_v60 = vpop.eup %4800 }
 0x584   : > { %3346 = vperm.xlu0 %4553, %v4773_v17   ;;  %v4803_v62 = vpop.eup %4802 }
 0x587   : > { %3351 = vperm.xlu1 %4552, %v4775_v45   ;;  %v2919_v45 = vmul.f32 %v6519_v61, %v2911_v44 }
 0x588   : > { %3356 = vperm.xlu0 %4553, %v4777_v1  }
 0x58b   : > { %v2923_v40 = vpop.xlane.xlu1 %2922  ;;  %3441 = vperm.xlu1 %4552, %v4779_v31  }
 0x58c   : > { %v2938_v9 = vadd.f32 %v2923_v40, %v2914_v12  ;;  %3446 = vperm.xlu0 %4553, %v4781_v7   ;;  %v2920_v12 = vmul.f32 %v6523_v34, %v2912_v24  ;;  %v4805_v7 = vpop.eup %4804 }
 0x58e   : > { %2946 = vst.msk [vmem:[#allocation3 + $0xc0] sm:$0xff] %vm398_vm0, %v2938_v9  ;;  %v2913_v9 = vld [vmem:[#allocation3 + $0xf8] sm:$0xff] }
 0x58f   : > { %3451 = vperm.xlu1 %4552, %v4783_v51   ;;  %v2921_v39 = vmul.f32 %v6525_v42, %v2913_v9 }
 0x590   : > { %3456 = vperm.xlu0 %4553, %v4785_v2   ;;  %v4807_v2 = vpop.eup %4806 }
 0x591   : > { %v4809_v57 = vpop.eup %4808 }
 0x593   : > { %3461 = vperm.xlu1 %4552, %v4787_v63   ;;  %v2925_v47 = vpop.xlane.xlu0 %2924 }
 0x594   : > { %v2939_v55 = vadd.f32 %v2925_v47, %v2915_v25  ;;  %3466 = vperm.xlu0 %4553, %v4789_v43   ;;  %v2956_v25 = vld [vmem:[#allocation4 + $0xc8] sm:$0xff]  ;;  %v2957_v43 = vld [vmem:[#allocation4 + $0xd0] sm:$0xff] }
 0x595   : > { %v3543_v21 = vld [vmem:[#allocation3 + $0xc0] sm:$0xff]  ;;  %v2964_v11 = vmul.f32 %v6507_v52, %v2956_v25 }
 0x596   : > { %2947 = vst.msk [vmem:[#allocation3 + $0xc8] sm:$0xff] %vm398_vm0, %v2939_v55  ;;  %vm3559_vm12 = vcmp.gt.f32.partialorder %v3543_v21, 0.0  ;;  %v2965_v55 = vmul.f32 %v6511_v16, %v2957_v43 }
 0x597   : > { %v2929_v29 = vpop.xlane.xlu1 %2928  ;;  %3471 = vperm.xlu1 %4552, %v4791_v37   ;;  %v2927_v50 = vpop.xlane.xlu0 %2926  ;;  %v3567_v17 = vsel %vm3559_vm12, %v3543_v21, 1.0  ;;  %v2958_v21 = vld [vmem:[#allocation4 + $0xd8] sm:$0xff] }
 0x598   : > { %v2941_v14 = vadd.f32 %v2929_v29, %v2917_v46  ;;  %v2940_v23 = vadd.f32 %v2927_v50, %v2916_v58  ;;  %3476 = vperm.xlu0 %4553, %v4793_v10   ;;  %4810 = vrcp.f32 %v3567_v17  ;;  %v2959_v46 = vld [vmem:[#allocation4 + $0xe0] sm:$0xff]  ;;  %v2966_v52 = vmul.f32 %v6513_v56, %v2958_v21 }
 0x599   : > { %v2967_v16 = vmul.f32 %v6517_v26, %v2959_v46  ;;  %v2969_v26 = vmul.f32 %v6523_v34, %v2961_v53 }
 0x59a   : > { %2949 = vst.msk [vmem:[#allocation3 + $0xd8] sm:$0xff] %vm398_vm0, %v2941_v14  ;;  %2948 = vst.msk [vmem:[#allocation3 + $0xd0] sm:$0xff] %vm398_vm0, %v2940_v23 }
 0x59b   : > { %3497 = vperm.xlu1 %4552, %v4795_v0   ;;  %v2931_v22 = vpop.xlane.xlu0 %2930  ;;  %v2960_v0 = vld [vmem:[#allocation4 + $0xe8] sm:$0xff] }
 0x59c   : > { %v2942_v36 = vadd.f32 %v2931_v22, %v2918_v5  ;;  %3502 = vperm.xlu0 %4553, %v4797_v38   ;;  %v2968_v56 = vmul.f32 %v6519_v61, %v2960_v0  ;;  %v2803_v0 = vld [vmem:[#allocation5 + $0xd8] sm:$0xff] }
 0x59d   : > { %v3544_v41 = vld [vmem:[#allocation3 + $0xc8] sm:$0xff] }
 0x59e   : > { %vm3560_vm14 = vcmp.gt.f32.partialorder %v3544_v41, 0.0  ;;  %2950 = vst.msk [vmem:[#allocation3 + $0xe0] sm:$0xff] %vm398_vm0, %v2942_v36 }
 0x59f   : > { %v3568_v1 = vsel %vm3560_vm14, %v3544_v41, 1.0  ;;  %v2933_v19 = vpop.xlane.xlu1 %2932  ;;  %3507 = vperm.xlu1 %4552, %v4799_v8   ;;  %vm3823_vm14 = vcmask 523264  }
 0x5a0   : > { %4812 = vrcp.f32 %v3568_v1  ;;  %v2943_v3 = vadd.f32 %v2933_v19, %v2919_v45  ;;  %3512 = vperm.xlu0 %4553, %v4801_v60   ;;  %v2962_v60 = vld [vmem:[#allocation4 + $0xf8] sm:$0xff] }
 0x5a1   : > { %v3546_v4 = vld [vmem:[#allocation3 + $0xd8] sm:$0xff]  ;;  %v3545_v31 = vld [vmem:[#allocation3 + $0xd0] sm:$0xff]  ;;  %v2970_v61 = vmul.f32 %v6525_v42, %v2962_v60 }
 0x5a2   : > { %vm3562_vm15 = vcmp.gt.f32.partialorder %v3546_v4, 0.0  ;;  %vm3561_vm1 = vcmp.gt.f32.partialorder %v3545_v31, 0.0  ;;  %2951 = vst.msk [vmem:[#allocation3 + $0xe8] sm:$0xff] %vm398_vm0, %v2943_v3  ;;  %v4811_v13 = vpop.eup %4810 }
 0x5a3   : > { %v3570_v54 = vsel %vm3562_vm15, %v3546_v4, 1.0  ;;  %v3569_v40 = vsel %vm3561_vm1, %v3545_v31, 1.0  ;;  %3517 = vperm.xlu1 %4552, %v4803_v62   ;;  %v2935_v18 = vpop.xlane.xlu0 %2934  ;;  %vm3832_vm15 = vcmask 785408  }
 0x5a4   : > { %4814 = vrcp.f32 %v3570_v54  ;;  %v2944_v51 = vadd.f32 %v2935_v18, %v2920_v12  ;;  %3522 = vperm.xlu0 %4553, %v4805_v7  }
 0x5a5   : > { %4816 = vrcp.f32 %v3569_v40  ;;  %v3547_v35 = vld [vmem:[#allocation3 + $0xe0] sm:$0xff] }
 0x5a6   : > { %vm3563_vm3 = vcmp.gt.f32.partialorder %v3547_v35, 0.0  ;;  %2952 = vst.msk [vmem:[#allocation3 + $0xf0] sm:$0xff] %vm398_vm0, %v2944_v51 }
 0x5a7   : > { %v3571_v20 = vsel %vm3563_vm3, %v3547_v35, 1.0  ;;  %v2937_v63 = vpop.xlane.xlu1 %2936  ;;  %3527 = vperm.xlu1 %4552, %v4807_v2   ;;  %v2972_v27 = vpop.xlane.xlu0 %2971 }
 0x5a8   : > { %4818 = vrcp.f32 %v3571_v20  ;;  %v2945_v28 = vadd.f32 %v2937_v63, %v2921_v39  ;;  %v2987_v47 = vadd.f32 %v2972_v27, %v2963_v49  ;;  %3532 = vperm.xlu0 %4553, %v4809_v57  }
 0x5a9   : > { %v3548_v6 = vld [vmem:[#allocation3 + $0xe8] sm:$0xff] }
 0x5aa   : > { %v4813_v32 = vpop.eup %4812  ;;  %vm3564_vm4 = vcmp.gt.f32.partialorder %v3548_v6, 0.0  ;;  %2953 = vst.msk [vmem:[#allocation3 + $0xf8] sm:$0xff] %vm398_vm0, %v2945_v28  ;;  %2995 = vst.msk [vmem:[#allocation4 + $0xc0] sm:$0xff] %vm398_vm0, %v2987_v47 }
 0x5ab   : > { %v3572_v30 = vsel %vm3564_vm4, %v3548_v6, 1.0  ;;  %3617 = vperm.xlu1 %4552, %v4811_v13   ;;  %v2974_v37 = vpop.xlane.xlu1 %2973  ;;  %v2976_v48 = vpop.xlane.xlu0 %2975 }
 0x5ac   : > { %4820 = vrcp.f32 %v3572_v30  ;;  %v2988_v58 = vadd.f32 %v2974_v37, %v2964_v11  ;;  %v2989_v10 = vadd.f32 %v2976_v48, %v2965_v55  ;;  %3622 = vperm.xlu0 %4553, %v4813_v32  }
 0x5ad   : > { %v3549_v29 = vld [vmem:[#allocation3 + $0xf0] sm:$0xff] }
 0x5ae   : > { %v4815_v50 = vpop.eup %4814  ;;  %vm3565_vm5 = vcmp.gt.f32.partialorder %v3549_v29, 0.0  ;;  %2996 = vst.msk [vmem:[#allocation4 + $0xc8] sm:$0xff] %vm398_vm0, %v2988_v58  ;;  %2997 = vst.msk [vmem:[#allocation4 + $0xd0] sm:$0xff] %vm398_vm0, %v2989_v10 }
 0x5af   : > { %v4817_v33 = vpop.eup %4816  ;;  %v3573_v14 = vsel %vm3565_vm5, %v3549_v29, 1.0  ;;  %v2978_v23 = vpop.xlane.xlu1 %2977 }
 0x5b0   : > { %v2980_v59 = vpop.xlane.xlu0 %2979  ;;  %4822 = vrcp.f32 %v3573_v14  ;;  %v2990_v5 = vadd.f32 %v2978_v23, %v2966_v52  ;;  %3627 = vperm.xlu1 %4552, %v4817_v33   ;;  %3632 = vperm.xlu0 %4553, %v4815_v50   ;;  %v2802_v23 = vld [vmem:[#allocation5 + $0xd0] sm:$0xff] }
 0x5b1   : > { %v2991_v38 = vadd.f32 %v2980_v59, %v2967_v16  ;;  %v3550_v22 = vld [vmem:[#allocation3 + $0xf8] sm:$0xff]  ;;  %v3551_v44 = vld [vmem:[#allocation4 + $0xc0] sm:$0xff] }
 0x5b2   : > { %v4819_v17 = vpop.eup %4818  ;;  %vm3566_vm7 = vcmp.gt.f32.partialorder %v3550_v22, 0.0  ;;  %vm3583_vm9 = vcmp.gt.f32.partialorder %v3551_v44, 0.0  ;;  %2998 = vst.msk [vmem:[#allocation4 + $0xd8] sm:$0xff] %vm398_vm0, %v2990_v5  ;;  %v2800_v59 = vld [vmem:[#allocation5 + $0xc0] sm:$0xff] }
 0x5b3   : > { %2999 = vst.msk [vmem:[#allocation4 + $0xe0] sm:$0xff] %vm398_vm0, %v2991_v38  ;;  %v3574_v36 = vsel %vm3566_vm7, %v3550_v22, 1.0  ;;  %v3591_v41 = vsel %vm3583_vm9, %v3551_v44, 1.0  ;;  %v2982_v8 = vpop.xlane.xlu1 %2981  ;;  %v2801_v22 = vld [vmem:[#allocation5 + $0xc8] sm:$0xff] }
 0x5b4   : > { %v2984_v45 = vpop.xlane.xlu0 %2983  ;;  %4824 = vrcp.f32 %v3574_v36  ;;  %v2992_v1 = vadd.f32 %v2982_v8, %v2968_v56  ;;  %3637 = vperm.xlu1 %4552, %v4819_v17  }
 0x5b5   : > { %v2993_v19 = vadd.f32 %v2984_v45, %v2969_v26  ;;  %4826 = vrcp.f32 %v3591_v41  ;;  %v3552_v24 = vld [vmem:[#allocation4 + $0xc8] sm:$0xff]  ;;  %v3553_v3 = vld [vmem:[#allocation4 + $0xd0] sm:$0xff] }
 0x5b6   : > { %v4821_v4 = vpop.eup %4820  ;;  %vm3584_vm11 = vcmp.gt.f32.partialorder %v3552_v24, 0.0  ;;  %vm3585_vm13 = vcmp.gt.f32.partialorder %v3553_v3, 0.0  ;;  %3000 = vst.msk [vmem:[#allocation4 + $0xe8] sm:$0xff] %vm398_vm0, %v2992_v1 }
 0x5b7   : > { %3001 = vst.msk [vmem:[#allocation4 + $0xf0] sm:$0xff] %vm398_vm0, %v2993_v19  ;;  %v3592_v34 = vsel %vm3584_vm11, %v3552_v24, 1.0  ;;  %v3593_v31 = vsel %vm3585_vm13, %v3553_v3, 1.0  ;;  %v2986_v62 = vpop.xlane.xlu1 %2985  ;;  %3642 = vperm.xlu0 %4553, %v4821_v4  }
 0x5b8   : > { %4828 = vrcp.f32 %v3592_v34  ;;  %v2994_v12 = vadd.f32 %v2986_v62, %v2970_v61  ;;  %v3255_v34 = vld [vmem:[#allocation5 + $0x40] sm:$0xff]  ;;  %v2806_v62 = vld [vmem:[#allocation5 + $0xf0] sm:$0xff] }
 0x5b9   : > { %4830 = vrcp.f32 %v3593_v31  ;;  %v3554_v7 = vld [vmem:[#allocation4 + $0xd8] sm:$0xff] }
 0x5ba   : > { %v3555_v54 = vld [vmem:[#allocation4 + $0xe0] sm:$0xff]  ;;  %v4823_v40 = vpop.eup %4822  ;;  %vm3586_vm2 = vcmp.gt.f32.partialorder %v3554_v7, 0.0  ;;  %3002 = vst.msk [vmem:[#allocation4 + $0xf8] sm:$0xff] %vm398_vm0, %v2994_v12 }
 0x5bb   : > { %vm3587_vm8 = vcmp.gt.f32.partialorder %v3555_v54, 0.0  ;;  %v3594_v18 = vsel %vm3586_vm2, %v3554_v7, 1.0  ;;  %v6562_v15 = vpop.permute.xlu1 %2810  ;;  %3647 = vperm.xlu1 %4552, %v4823_v40   ;;  %v6564_v42 = vpop.permute.xlu0 %2815  ;;  %v3256_v7 = vld [vmem:[#allocation5 + $0x48] sm:$0xff]  ;;  %v2804_v40 = vld [vmem:[#allocation5 + $0xe0] sm:$0xff] }
 0x5bc   : > { %v3595_v9 = vsel %vm3587_vm8, %v3555_v54, 1.0  ;;  %4832 = vrcp.f32 %v3594_v18  ;;  %v2848_v17 = vmul.f32 %v6562_v15, %v2800_v59  ;;  %v2849_v45 = vmul.f32 %v6564_v42, %v2801_v22  ;;  %v3259_v22 = vld [vmem:[#allocation5 + $0x60] sm:$0xff] }
 0x5bd   : > { %4834 = vrcp.f32 %v3595_v9  ;;  %v3556_v51 = vld [vmem:[#allocation4 + $0xe8] sm:$0xff]  ;;  %v2807_v9 = vld [vmem:[#allocation5 + $0xf8] sm:$0xff] }
 0x5be   : > { %v3557_v35 = vld [vmem:[#allocation4 + $0xf0] sm:$0xff]  ;;  %v4825_v2 = vpop.eup %4824  ;;  %vm3588_vm10 = vcmp.gt.f32.partialorder %v3556_v51, 0.0 }
 0x5bf   : > { %vm3589_vm12 = vcmp.gt.f32.partialorder %v3557_v35, 0.0  ;;  %v4827_v39 = vpop.eup %4826  ;;  %v3596_v49 = vsel %vm3588_vm10, %v3556_v51, 1.0  ;;  %v6566_v20 = vpop.permute.xlu1 %2820  ;;  %3652 = vperm.xlu0 %4553, %v4825_v2   ;;  %v3257_v2 = vld [vmem:[#allocation5 + $0x50] sm:$0xff] }
 0x5c0   : > { %v3597_v57 = vsel %vm3589_vm12, %v3557_v35, 1.0  ;;  %v6568_v63 = vpop.permute.xlu0 %2825  ;;  %4836 = vrcp.f32 %v3596_v49  ;;  %3673 = vperm.xlu1 %4552, %v4827_v39   ;;  %v2850_v38 = vmul.f32 %v6566_v20, %v2802_v23  ;;  %v2805_v35 = vld [vmem:[#allocation5 + $0xe8] sm:$0xff] }
 0x5c1   : > { %4838 = vrcp.f32 %v3597_v57  ;;  %v3558_v27 = vld [vmem:[#allocation4 + $0xf8] sm:$0xff]  ;;  %v2851_v36 = vmul.f32 %v6568_v63, %v2803_v0 }
 0x5c2   : > { %v4829_v25 = vpop.eup %4828  ;;  %vm3590_vm0 = vcmp.gt.f32.partialorder %v3558_v27, 0.0 }
 0x5c3   : > { %v4831_v43 = vpop.eup %4830  ;;  %v3598_v28 = vsel %vm3590_vm0, %v3558_v27, 1.0  ;;  %v6570_v47 = vpop.permute.xlu1 %2830  ;;  %3678 = vperm.xlu0 %4553, %v4829_v25   ;;  %v3258_v25 = vld [vmem:[#allocation5 + $0x58] sm:$0xff] }
 0x5c4   : > { %v6572_v13 = vpop.permute.xlu0 %2835  ;;  %4840 = vrcp.f32 %v3598_v28  ;;  %3683 = vperm.xlu1 %4552, %v4831_v43   ;;  %v2852_v57 = vmul.f32 %v6570_v47, %v2804_v40 }
 0x5c5   : > { %v2853_v23 = vmul.f32 %v6572_v13, %v2805_v35 }
 0x5c6   : > { %v4833_v6 = vpop.eup %4832 }
 0x5c7   : > { %v4835_v32 = vpop.eup %4834  ;;  %v6574_v11 = vpop.permute.xlu1 %2840  ;;  %3688 = vperm.xlu0 %4553, %v4833_v6  }
 0x5c8   : > { %v6576_v55 = vpop.permute.xlu0 %2845  ;;  %3693 = vperm.xlu1 %4552, %v4835_v32   ;;  %v2854_v51 = vmul.f32 %v6574_v11, %v2806_v62 }
 0x5c9   : > { %v2855_v32 = vmul.f32 %v6576_v55, %v2807_v9 }
 0x5ca   : > { %v4837_v30 = vpop.eup %4836 }
 0x5cb   : > { %v4839_v37 = vpop.eup %4838  ;;  %v6578_v48 = vpop.permute.xlu1 %3094  ;;  %3698 = vperm.xlu0 %4553, %v4837_v30  }
 0x5cc   : > { %v6580_v21 = vpop.permute.xlu0 %3089  ;;  %3703 = vperm.xlu1 %4552, %v4839_v37  }
 0x5ce   : > { %v4841_v46 = vpop.eup %4840 }
 0x5cf   : > { %v6582_v58 = vpop.permute.xlu1 %3099  ;;  %3708 = vperm.xlu0 %4553, %v4841_v46  }
 0x5d0   : > { %v6584_v10 = vpop.permute.xlu0 %3104 }
 0x5d3   : > { %v6586_v29 = vpop.permute.xlu1 %3109 }
 0x5d4   : > { %v6588_v50 = vpop.permute.xlu0 %3114 }
 0x5d7   : > { %v6590_v52 = vpop.permute.xlu1 %3119 }
 0x5d8   : > { %v6592_v16 = vpop.permute.xlu0 %3124 }
 0x5db   : > { %v6594_v33 = vpop.permute.xlu1 %3145 }
 0x5dc   : > { %v6596_v14 = vpop.permute.xlu0 %3150 }
 0x5df   : > { %v6598_v53 = vpop.permute.xlu1 %3155  ;;  %v4495_v44 = vpop.f32.mrb[16].mxu1 }
 0x5e0   : > { %v6600_v5 = vpop.permute.xlu0 %3160  ;;  %v2858_v56 = vadd.f32 %v4495_v44, %v2850_v38  ;;  %v2736_v26 = vpop.f32.mrb[17].mxu1 }
 0x5e1   : > { %v2856_v41 = vadd.f32 %v2848_v17, %v2736_v26  ;;  %v4496_v8 = vpop.f32.mrb[18].mxu1  ;;  %v2875_v17 = vld [vmem:[#allocation6 + $0xd0] sm:$0xff]  ;;  %v3260_v26 = vld [vmem:[#allocation5 + $0x68] sm:$0xff] }
 0x5e2   : > { %2866 = vst.msk [vmem:[#allocation5 + $0xd0] sm:$0xff] %vm495_vm6, %v2858_v56  ;;  %v2859_v60 = vadd.f32 %v4496_v8, %v2851_v36  ;;  %v2739_v1 = vpop.f32.mrb[19].mxu1 }
 0x5e3   : > { %v6607_v19 = vpop.permute.xlu1 %3165  ;;  %2864 = vst.msk [vmem:[#allocation5 + $0xc0] sm:$0xff] %vm495_vm6, %v2856_v41  ;;  %v2857_v24 = vadd.f32 %v2849_v45, %v2739_v1  ;;  %v2873_v41 = vld [vmem:[#allocation6 + $0xc0] sm:$0xff]  ;;  %v2876_v45 = vld [vmem:[#allocation6 + $0xd8] sm:$0xff]  ;;  %v2874_v1 = vld [vmem:[#allocation6 + $0xc8] sm:$0xff] }
 0x5e4   : > { %v6610_v3 = vpop.permute.xlu0 %3170  ;;  %2867 = vst.msk [vmem:[#allocation5 + $0xd8] sm:$0xff] %vm495_vm6, %v2859_v60  ;;  %v2883_v60 = vmul.f32 %v2875_v17, %v6566_v20  ;;  %v2881_v62 = vmul.f32 %v2873_v41, %v6562_v15  ;;  %v2884_v9 = vmul.f32 %v2876_v45, %v6568_v63  ;;  %v2882_v20 = vmul.f32 %v2874_v1, %v6564_v42  ;;  %v2880_v42 = vld [vmem:[#allocation6 + $0xf8] sm:$0xff]  ;;  %v3431_v41 = vld [vmem:[#allocation5 + $0x80] sm:$0xff] }
 0x5e5   : > { %2865 = vst.msk [vmem:[#allocation5 + $0xc8] sm:$0xff] %vm495_vm6, %v2857_v24  ;;  %v3261_v24 = vld [vmem:[#allocation5 + $0x70] sm:$0xff] }
 0x5e7   : > { %v6614_v4 = vpop.permute.xlu1 %3175 }
 0x5e8   : > { %v6616_v61 = vpop.permute.xlu0 %3180 }
 0x5eb   : > { %v3266_v31 = vpop.permute.xlu1 %3265 }
 0x5ec   : > { %v3303_v12 = vmul.f32 %v3266_v31, %v3255_v34  ;;  %v3271_v54 = vpop.permute.xlu0 %3270 }
 0x5ed   : > { %v3304_v18 = vmul.f32 %v3271_v54, %v3256_v7  ;;  %v3262_v7 = vld [vmem:[#allocation5 + $0x78] sm:$0xff] }
 0x5ee   : > { %3727 = vrot.lane.b32.xlu1 %v3303_v12, %s4882_s12 }
 0x5ef   : > { %3729 = vrot.lane.b32.xlu0 %v3304_v18, %s4882_s12  ;;  %v3276_v39 = vpop.permute.xlu1 %3275  ;;  %v4499_v49 = vpop.f32.mrb[20].mxu1 }
 0x5f0   : > { %v3305_v27 = vmul.f32 %v3276_v39, %v3257_v2  ;;  %v3281_v43 = vpop.permute.xlu0 %3280  ;;  %v2862_v28 = vadd.f32 %v4499_v49, %v2854_v51  ;;  %v2752_v6 = vpop.f32.mrb[21].mxu1 }
 0x5f1   : > { %v3306_v30 = vmul.f32 %v3281_v43, %v3258_v25  ;;  %v2860_v37 = vadd.f32 %v2852_v57, %v2752_v6  ;;  %v4500_v46 = vpop.f32.mrb[22].mxu1  ;;  %v2877_v25 = vld [vmem:[#allocation6 + $0xe0] sm:$0xff] }
 0x5f2   : > { %2870 = vst.msk [vmem:[#allocation5 + $0xf0] sm:$0xff] %vm495_vm6, %v2862_v28  ;;  %v2863_v59 = vadd.f32 %v4500_v46, %v2855_v32  ;;  %3731 = vrot.lane.b32.xlu1 %v3305_v27, %s4882_s12  ;;  %v2755_v0 = vpop.f32.mrb[23].mxu1  ;;  %v2879_v27 = vld [vmem:[#allocation6 + $0xf0] sm:$0xff]  ;;  %v2878_v28 = vld [vmem:[#allocation6 + $0xe8] sm:$0xff] }
 0x5f3   : > { %2868 = vst.msk [vmem:[#allocation5 + $0xe0] sm:$0xff] %vm495_vm6, %v2860_v37  ;;  %3733 = vrot.lane.b32.xlu0 %v3306_v30, %s4882_s12  ;;  %v2861_v38 = vadd.f32 %v2853_v23, %v2755_v0  ;;  %v3286_v44 = vpop.permute.xlu1 %3285  ;;  %v2887_v43 = vmul.f32 %v2879_v27, %v6574_v11  ;;  %v2885_v30 = vmul.f32 %v2877_v25, %v6570_v47  ;;  %v3312_v27 = vld [vmem:[#allocation6 + $0x48] sm:$0xff] }
 0x5f4   : > { %2871 = vst.msk [vmem:[#allocation5 + $0xf8] sm:$0xff] %vm495_vm6, %v2863_v59  ;;  %v3307_v56 = vmul.f32 %v3286_v44, %v3259_v22  ;;  %v3291_v36 = vpop.permute.xlu0 %3290  ;;  %v2888_v59 = vmul.f32 %v2880_v42, %v6576_v55  ;;  %v2886_v22 = vmul.f32 %v2878_v28, %v6572_v13  ;;  %v3432_v13 = vld [vmem:[#allocation5 + $0x88] sm:$0xff] }
 0x5f5   : > { %2869 = vst.msk [vmem:[#allocation5 + $0xe8] sm:$0xff] %vm495_vm6, %v2861_v38  ;;  %v3308_v8 = vmul.f32 %v3291_v36, %v3260_v26 }
 0x5f6   : > { %3735 = vrot.lane.b32.xlu1 %v3307_v56, %s4882_s12 }
 0x5f7   : > { %3737 = vrot.lane.b32.xlu0 %v3308_v8, %s4882_s12  ;;  %v3296_v34 = vpop.permute.xlu1 %3295  ;;  %v4503_v31 = vpop.f32.mrb[24].mxu1 }
 0x5f8   : > { %v3309_v12 = vmul.f32 %v3296_v34, %v3261_v24  ;;  %v3301_v54 = vpop.permute.xlu0 %3300  ;;  %v2891_v40 = vadd.f32 %v4503_v31, %v2883_v60  ;;  %v2768_v18 = vpop.f32.mrb[25].mxu1  ;;  %v3433_v24 = vld [vmem:[#allocation5 + $0x90] sm:$0xff] }
 0x5f9   : > { %v3310_v51 = vmul.f32 %v3301_v54, %v3262_v7  ;;  %v2889_v35 = vadd.f32 %v2881_v62, %v2768_v18  ;;  %v4504_v2 = vpop.f32.mrb[26].mxu1  ;;  %v3434_v62 = vld [vmem:[#allocation5 + $0x98] sm:$0xff]  ;;  %v3435_v54 = vld [vmem:[#allocation5 + $0xa0] sm:$0xff] }
 0x5fa   : > { %2899 = vst.msk [vmem:[#allocation6 + $0xd0] sm:$0xff] %vm495_vm6, %v2891_v40  ;;  %v2892_v39 = vadd.f32 %v4504_v2, %v2884_v9  ;;  %3739 = vrot.lane.b32.xlu1 %v3309_v12, %s4882_s12  ;;  %v2771_v49 = vpop.f32.mrb[27].mxu1  ;;  %v3436_v9 = vld [vmem:[#allocation5 + $0xa8] sm:$0xff]  ;;  %v3437_v2 = vld [vmem:[#allocation5 + $0xb0] sm:$0xff] }
 0x5fb   : > { %2897 = vst.msk [vmem:[#allocation6 + $0xc0] sm:$0xff] %vm495_vm6, %v2889_v35  ;;  %3741 = vrot.lane.b32.xlu0 %v3310_v51, %s4882_s12  ;;  %v2890_v15 = vadd.f32 %v2882_v20, %v2771_v49  ;;  %v3322_v57 = vpop.permute.xlu1 %3321  ;;  %v3311_v20 = vld [vmem:[#allocation6 + $0x40] sm:$0xff] }
 0x5fc   : > { %2900 = vst.msk [vmem:[#allocation6 + $0xd8] sm:$0xff] %vm495_vm6, %v2892_v39  ;;  %v3327_v63 = vpop.permute.xlu0 %3326 }
 0x5fd   : > { %2898 = vst.msk [vmem:[#allocation6 + $0xc8] sm:$0xff] %vm495_vm6, %v2890_v15  ;;  %v3359_v15 = vmul.f32 %v3322_v57, %v3311_v20  ;;  %v3360_v42 = vmul.f32 %v3327_v63, %v3312_v27  ;;  %v3608_v27 = vld [vmem:[#allocation5 + $0xc8] sm:$0xff] }
 0x5ff   : > { %v3332_v6 = vpop.permute.xlu1 %3331  ;;  %v4507_v32 = vpop.f32.mrb[28].mxu1 }
 0x600   : > { %v3337_v37 = vpop.permute.xlu0 %3336  ;;  %v2895_v46 = vadd.f32 %v4507_v32, %v2887_v43  ;;  %v2784_v23 = vpop.f32.mrb[29].mxu1  ;;  %v3313_v43 = vld [vmem:[#allocation6 + $0x50] sm:$0xff] }
 0x601   : > { %v2893_v0 = vadd.f32 %v2885_v30, %v2784_v23  ;;  %v4508_v38 = vpop.f32.mrb[30].mxu1  ;;  %v3361_v32 = vmul.f32 %v3332_v6, %v3313_v43  ;;  %v3314_v30 = vld [vmem:[#allocation6 + $0x58] sm:$0xff] }
 0x602   : > { %2903 = vst.msk [vmem:[#allocation6 + $0xf0] sm:$0xff] %vm495_vm6, %v2895_v46  ;;  %v2896_v44 = vadd.f32 %v4508_v38, %v2888_v59  ;;  %v2787_v17 = vpop.f32.mrb[31].mxu1  ;;  %v3362_v23 = vmul.f32 %v3337_v37, %v3314_v30  ;;  %v3315_v59 = vld [vmem:[#allocation6 + $0x60] sm:$0xff]  ;;  %v3316_v38 = vld [vmem:[#allocation6 + $0x68] sm:$0xff]  ;;  %v3610_v30 = vld [vmem:[#allocation5 + $0xd8] sm:$0xff] }
 0x603   : > { %2901 = vst.msk [vmem:[#allocation6 + $0xe0] sm:$0xff] %vm495_vm6, %v2893_v0  ;;  %v2894_v11 = vadd.f32 %v2886_v22, %v2787_v17  ;;  %v3342_v56 = vpop.permute.xlu1 %3341 }
 0x604   : > { %2904 = vst.msk [vmem:[#allocation6 + $0xf8] sm:$0xff] %vm495_vm6, %v2896_v44  ;;  %v3347_v47 = vpop.permute.xlu0 %3346  ;;  %v3363_v57 = vmul.f32 %v3342_v56, %v3315_v59  ;;  %v3317_v44 = vld [vmem:[#allocation6 + $0x70] sm:$0xff] }
 0x605   : > { %2902 = vst.msk [vmem:[#allocation6 + $0xe8] sm:$0xff] %vm495_vm6, %v2894_v11  ;;  %v3364_v63 = vmul.f32 %v3347_v47, %v3316_v38  ;;  %v3318_v11 = vld [vmem:[#allocation6 + $0x78] sm:$0xff]  ;;  %v3488_v47 = vld [vmem:[#allocation6 + $0x88] sm:$0xff] }
 0x607   : > { %v3352_v26 = vpop.permute.xlu1 %3351 }
 0x608   : > { %v3357_v36 = vpop.permute.xlu0 %3356  ;;  %v3365_v6 = vmul.f32 %v3352_v26, %v3317_v44  ;;  %v3489_v26 = vld [vmem:[#allocation6 + $0x90] sm:$0xff] }
 0x609   : > { %v3366_v37 = vmul.f32 %v3357_v36, %v3318_v11 }
 0x60b   : > { %v3442_v55 = vpop.permute.xlu1 %3441 }
 0x60c   : > { %v3479_v8 = vmul.f32 %v3442_v55, %v3431_v41  ;;  %v3447_v45 = vpop.permute.xlu0 %3446  ;;  %v3438_v41 = vld [vmem:[#allocation5 + $0xb8] sm:$0xff] }
 0x60d   : > { %v3480_v60 = vmul.f32 %v3447_v45, %v3432_v13  ;;  %v3487_v45 = vld [vmem:[#allocation6 + $0x80] sm:$0xff] }
 0x60e   : > { %3759 = vrot.lane.b32.xlu1 %v3479_v8, %s4883_s9 }
 0x60f   : > { %3761 = vrot.lane.b32.xlu0 %v3480_v60, %s4883_s9  ;;  %v3452_v1 = vpop.permute.xlu1 %3451 }
 0x610   : > { %v3481_v34 = vmul.f32 %v3452_v1, %v3433_v24  ;;  %v3457_v31 = vpop.permute.xlu0 %3456 }
 0x611   : > { %v3482_v12 = vmul.f32 %v3457_v31, %v3434_v62  ;;  %v3491_v62 = vld [vmem:[#allocation6 + $0xa0] sm:$0xff] }
 0x612   : > { %3763 = vrot.lane.b32.xlu1 %v3481_v34, %s4883_s9  ;;  %v3490_v34 = vld [vmem:[#allocation6 + $0x98] sm:$0xff] }
 0x613   : > { %3765 = vrot.lane.b32.xlu0 %v3482_v12, %s4883_s9  ;;  %v3462_v7 = vpop.permute.xlu1 %3461 }
 0x614   : > { %v3483_v40 = vmul.f32 %v3462_v7, %v3435_v54  ;;  %v3467_v18 = vpop.permute.xlu0 %3466  ;;  %v3492_v54 = vld [vmem:[#allocation6 + $0xa8] sm:$0xff] }
 0x615   : > { %v3484_v51 = vmul.f32 %v3467_v18, %v3436_v9  ;;  %v3493_v9 = vld [vmem:[#allocation6 + $0xb0] sm:$0xff] }
 0x616   : > { %3767 = vrot.lane.b32.xlu1 %v3483_v40, %s4883_s9 }
 0x617   : > { %3769 = vrot.lane.b32.xlu0 %v3484_v51, %s4883_s9  ;;  %v3472_v35 = vpop.permute.xlu1 %3471 }
 0x618   : > { %v3485_v39 = vmul.f32 %v3472_v35, %v3437_v2  ;;  %v3477_v49 = vpop.permute.xlu0 %3476  ;;  %v3494_v35 = vld [vmem:[#allocation6 + $0xb8] sm:$0xff] }
 0x619   : > { %v3486_v8 = vmul.f32 %v3477_v49, %v3438_v41  ;;  %v3607_v49 = vld [vmem:[#allocation5 + $0xc0] sm:$0xff] }
 0x61a   : > { %3771 = vrot.lane.b32.xlu1 %v3485_v39, %s4883_s9 }
 0x61b   : > { %3863 = vrot.lane.b32.xlu0 %v3359_v15, %s4882_s12  ;;  %v3498_v25 = vpop.permute.xlu1 %3497 }
 0x61c   : > { %v3503_v28 = vpop.permute.xlu0 %3502  ;;  %v3535_v13 = vmul.f32 %v3498_v25, %v3487_v45  ;;  %v3665_v45 = vld [vmem:[#allocation6 + $0xd0] sm:$0xff] }
 0x61d   : > { %v3536_v60 = vmul.f32 %v3503_v28, %v3488_v47  ;;  %v3609_v28 = vld [vmem:[#allocation5 + $0xd0] sm:$0xff] }
 0x61e   : > { %3865 = vrot.lane.b32.xlu1 %v3360_v42, %s4882_s12 }
 0x61f   : > { %3867 = vrot.lane.b32.xlu0 %v3361_v32, %s4882_s12  ;;  %v3508_v46 = vpop.permute.xlu1 %3507 }
 0x620   : > { %v3513_v0 = vpop.permute.xlu0 %3512  ;;  %v3537_v24 = vmul.f32 %v3508_v46, %v3489_v26 }
 0x621   : > { %v3538_v31 = vmul.f32 %v3513_v0, %v3490_v34 }
 0x622   : > { %3869 = vrot.lane.b32.xlu1 %v3362_v23, %s4882_s12  ;;  %v3611_v23 = vld [vmem:[#allocation5 + $0xe0] sm:$0xff] }
 0x623   : > { %3871 = vrot.lane.b32.xlu0 %v3363_v57, %s4882_s12  ;;  %v3518_v22 = vpop.permute.xlu1 %3517  ;;  %v3612_v57 = vld [vmem:[#allocation5 + $0xe8] sm:$0xff] }
 0x624   : > { %v3523_v17 = vpop.permute.xlu0 %3522  ;;  %v3539_v7 = vmul.f32 %v3518_v22, %v3491_v62 }
 0x625   : > { %v3540_v40 = vmul.f32 %v3523_v17, %v3492_v54  ;;  %v3614_v17 = vld [vmem:[#allocation5 + $0xf8] sm:$0xff] }
 0x626   : > { %3873 = vrot.lane.b32.xlu1 %v3364_v63, %s4882_s12  ;;  %v3613_v63 = vld [vmem:[#allocation5 + $0xf0] sm:$0xff] }
 0x627   : > { %3875 = vrot.lane.b32.xlu0 %v3365_v6, %s4882_s12  ;;  %v3528_v55 = vpop.permute.xlu1 %3527 }
 0x628   : > { %v3533_v56 = vpop.permute.xlu0 %3532  ;;  %v3541_v51 = vmul.f32 %v3528_v55, %v3493_v9 }
 0x629   : > { %v3542_v2 = vmul.f32 %v3533_v56, %v3494_v35 }
 0x62a   : > { %3877 = vrot.lane.b32.xlu1 %v3366_v37, %s4882_s12  ;;  %v3663_v37 = vld [vmem:[#allocation6 + $0xc0] sm:$0xff] }
 0x62b   : > { %3773 = vrot.lane.b32.xlu0 %v3486_v8, %s4883_s9  ;;  %v3618_v1 = vpop.permute.xlu1 %3617  ;;  %v3664_v8 = vld [vmem:[#allocation6 + $0xc8] sm:$0xff] }
 0x62c   : > { %v3623_v36 = vpop.permute.xlu0 %3622  ;;  %v3655_v15 = vmul.f32 %v3618_v1, %v3607_v49 }
 0x62d   : > { %v3656_v25 = vmul.f32 %v3623_v36, %v3608_v27  ;;  %v3668_v36 = vld [vmem:[#allocation6 + $0xe8] sm:$0xff] }
 0x62e   : > { %3895 = vrot.lane.b32.xlu1 %v3535_v13, %s4883_s9 }
 0x62f   : > { %3897 = vrot.lane.b32.xlu0 %v3536_v60, %s4883_s9  ;;  %v3628_v12 = vpop.permute.xlu1 %3627  ;;  %v3666_v60 = vld [vmem:[#allocation6 + $0xd8] sm:$0xff] }
 0x630   : > { %v3633_v18 = vpop.permute.xlu0 %3632  ;;  %v3657_v32 = vmul.f32 %v3628_v12, %v3609_v28 }
 0x631   : > { %v3658_v46 = vmul.f32 %v3633_v18, %v3610_v30 }
 0x632   : > { %3899 = vrot.lane.b32.xlu1 %v3537_v24, %s4883_s9  ;;  %v3667_v24 = vld [vmem:[#allocation6 + $0xe0] sm:$0xff] }
 0x633   : > { %3901 = vrot.lane.b32.xlu0 %v3538_v31, %s4883_s9  ;;  %v3638_v20 = vpop.permute.xlu1 %3637 }
 0x634   : > { %v3659_v0 = vmul.f32 %v3638_v20, %v3611_v23 }
 0x636   : > { %3903 = vrot.lane.b32.xlu1 %v3539_v7, %s4883_s9  ;;  %v3643_v39 = vpop.permute.xlu0 %3642  ;;  %v3669_v7 = vld [vmem:[#allocation6 + $0xf0] sm:$0xff] }
 0x637   : > { %3905 = vrot.lane.b32.xlu0 %v3540_v40, %s4883_s9  ;;  %v3660_v22 = vmul.f32 %v3643_v39, %v3612_v57  ;;  %v3670_v40 = vld [vmem:[#allocation6 + $0xf8] sm:$0xff] }
 0x63a   : > { %3907 = vrot.lane.b32.xlu1 %v3541_v51, %s4883_s9  ;;  %v3648_v42 = vpop.permute.xlu1 %3647 }
 0x63b   : > { %3909 = vrot.lane.b32.xlu0 %v3542_v2, %s4883_s9  ;;  %v3661_v44 = vmul.f32 %v3648_v42, %v3613_v63 }
 0x63e   : > { %v3653_v43 = vpop.permute.xlu0 %3652  ;;  %3791 = vrot.lane.b32.xlu1 %v3655_v15, %s4884_s13 }
 0x63f   : > { %3793 = vrot.lane.b32.xlu0 %v3656_v25, %s4884_s13  ;;  %v3674_v59 = vpop.permute.xlu1 %3673  ;;  %v3662_v6 = vmul.f32 %v3653_v43, %v3614_v17 }
 0x640   : > { %v3711_v41 = vmul.f32 %v3674_v59, %v3663_v37 }
 0x642   : > { %3795 = vrot.lane.b32.xlu1 %v3657_v32, %s4884_s13  ;;  %v3679_v38 = vpop.permute.xlu0 %3678 }
 0x643   : > { %3797 = vrot.lane.b32.xlu0 %v3658_v46, %s4884_s13  ;;  %v3684_v11 = vpop.permute.xlu1 %3683  ;;  %v3712_v56 = vmul.f32 %v3679_v38, %v3664_v8  ;;  %v3079_v8 = vld [vmem:[#allocation5] sm:$0xff] }
 0x644   : > { %v3713_v47 = vmul.f32 %v3684_v11, %v3665_v45  ;;  %v3080_v45 = vld [vmem:[#allocation5 + $0x8] sm:$0xff] }
 0x646   : > { %3799 = vrot.lane.b32.xlu1 %v3659_v0, %s4884_s13  ;;  %v3689_v55 = vpop.permute.xlu0 %3688 }
 0x647   : > { %3801 = vrot.lane.b32.xlu0 %v3660_v22, %s4884_s13  ;;  %v3694_v13 = vpop.permute.xlu1 %3693  ;;  %v3714_v26 = vmul.f32 %v3689_v55, %v3666_v60  ;;  %v3128_v60 = vmul.f32 %v6578_v48, %v3080_v45  ;;  %v3084_v45 = vld [vmem:[#allocation5 + $0x28] sm:$0xff] }
 0x648   : > { %v3715_v34 = vmul.f32 %v3694_v13, %v3667_v24  ;;  %v3127_v13 = vmul.f32 %v6580_v21, %v3079_v8  ;;  %v3081_v24 = vld [vmem:[#allocation5 + $0x10] sm:$0xff] }
 0x64a   : > { %3803 = vrot.lane.b32.xlu1 %v3661_v44, %s4884_s13  ;;  %v3699_v1 = vpop.permute.xlu0 %3698 }
 0x64b   : > { %3805 = vrot.lane.b32.xlu0 %v3662_v6, %s4884_s13  ;;  %v3704_v31 = vpop.permute.xlu1 %3703  ;;  %v3716_v62 = vmul.f32 %v3699_v1, %v3668_v36 }
 0x64c   : > { %v3717_v54 = vmul.f32 %v3704_v31, %v3669_v7  ;;  %v3129_v31 = vmul.f32 %v6582_v58, %v3081_v24 }
 0x64e   : > { %3927 = vrot.lane.b32.xlu1 %v3711_v41, %s4884_s13  ;;  %v3709_v12 = vpop.permute.xlu0 %3708 }
 0x64f   : > { %3929 = vrot.lane.b32.xlu0 %v3712_v56, %s4884_s13  ;;  %v3718_v18 = vmul.f32 %v3709_v12, %v3670_v40 }
 0x652   : > { %3931 = vrot.lane.b32.xlu1 %v3713_v47, %s4884_s13 }
 0x653   : > { %3933 = vrot.lane.b32.xlu0 %v3714_v26, %s4884_s13  ;;  %v6744_v26 = vld [vmem:[%s6933_s3] ss:$0 sm:$0xff] }
 0x656   : > { %3935 = vrot.lane.b32.xlu1 %v3715_v34, %s4884_s13 }
 0x657   : > { %3937 = vrot.lane.b32.xlu0 %v3716_v62, %s4884_s13  ;;  %v3082_v62 = vld [vmem:[#allocation5 + $0x18] sm:$0xff] }
 0x65a   : > { %3939 = vrot.lane.b32.xlu1 %v3717_v54, %s4884_s13  ;;  %v3130_v54 = vmul.f32 %v6584_v10, %v3082_v62 }
 0x65b   : > { %3941 = vrot.lane.b32.xlu0 %v3718_v18, %s4884_s13 }
 0x660   : > { %v3728_v9 = vpop.permute.xlu1 %3727 }
 0x661   : > { %v3730_v51 = vpop.permute.xlu0 %3729  ;;  %v3815_v1 = vsel %vm495_vm6, %v3127_v13, %v3728_v9 }
 0x662   : > { %v3816_v34 = vsel %vm495_vm6, %v3128_v60, %v3730_v51  ;;  %v3083_v51 = vld [vmem:[#allocation5 + $0x20] sm:$0xff] }
 0x664   : > { %v3732_v35 = vpop.permute.xlu1 %3731 }
 0x665   : > { %v3734_v2 = vpop.permute.xlu0 %3733  ;;  %v3817_v9 = vsel %vm495_vm6, %v3129_v31, %v3732_v35  ;;  %v3131_v35 = vmul.f32 %v6586_v29, %v3083_v51  ;;  %v3135_v51 = vld [vmem:[#allocation6] sm:$0xff] }
 0x666   : > { %v3818_v10 = vsel %vm495_vm6, %v3130_v54, %v3734_v2 }
 0x668   : > { %v6690_v20 = vpop.permute.xlu1 %3735 }
 0x669   : > { %v6692_v39 = vpop.permute.xlu0 %3737  ;;  %v3819_v29 = vsel %vm495_vm6, %v3131_v35, %v6690_v20  ;;  %v3136_v35 = vld [vmem:[#allocation6 + $0x8] sm:$0xff] }
 0x66c   : > { %v6694_v49 = vpop.permute.xlu1 %3739 }
 0x66d   : > { %v6696_v15 = vpop.permute.xlu0 %3741 }
 0x680   : > { %v3760_v27 = vpop.permute.xlu1 %3759 }
 0x681   : > { %v3762_v25 = vpop.permute.xlu0 %3761  ;;  %v3824_v36 = vsel %vm3823_vm14, %v3815_v1, %v3760_v27 }
 0x682   : > { %v3825_v48 = vsel %vm3823_vm14, %v3816_v34, %v3762_v25  ;;  %v3132_v34 = vmul.f32 %v6588_v50, %v3084_v45 }
 0x684   : > { %v3764_v42 = vpop.permute.xlu1 %3763 }
 0x685   : > { %v3766_v43 = vpop.permute.xlu0 %3765  ;;  %v3826_v27 = vsel %vm3823_vm14, %v3817_v9, %v3764_v42 }
 0x686   : > { %v3827_v13 = vsel %vm3823_vm14, %v3818_v10, %v3766_v43 }
 0x688   : > { %v6698_v28 = vpop.permute.xlu1 %3767 }
 0x689   : > { %v6700_v32 = vpop.permute.xlu0 %3769  ;;  %v3828_v50 = vsel %vm3823_vm14, %v3819_v29, %v6698_v28 }
 0x68c   : > { %v6702_v30 = vpop.permute.xlu1 %3771 }
 0x68d   : > { %v6704_v46 = vpop.permute.xlu0 %3863 }
 0x690   : > { %v6706_v23 = vpop.permute.xlu1 %3865 }
 0x691   : > { %v6708_v59 = vpop.permute.xlu0 %3867 }
 0x694   : > { %v6710_v0 = vpop.permute.xlu1 %3869 }
 0x695   : > { %v6712_v57 = vpop.permute.xlu0 %3871 }
 0x698   : > { %v6714_v38 = vpop.permute.xlu1 %3873 }
 0x699   : > { %v6716_v22 = vpop.permute.xlu0 %3875 }
 0x69c   : > { %v6718_v63 = vpop.permute.xlu1 %3877 }
 0x69d   : > { %v6720_v44 = vpop.permute.xlu0 %3773 }
 0x6a0   : > { %v6722_v17 = vpop.permute.xlu1 %3895 }
 0x6a1   : > { %v6724_v6 = vpop.permute.xlu0 %3897 }
 0x6a4   : > { %v6726_v11 = vpop.permute.xlu1 %3899 }
 0x6a5   : > { %v6728_v55 = vpop.permute.xlu0 %3901 }
 0x6a8   : > { %v6730_v37 = vpop.permute.xlu1 %3903 }
 0x6a9   : > { %v6732_v41 = vpop.permute.xlu0 %3905 }
 0x6ac   : > { %v6734_v56 = vpop.permute.xlu1 %3907 }
 0x6ad   : > { %v6737_v47 = vpop.permute.xlu0 %3909 }
 0x6b0   : > { %v3792_v21 = vpop.permute.xlu1 %3791 }
 0x6b1   : > { %v3833_v12 = vsel %vm3832_vm15, %v3824_v36, %v3792_v21  ;;  %v3794_v7 = vpop.permute.xlu0 %3793  ;;  %v3085_v36 = vld [vmem:[#allocation5 + $0x30] sm:$0xff]  ;;  %v3820_v21 = vsel %vm495_vm6, %v3132_v34, %v6692_v39 }
 0x6b2   : > { %v6753_v40 = vadd.f32 %v6744_v26, %v3833_v12  ;;  %v3834_v18 = vsel %vm3832_vm15, %v3825_v48, %v3794_v7  ;;  %v3133_v48 = vmul.f32 %v6590_v52, %v3085_v36  ;;  %v3086_v12 = vld [vmem:[#allocation5 + $0x38] sm:$0xff]  ;;  %v3829_v20 = vsel %vm3823_vm14, %v3820_v21, %v6700_v32 }
 0x6b3   : > { %v6764_v58 = vadd.f32 %v6744_v26, %v3834_v18  ;;  %v3134_v9 = vmul.f32 %v6592_v16, %v3086_v12 }
 0x6b4   : > { %v4007_v25 = vmax.f32 %v6753_v40, 0.0  ;;  %v3796_v8 = vpop.permute.xlu1 %3795  ;;  %v3821_v52 = vsel %vm495_vm6, %v3133_v48, %v6694_v49  ;;  %v3139_v48 = vld [vmem:[#allocation6 + $0x20] sm:$0xff] }
 0x6b5   : > { %v4008_v60 = vmax.f32 %v6764_v58, 0.0  ;;  %v3835_v1 = vsel %vm3832_vm15, %v3826_v27, %v3796_v8  ;;  %v3798_v24 = vpop.permute.xlu0 %3797  ;;  %v3822_v10 = vsel %vm495_vm6, %v3134_v9, %v6696_v15  ;;  %v3830_v16 = vsel %vm3823_vm14, %v3821_v52, %v6702_v30 }
 0x6b6   : > { %4015 = vst [vmem:[%s6761_s18] sm:$0xff] %v4007_v25  ;;  %v6776_v2 = vadd.f32 %v6744_v26, %v3835_v1  ;;  %v3836_v42 = vsel %vm3832_vm15, %v3827_v13, %v3798_v24  ;;  %v3183_v8 = vmul.f32 %v6594_v33, %v3135_v51  ;;  %v3831_v49 = vsel %vm3823_vm14, %v3822_v10, %v6720_v44  ;;  %v3137_v24 = vld [vmem:[#allocation6 + $0x10] sm:$0xff] }
 0x6b7   : > { %4016 = vst [vmem:[%s6761_s18 + $0x8] sm:$0xff] %v4008_v60  ;;  %v6783_v43 = vadd.f32 %v6744_v26, %v3836_v42  ;;  %v3184_v1 = vmul.f32 %v6596_v14, %v3136_v35  ;;  %v3185_v36 = vmul.f32 %v6598_v53, %v3137_v24  ;;  %v3187_v53 = vmul.f32 %v6607_v19, %v3139_v48  ;;  %v3141_v51 = vld [vmem:[#allocation6 + $0x30] sm:$0xff] }
 0x6b8   : > { %v4009_v31 = vmax.f32 %v6776_v2, 0.0  ;;  %v3800_v62 = vpop.permute.xlu1 %3799  ;;  %v3951_v33 = vsel %vm495_vm6, %v3183_v8, %v6704_v46  ;;  %v3138_v46 = vld [vmem:[#allocation6 + $0x18] sm:$0xff] }
 0x6b9   : > { %v4010_v7 = vmax.f32 %v6783_v43, 0.0  ;;  %v3837_v54 = vsel %vm3832_vm15, %v3828_v50, %v3800_v62  ;;  %v3802_v18 = vpop.permute.xlu0 %3801  ;;  %v3952_v34 = vsel %vm495_vm6, %v3184_v1, %v6706_v23  ;;  %v3959_v14 = vsel %vm3823_vm14, %v3951_v33, %v6722_v17 }
 0x6ba   : > { %4017 = vst [vmem:[%s6761_s18 + $0x10] sm:$0xff] %v4009_v31  ;;  %v6798_v39 = vadd.f32 %v6744_v26, %v3837_v54  ;;  %v3838_v28 = vsel %vm3832_vm15, %v3829_v20, %v3802_v18  ;;  %v3960_v21 = vsel %vm3823_vm14, %v3952_v34, %v6724_v6  ;;  %v3186_v23 = vmul.f32 %v6600_v5, %v3138_v46 }
 0x6bb   : > { %4018 = vst [vmem:[%s6761_s18 + $0x18] sm:$0xff] %v4010_v7  ;;  %v6805_v32 = vadd.f32 %v6744_v26, %v3838_v28  ;;  %v3953_v20 = vsel %vm495_vm6, %v3185_v36, %v6708_v59  ;;  %v3140_v59 = vld [vmem:[#allocation6 + $0x28] sm:$0xff] }
 0x6bc   : > { %v4011_v27 = vmax.f32 %v6798_v39, 0.0  ;;  %v3804_v25 = vpop.permute.xlu1 %3803  ;;  %v3954_v6 = vsel %vm495_vm6, %v3186_v23, %v6710_v0  ;;  %v3961_v7 = vsel %vm3823_vm14, %v3953_v20, %v6726_v11 }
 0x6bd   : > { %v4012_v45 = vmax.f32 %v6805_v32, 0.0  ;;  %v3839_v13 = vsel %vm3832_vm15, %v3830_v16, %v3804_v25  ;;  %v3806_v60 = vpop.permute.xlu0 %3805  ;;  %v3962_v9 = vsel %vm3823_vm14, %v3954_v6, %v6728_v55 }
 0x6be   : > { %4019 = vst [vmem:[%s6761_s18 + $0x20] sm:$0xff] %v4011_v27  ;;  %v6820_v15 = vadd.f32 %v6744_v26, %v3839_v13  ;;  %v3840_v30 = vsel %vm3832_vm15, %v3831_v49, %v3806_v60  ;;  %v3189_v27 = vmul.f32 %v6614_v4, %v3141_v51  ;;  %v3142_v13 = vld [vmem:[#allocation6 + $0x38] sm:$0xff] }
 0x6bf   : > { %4020 = vst [vmem:[%s6761_s18 + $0x28] sm:$0xff] %v4012_v45  ;;  %v6827_v44 = vadd.f32 %v6744_v26, %v3840_v30 }
 0x6c0   : > { %v4013_v42 = vmax.f32 %v6820_v15, 0.0  ;;  %v3928_v29 = vpop.permute.xlu1 %3927 }
 0x6c1   : > { %v4014_v50 = vmax.f32 %v6827_v44, 0.0  ;;  %v3967_v31 = vsel %vm3832_vm15, %v3959_v14, %v3928_v29  ;;  %v3930_v62 = vpop.permute.xlu0 %3929 }
 0x6c2   : > { %4021 = vst [vmem:[%s6761_s18 + $0x30] sm:$0xff] %v4013_v42  ;;  %v3975_v17 = vadd.f32 %v6744_v26, %v3967_v31  ;;  %v3968_v12 = vsel %vm3832_vm15, %v3960_v21, %v3930_v62 }
 0x6c3   : > { %4022 = vst [vmem:[%s6761_s18 + $0x38] sm:$0xff] %v4014_v50  ;;  %v3976_v5 = vadd.f32 %v6744_v26, %v3968_v12 }
 0x6c4   : > { %v3983_v19 = vsub.f32 %v6753_v40, %v3975_v17  ;;  %v4023_v54 = vmax.f32 %v3975_v17, 0.0  ;;  %v3932_v18 = vpop.permute.xlu1 %3931  ;;  %v3188_v40 = vmul.f32 %v6610_v3, %v3140_v59 }
 0x6c5   : > { %v3984_v28 = vsub.f32 %v6764_v58, %v3976_v5  ;;  %v4024_v0 = vmax.f32 %v3976_v5, 0.0  ;;  %v3969_v11 = vsel %vm3832_vm15, %v3961_v7, %v3932_v18  ;;  %v3934_v52 = vpop.permute.xlu0 %3933  ;;  %v3955_v58 = vsel %vm495_vm6, %v3187_v53, %v6712_v57 }
 0x6c6   : > { %v3991_v10 = vmax.f32 %v3983_v19, 0.0  ;;  %4031 = vst [vmem:[%s6851_s21] sm:$0xff] %v4023_v54  ;;  %v3977_v55 = vadd.f32 %v6744_v26, %v3969_v11  ;;  %v3970_v16 = vsel %vm3832_vm15, %v3962_v9, %v3934_v52  ;;  %v3956_v3 = vsel %vm495_vm6, %v3188_v40, %v6714_v38 }
 0x6c7   : > { %v3992_v25 = vmax.f32 %v3984_v28, 0.0  ;;  %4032 = vst [vmem:[%s6851_s21 + $0x8] sm:$0xff] %v4024_v0  ;;  %v3978_v8 = vadd.f32 %v6744_v26, %v3970_v16  ;;  %v3963_v35 = vsel %vm3823_vm14, %v3955_v58, %v6730_v37  ;;  %v3964_v57 = vsel %vm3823_vm14, %v3956_v3, %v6732_v41 }
 0x6c8   : > { %3999 = vst [vmem:[%s6865_s24] sm:$0xff] %v3991_v10  ;;  %v3985_v49 = vsub.f32 %v6776_v2, %v3977_v55  ;;  %v4025_v45 = vmax.f32 %v3977_v55, 0.0  ;;  %v3936_v4 = vpop.permute.xlu1 %3935  ;;  %v3190_v37 = vmul.f32 %v6616_v61, %v3142_v13  ;;  %v3957_v41 = vsel %vm495_vm6, %v3189_v27, %v6716_v22 }
 0x6c9   : > { %4000 = vst [vmem:[%s6865_s24 + $0x8] sm:$0xff] %v3992_v25  ;;  %v3986_v60 = vsub.f32 %v6783_v43, %v3978_v8  ;;  %v4026_v1 = vmax.f32 %v3978_v8, 0.0  ;;  %v3971_v38 = vsel %vm3832_vm15, %v3963_v35, %v3936_v4  ;;  %v3938_v30 = vpop.permute.xlu0 %3937  ;;  %v3965_v61 = vsel %vm3823_vm14, %v3957_v41, %v6734_v56 }
 0x6ca   : > { %v3993_v33 = vmax.f32 %v3985_v49, 0.0  ;;  %4033 = vst [vmem:[%s6851_s21 + $0x10] sm:$0xff] %v4025_v45  ;;  %v3979_v2 = vadd.f32 %v6744_v26, %v3971_v38  ;;  %v3972_v24 = vsel %vm3832_vm15, %v3964_v57, %v3938_v30  ;;  %v3958_v14 = vsel %vm495_vm6, %v3190_v37, %v6718_v63 }
 0x6cb   : > { %v3994_v34 = vmax.f32 %v3986_v60, 0.0  ;;  %4034 = vst [vmem:[%s6851_s21 + $0x18] sm:$0xff] %v4026_v1  ;;  %v3980_v43 = vadd.f32 %v6744_v26, %v3972_v24  ;;  %v3966_v22 = vsel %vm3823_vm14, %v3958_v14, %v6737_v47 }
 0x6cc   : > { %4001 = vst [vmem:[%s6865_s24 + $0x10] sm:$0xff] %v3993_v33  ;;  %v3987_v42 = vsub.f32 %v6798_v39, %v3979_v2  ;;  %v4027_v29 = vmax.f32 %v3979_v2, 0.0  ;;  %v3940_v36 = vpop.permute.xlu1 %3939 }
 0x6cd   : > { %4002 = vst [vmem:[%s6865_s24 + $0x18] sm:$0xff] %v3994_v34  ;;  %v3988_v46 = vsub.f32 %v6805_v32, %v3980_v43  ;;  %v4028_v21 = vmax.f32 %v3980_v43, 0.0  ;;  %v3973_v63 = vsel %vm3832_vm15, %v3965_v61, %v3940_v36  ;;  %v3942_v50 = vpop.permute.xlu0 %3941 }
 0x6ce   : > { %v3995_v56 = vmax.f32 %v3987_v42, 0.0  ;;  %4035 = vst [vmem:[%s6851_s21 + $0x20] sm:$0xff] %v4027_v29  ;;  %v3981_v39 = vadd.f32 %v6744_v26, %v3973_v63  ;;  %v3974_v31 = vsel %vm3832_vm15, %v3966_v22, %v3942_v50 }
 0x6cf   : > { %v3996_v62 = vmax.f32 %v3988_v46, 0.0  ;;  %4036 = vst [vmem:[%s6851_s21 + $0x28] sm:$0xff] %v4028_v21  ;;  %v3982_v47 = vadd.f32 %v6744_v26, %v3974_v31 }
 0x6d0   : > { %4003 = vst [vmem:[%s6865_s24 + $0x20] sm:$0xff] %v3995_v56  ;;  %v3989_v32 = vsub.f32 %v6820_v15, %v3981_v39  ;;  %v4029_v23 = vmax.f32 %v3981_v39, 0.0 }
 0x6d1   : > { %4004 = vst [vmem:[%s6865_s24 + $0x28] sm:$0xff] %v3996_v62  ;;  %v3990_v48 = vsub.f32 %v6827_v44, %v3982_v47  ;;  %v4030_v17 = vmax.f32 %v3982_v47, 0.0 }
 0x6d2   : > { %v3997_v12 = vmax.f32 %v3989_v32, 0.0  ;;  %4037 = vst [vmem:[%s6851_s21 + $0x30] sm:$0xff] %v4029_v23 }
 0x6d3   : > { %v3998_v53 = vmax.f32 %v3990_v48, 0.0  ;;  %4038 = vst [vmem:[%s6851_s21 + $0x38] sm:$0xff] %v4030_v17 }
 0x6d4   : > { %4005 = vst [vmem:[%s6865_s24 + $0x30] sm:$0xff] %v3997_v12 }
 0x6d5   : > { %4006 = vst [vmem:[%s6865_s24 + $0x38] sm:$0xff] %v3998_v53 }
 0x6d6 PF: > { %s18_s26 = sadd.s32 1, %s4874_s26   ;;  %s7094_s24 = smov %s4870_s25 }
 0x6d7   : > { %p15_p6 = scmp.ge.s32.totalorder %s18_s26, 4   ;;  %s7095_s25 = smov %s7097_s27 }
 0x6d9   :  { %17 = sbr.rel (!%p15_p6) target bundleno = 2 (0x2), region = 129 }

</bundles_post_ra>
